<compile_context>
chip_gen: v7x
topology: tpu7x:2x2x1
jax: 0.10.0
libtpu: 0.0.40
codegen_flags: <defaults>
</compile_context>

<pallas_src>
import jax
import jax.numpy as jnp
from jax import lax
from jax.experimental import pallas as pl
from jax.experimental.pallas import tpu as pltpu


# ----------------------------------------------------------------------------
# Pallas kernel: full bidirectional GRU + final fc for one 8-row batch slab.
# ----------------------------------------------------------------------------
def _bigru_encoder_kernel(
    # inputs
    emb_ref,   # (T*8, E_pad)        embedded tokens, row = t*8 + local_batch
    wih_ref,   # (E_pad, 6*H_pad)    [fwd r,z,n | bwd r,z,n] input weights
    bih_ref,   # (1, 6*H_pad)        input biases, both directions
    whh_ref,   # (2*H_pad, 6*H_pad)  block-diagonal [fwd | bwd] hidden weights
    bhh_ref,   # (1, 6*H_pad)        hidden biases, both directions
    wfc_ref,   # (2*H_pad, D_pad)    fc weight (rows: [h_fwd | h_bwd])
    bfc_ref,   # (1, D_pad)          fc bias
    # outputs
    out_ref,   # (T*8, 2*H_pad)      per-step [h_fwd_t | h_bwd_t]
    hid_ref,   # (8, D_pad)          tanh(fc(cat(h_fwd_final, h_bwd_final)))
    # scratch
    gi_ref,    # VMEM (T*8, 6*H_pad) f32 -- precomputed input projections
    h_ref,     # VMEM (8, 2*H_pad)   f32 -- [h_fwd | h_bwd] carry
):
    Bp = h_ref.shape[0]            # 8
    Hp = h_ref.shape[1] // 2       # padded hidden size (multiple of 128)
    G = 3 * Hp                     # gate width per direction
    T = gi_ref.shape[0] // Bp      # number of time steps

    # -- one large MXU matmul: input projection for every step, both dirs ----
    gi_ref[...] = (
        jnp.dot(emb_ref[...], wih_ref[...], preferred_element_type=jnp.float32)
        + bih_ref[...])

    # fresh hidden state for this batch slab
    h_ref[...] = jnp.zeros_like(h_ref)

    # loop constants hoisted out of the recurrence (no per-iter broadcasts)
    whh = whh_ref[...]
    bhh = jnp.broadcast_to(bhh_ref[...], (Bp, 2 * G))

    def _gates(gi, gh, h_prev):
        # PyTorch GRU gate order: r, z, n (all slices 128-lane aligned)
        r = jax.nn.sigmoid(gi[:, 0:Hp] + gh[:, 0:Hp])
        z = jax.nn.sigmoid(gi[:, Hp:2 * Hp] + gh[:, Hp:2 * Hp])
        n = jnp.tanh(gi[:, 2 * Hp:3 * Hp] + r * gh[:, 2 * Hp:3 * Hp])
        return (1.0 - z) * n + z * h_prev

    def _step(t, carry):
        tb = T - 1 - t
        rf = pl.multiple_of(t * Bp, Bp)
        rb = pl.multiple_of(tb * Bp, Bp)
        # single fused hidden matmul for both directions (block-diagonal Whh)
        gh = jnp.dot(h_ref[...], whh, preferred_element_type=jnp.float32) + bhh
        gi_f = gi_ref[pl.ds(rf, Bp), 0:G]          # forward uses time t
        gi_b = gi_ref[pl.ds(rb, Bp), G:2 * G]      # backward uses time T-1-t
        h_f = _gates(gi_f, gh[:, 0:G], h_ref[:, 0:Hp])
        h_b = _gates(gi_b, gh[:, G:2 * G], h_ref[:, Hp:2 * Hp])
        h_ref[:, 0:Hp] = h_f
        h_ref[:, Hp:2 * Hp] = h_b
        # lane-dense combined output: full (8, 128) unmasked stores
        out_ref[pl.ds(rf, Bp), 0:Hp] = h_f.astype(out_ref.dtype)
        out_ref[pl.ds(rb, Bp), Hp:2 * Hp] = h_b.astype(out_ref.dtype)
        return carry

    lax.fori_loop(0, T, _step, 0, unroll=True)

    # hidden = tanh(fc(cat(h_fwd_final, h_bwd_final)))
    hid = jnp.tanh(
        jnp.dot(h_ref[...], wfc_ref[...], preferred_element_type=jnp.float32)
        + bfc_ref[...])
    hid_ref[...] = hid.astype(hid_ref.dtype)


# ----------------------------------------------------------------------------
# Wrapper
# ----------------------------------------------------------------------------
def _round_up(x, m):
    return (x + m - 1) // m * m


@jax.jit
def encoder_forward(src, params):
    """src: (T, B) int32.  Returns (outputs (T, B, 2H), hidden (B, D))."""
    E = params["emb"].shape[1]
    H = params["whh_f_T"].shape[0]
    D = params["wfc_T"].shape[1]
    T, B = src.shape

    B_pad = _round_up(B, 8)
    nb = B_pad // 8
    E_pad = _round_up(E, 128)
    H_pad = _round_up(H, 128)
    D_pad = _round_up(D, 128)
    G = 3 * H_pad

    # ---- embedding gather (XLA glue; dropout == identity in eval mode) ----
    emb = params["emb"][src].astype(jnp.float32)                 # (T, B, E)
    emb_p = jnp.zeros((T, B_pad, E_pad), jnp.float32).at[:, :B, :E].set(emb)
    # batch-slab-major layout: row = slab*(T*8) + t*8 + local_batch
    emb_slab = (emb_p.reshape(T, nb, 8, E_pad)
                     .transpose(1, 0, 2, 3)
                     .reshape(nb * T * 8, E_pad))

    # ---- pack padded / fused weights (tiny one-time glue) -----------------
    wih = jnp.zeros((E_pad, 2 * G), jnp.float32)
    bih = jnp.zeros((1, 2 * G), jnp.float32)
    whh = jnp.zeros((2 * H_pad, 2 * G), jnp.float32)
    bhh = jnp.zeros((1, 2 * G), jnp.float32)
    wih_d = (params["wih_f_T"], params["wih_b_T"])
    bih_d = (params["bih_f"], params["bih_b"])
    whh_d = (params["whh_f_T"], params["whh_b_T"])
    bhh_d = (params["bhh_f"], params["bhh_b"])
    for d in range(2):
        for g in range(3):
            col = d * G + g * H_pad
            gcols = slice(g * H, (g + 1) * H)
            wih = wih.at[:E, col:col + H].set(wih_d[d][:, gcols])
            bih = bih.at[:, col:col + H].set(bih_d[d][:, gcols])
            whh = whh.at[d * H_pad:d * H_pad + H, col:col + H].set(
                whh_d[d][:, gcols])
            bhh = bhh.at[:, col:col + H].set(bhh_d[d][:, gcols])
    wfc = jnp.zeros((2 * H_pad, D_pad), jnp.float32)
    wfc = wfc.at[:H, :D].set(params["wfc_T"][:H])
    wfc = wfc.at[H_pad:H_pad + H, :D].set(params["wfc_T"][H:])
    bfc = jnp.zeros((1, D_pad), jnp.float32).at[:, :D].set(params["bfc"])

    TB8 = T * 8
    grid_spec = pltpu.PrefetchScalarGridSpec(
        num_scalar_prefetch=0,
        grid=(nb,),                                        # batch slabs only
        in_specs=[
            pl.BlockSpec((TB8, E_pad), lambda b: (b, 0)),          # emb slab
            pl.BlockSpec((E_pad, 2 * G), lambda b: (0, 0)),        # wih (both)
            pl.BlockSpec((1, 2 * G), lambda b: (0, 0)),            # bih
            pl.BlockSpec((2 * H_pad, 2 * G), lambda b: (0, 0)),    # whh blkdiag
            pl.BlockSpec((1, 2 * G), lambda b: (0, 0)),            # bhh
            pl.BlockSpec((2 * H_pad, D_pad), lambda b: (0, 0)),    # wfc
            pl.BlockSpec((1, D_pad), lambda b: (0, 0)),            # bfc
        ],
        out_specs=[
            pl.BlockSpec((TB8, 2 * H_pad), lambda b: (b, 0)),      # outputs
            pl.BlockSpec((8, D_pad), lambda b: (b, 0)),            # final hidden
        ],
        scratch_shapes=[
            pltpu.VMEM((TB8, 2 * G), jnp.float32),   # gi for all steps
            pltpu.VMEM((8, 2 * H_pad), jnp.float32), # [h_fwd | h_bwd] carry
        ],
    )

    out2d, hid2d = pl.pallas_call(
        _bigru_encoder_kernel,
        out_shape=[
            jax.ShapeDtypeStruct((nb * TB8, 2 * H_pad), jnp.float32),
            jax.ShapeDtypeStruct((B_pad, D_pad), jnp.float32),
        ],
        grid_spec=grid_spec,
        compiler_params=pltpu.CompilerParams(
            dimension_semantics=("parallel",),      # batch slabs independent
            vmem_limit_bytes=32 * 1024 * 1024),
    )(emb_slab, wih, bih, whh, bhh, wfc, bfc)

    # ---- unpack padded / slab layout back to (T, B, 2H) and (B, D) --------
    out_p = (out2d.reshape(nb, T, 8, 2 * H_pad)
                  .transpose(1, 0, 2, 3)
                  .reshape(T, B_pad, 2 * H_pad))
    outputs = jnp.concatenate(
        [out_p[:, :B, :H], out_p[:, :B, H_pad:H_pad + H]], axis=-1)
    hidden = hid2d[:B, :D]
    return outputs, hidden


# ----------------------------------------------------------------------------
# Pure-JAX reference (lax.scan) for a correctness check
# ----------------------------------------------------------------------------
def encoder_reference(src, params):
    emb = params["emb"][src].astype(jnp.float32)
    H = params["whh_f_T"].shape[0]
    B = emb.shape[1]

    def cell(x, h, wih_t, whh_t, bih, bhh):
        gi = x @ wih_t + bih
        gh = h @ whh_t + bhh
        r = jax.nn.sigmoid(gi[:, :H] + gh[:, :H])
        z = jax.nn.sigmoid(gi[:, H:2 * H] + gh[:, H:2 * H])
        n = jnp.tanh(gi[:, 2 * H:] + r * gh[:, 2 * H:])
        return (1.0 - z) * n + z * h

    h0 = jnp.zeros((B, H), jnp.float32)

    def step_f(h, x):
        hn = cell(x, h, params["wih_f_T"], params["whh_f_T"],
                  params["bih_f"], params["bhh_f"])
        return hn, hn

    def step_b(h, x):
        hn = cell(x, h, params["wih_b_T"], params["whh_b_T"],
                  params["bih_b"], params["bhh_b"])
        return hn, hn

    h_f, out_f = jax.lax.scan(step_f, h0, emb)
    h_b, out_b_rev = jax.lax.scan(step_b, h0, emb[::-1])
    out_b = out_b_rev[::-1]
    outputs = jnp.concatenate([out_f, out_b], axis=-1)
    hidden = jnp.tanh(
        jnp.concatenate([h_f, h_b], axis=1) @ params["wfc_T"] + params["bfc"])
    return outputs, hidden


# ----------------------------------------------------------------------------
# Deterministic parameter init (PyTorch-style, stored pre-transposed)
# ----------------------------------------------------------------------------
def init_params(key, input_dim, embedding_dim, enc_hidden, dec_hidden):
    ks = jax.random.split(key, 12)
    H, E, D = enc_hidden, embedding_dim, dec_hidden
    k = 1.0 / jnp.sqrt(H)
    kfc = 1.0 / jnp.sqrt(2.0 * H)
    u = lambda kk, shape, bound: jax.random.uniform(
        kk, shape, jnp.float32, -bound, bound)
    return {
        "emb": jax.random.normal(ks[0], (input_dim, E), jnp.float32),
        # forward direction (stored transposed: x @ W^T == x @ W_T)
        "wih_f_T": u(ks[1], (E, 3 * H), k),
        "whh_f_T": u(ks[2], (H, 3 * H), k),
        "bih_f":   u(ks[3], (1, 3 * H), k),
        "bhh_f":   u(ks[4], (1, 3 * H), k),
        # backward direction
        "wih_b_T": u(ks[5], (E, 3 * H), k),
        "whh_b_T": u(ks[6], (H, 3 * H), k),
        "bih_b":   u(ks[7], (1, 3 * H), k),
        "bhh_b":   u(ks[8], (1, 3 * H), k),
        # fc: Linear(2H -> D)
        "wfc_T": u(ks[9], (2 * H, D), kfc),
        "bfc":   u(ks[10], (1, D), kfc),
    }


if __name__ == "__main__":
    INPUT_DIM = 50      # vocab size
    EMB_DIM = 32
    ENC_HID = 32
    DEC_HID = 32
    T, B = 8, 2         # seq_len, batch

    key = jax.random.PRNGKey(0)
    kp, ks = jax.random.split(key)
    params = init_params(kp, INPUT_DIM, EMB_DIM, ENC_HID, DEC_HID)
    src = jax.random.randint(ks, (T, B), 0, INPUT_DIM, dtype=jnp.int32)

    outputs, hidden = encoder_forward(src, params)
    jax.block_until_ready((outputs, hidden))

    ref_out, ref_hid = encoder_reference(src, params)
    assert outputs.shape == (T, B, 2 * ENC_HID)
    assert hidden.shape == (B, DEC_HID)
    assert jnp.max(jnp.abs(outputs - ref_out)) < 2e-2
    assert jnp.max(jnp.abs(hidden - ref_hid)) < 2e-2

    print("KERNEL_OK")
</pallas_src>

<mosaic_0001>
module attributes {stable_mosaic.version = 11 : i64} {
  func.func @_bigru_encoder_kernel(%arg0: i32, %arg1: memref<64x128xf32, #tpu.memory_space<vmem>>, %arg2: memref<128x768xf32, #tpu.memory_space<vmem>>, %arg3: memref<1x768xf32, #tpu.memory_space<vmem>>, %arg4: memref<256x768xf32, #tpu.memory_space<vmem>>, %arg5: memref<1x768xf32, #tpu.memory_space<vmem>>, %arg6: memref<256x128xf32, #tpu.memory_space<vmem>>, %arg7: memref<1x128xf32, #tpu.memory_space<vmem>>, %arg8: memref<64x256xf32, #tpu.memory_space<vmem>>, %arg9: memref<8x128xf32, #tpu.memory_space<vmem>>, %arg10: memref<64x768xf32, #tpu.memory_space<vmem>>, %arg11: memref<8x256xf32, #tpu.memory_space<vmem>>) attributes {dimension_semantics = [#tpu.dimension_semantics<parallel>], iteration_bounds = array<i64: 1>, scalar_prefetch = 0 : i64, scratch_operands = 2 : i64, tpu.core_type = #tpu.core_type<tc>, window_params = [{transform_indices = @transform_0, window_bounds = array<i64: 64, 128>}, {pipeline_mode = #tpu.pipeline_mode<synchronous>, transform_indices = @transform_1, window_bounds = array<i64: 128, 768>}, {pipeline_mode = #tpu.pipeline_mode<synchronous>, transform_indices = @transform_2, window_bounds = array<i64: 1, 768>}, {pipeline_mode = #tpu.pipeline_mode<synchronous>, transform_indices = @transform_3, window_bounds = array<i64: 256, 768>}, {pipeline_mode = #tpu.pipeline_mode<synchronous>, transform_indices = @transform_4, window_bounds = array<i64: 1, 768>}, {pipeline_mode = #tpu.pipeline_mode<synchronous>, transform_indices = @transform_5, window_bounds = array<i64: 256, 128>}, {pipeline_mode = #tpu.pipeline_mode<synchronous>, transform_indices = @transform_6, window_bounds = array<i64: 1, 128>}, {transform_indices = @transform_7, window_bounds = array<i64: 64, 256>}, {transform_indices = @transform_8, window_bounds = array<i64: 8, 128>}]} {
    %c0 = arith.constant 0 : index
    %c0_0 = arith.constant 0 : index
    %0 = vector.load %arg1[%c0, %c0_0] : memref<64x128xf32, #tpu.memory_space<vmem>>, vector<64x128xf32>
    %c0_1 = arith.constant 0 : index
    %c0_2 = arith.constant 0 : index
    %1 = vector.load %arg2[%c0_1, %c0_2] : memref<128x768xf32, #tpu.memory_space<vmem>>, vector<128x768xf32>
    %cst = arith.constant dense<0.000000e+00> : vector<64x768xf32>
    %2 = tpu.matmul %0, %1, %cst {dimension_numbers = #tpu.dot_dimension_numbers<[1], [0], [0], [1], [0, 0, 1, 1], [], []>} : vector<64x128xf32>, vector<128x768xf32>, vector<64x768xf32> -> vector<64x768xf32>
    %c0_3 = arith.constant 0 : index
    %c0_4 = arith.constant 0 : index
    %3 = vector.load %arg3[%c0_3, %c0_4] : memref<1x768xf32, #tpu.memory_space<vmem>>, vector<1x768xf32>
    %4 = vector.broadcast %3 : vector<1x768xf32> to vector<64x768xf32>
    %5 = arith.addf %2, %4 : vector<64x768xf32>
    %c0_5 = arith.constant 0 : index
    %c0_6 = arith.constant 0 : index
    %6 = vector.load %arg10[%c0_5, %c0_6] : memref<64x768xf32, #tpu.memory_space<vmem>>, vector<64x768xf32>
    tpu.vector_store %arg10[%c0_5, %c0_6], %5 {strides = array<i32>} : memref<64x768xf32, #tpu.memory_space<vmem>>, vector<64x768xf32>,
    %cst_7 = arith.constant 0.000000e+00 : f32
    %7 = vector.broadcast %cst_7 : f32 to vector<8x256xf32>
    %c0_8 = arith.constant 0 : index
    %c0_9 = arith.constant 0 : index
    %8 = vector.load %arg11[%c0_8, %c0_9] : memref<8x256xf32, #tpu.memory_space<vmem>>, vector<8x256xf32>
    tpu.vector_store %arg11[%c0_8, %c0_9], %7 {strides = array<i32>} : memref<8x256xf32, #tpu.memory_space<vmem>>, vector<8x256xf32>,
    %c0_10 = arith.constant 0 : index
    %c0_11 = arith.constant 0 : index
    %9 = vector.load %arg4[%c0_10, %c0_11] : memref<256x768xf32, #tpu.memory_space<vmem>>, vector<256x768xf32>
    %c0_12 = arith.constant 0 : index
    %c0_13 = arith.constant 0 : index
    %10 = vector.load %arg5[%c0_12, %c0_13] : memref<1x768xf32, #tpu.memory_space<vmem>>, vector<1x768xf32>
    %11 = vector.shape_cast %10 : vector<1x768xf32> to vector<1x768xf32>
    %12 = vector.broadcast %11 : vector<1x768xf32> to vector<8x768xf32>
    %c0_i32 = arith.constant 0 : i32
    %c7_i32 = arith.constant 7 : i32
    %13 = arith.subi %c7_i32, %c0_i32 : i32
    %c8_i32 = arith.constant 8 : i32
    %14 = arith.muli %c0_i32, %c8_i32 : i32
    %15 = tpu.assume_multiple %14, 8 : i32
    %c8_i32_14 = arith.constant 8 : i32
    %16 = arith.muli %13, %c8_i32_14 : i32
    %17 = tpu.assume_multiple %16, 8 : i32
    %c0_15 = arith.constant 0 : index
    %c0_16 = arith.constant 0 : index
    %18 = vector.load %arg11[%c0_15, %c0_16] : memref<8x256xf32, #tpu.memory_space<vmem>>, vector<8x256xf32>
    %cst_17 = arith.constant dense<0.000000e+00> : vector<8x768xf32>
    %19 = tpu.matmul %18, %9, %cst_17 {dimension_numbers = #tpu.dot_dimension_numbers<[1], [0], [0], [1], [0, 0, 1, 1], [], []>} : vector<8x256xf32>, vector<256x768xf32>, vector<8x768xf32> -> vector<8x768xf32>
    %20 = arith.addf %19, %12 : vector<8x768xf32>
    %21 = arith.index_cast %15 : i32 to index
    %c0_18 = arith.constant 0 : index
    %22 = vector.load %arg10[%21, %c0_18] : memref<64x768xf32, #tpu.memory_space<vmem>>, vector<8x384xf32>
    %23 = arith.index_cast %17 : i32 to index
    %c384 = arith.constant 384 : index
    %24 = vector.load %arg10[%23, %c384] : memref<64x768xf32, #tpu.memory_space<vmem>>, vector<8x384xf32>
    %25 = vector.extract_strided_slice %20 {offsets = [0, 0], sizes = [8, 384], strides = [1, 1]} : vector<8x768xf32> to vector<8x384xf32>
    %c0_19 = arith.constant 0 : index
    %c0_20 = arith.constant 0 : index
    %26 = vector.load %arg11[%c0_19, %c0_20] : memref<8x256xf32, #tpu.memory_space<vmem>>, vector<8x128xf32>
    %27 = vector.extract_strided_slice %22 {offsets = [0, 0], sizes = [8, 128], strides = [1, 1]} : vector<8x384xf32> to vector<8x128xf32>
    %28 = vector.extract_strided_slice %25 {offsets = [0, 0], sizes = [8, 128], strides = [1, 1]} : vector<8x384xf32> to vector<8x128xf32>
    %29 = arith.addf %27, %28 : vector<8x128xf32>
    %30 = arith.negf %29 : vector<8x128xf32>
    %31 = math.exp %30 : vector<8x128xf32>
    %cst_21 = arith.constant 1.000000e+00 : f32
    %32 = vector.broadcast %cst_21 : f32 to vector<8x128xf32>
    %33 = arith.addf %32, %31 : vector<8x128xf32>
    %34 = arith.divf %32, %33 : vector<8x128xf32>
    %35 = vector.extract_strided_slice %22 {offsets = [0, 128], sizes = [8, 128], strides = [1, 1]} : vector<8x384xf32> to vector<8x128xf32>
    %36 = vector.extract_strided_slice %25 {offsets = [0, 128], sizes = [8, 128], strides = [1, 1]} : vector<8x384xf32> to vector<8x128xf32>
    %37 = arith.addf %35, %36 : vector<8x128xf32>
    %38 = arith.negf %37 : vector<8x128xf32>
    %39 = math.exp %38 : vector<8x128xf32>
    %cst_22 = arith.constant 1.000000e+00 : f32
    %40 = vector.broadcast %cst_22 : f32 to vector<8x128xf32>
    %41 = arith.addf %40, %39 : vector<8x128xf32>
    %42 = arith.divf %40, %41 : vector<8x128xf32>
    %43 = vector.extract_strided_slice %22 {offsets = [0, 256], sizes = [8, 128], strides = [1, 1]} : vector<8x384xf32> to vector<8x128xf32>
    %44 = vector.extract_strided_slice %25 {offsets = [0, 256], sizes = [8, 128], strides = [1, 1]} : vector<8x384xf32> to vector<8x128xf32>
    %45 = arith.mulf %34, %44 : vector<8x128xf32>
    %46 = arith.addf %43, %45 : vector<8x128xf32>
    %47 = math.tanh %46 : vector<8x128xf32>
    %cst_23 = arith.constant 1.000000e+00 : f32
    %48 = vector.broadcast %cst_23 : f32 to vector<8x128xf32>
    %49 = arith.subf %48, %42 : vector<8x128xf32>
    %50 = arith.mulf %49, %47 : vector<8x128xf32>
    %51 = arith.mulf %42, %26 : vector<8x128xf32>
    %52 = arith.addf %50, %51 : vector<8x128xf32>
    %53 = vector.extract_strided_slice %20 {offsets = [0, 384], sizes = [8, 384], strides = [1, 1]} : vector<8x768xf32> to vector<8x384xf32>
    %c0_24 = arith.constant 0 : index
    %c128 = arith.constant 128 : index
    %54 = vector.load %arg11[%c0_24, %c128] : memref<8x256xf32, #tpu.memory_space<vmem>>, vector<8x128xf32>
    %55 = vector.extract_strided_slice %24 {offsets = [0, 0], sizes = [8, 128], strides = [1, 1]} : vector<8x384xf32> to vector<8x128xf32>
    %56 = vector.extract_strided_slice %53 {offsets = [0, 0], sizes = [8, 128], strides = [1, 1]} : vector<8x384xf32> to vector<8x128xf32>
    %57 = arith.addf %55, %56 : vector<8x128xf32>
    %58 = arith.negf %57 : vector<8x128xf32>
    %59 = math.exp %58 : vector<8x128xf32>
    %cst_25 = arith.constant 1.000000e+00 : f32
    %60 = vector.broadcast %cst_25 : f32 to vector<8x128xf32>
    %61 = arith.addf %60, %59 : vector<8x128xf32>
    %62 = arith.divf %60, %61 : vector<8x128xf32>
    %63 = vector.extract_strided_slice %24 {offsets = [0, 128], sizes = [8, 128], strides = [1, 1]} : vector<8x384xf32> to vector<8x128xf32>
    %64 = vector.extract_strided_slice %53 {offsets = [0, 128], sizes = [8, 128], strides = [1, 1]} : vector<8x384xf32> to vector<8x128xf32>
    %65 = arith.addf %63, %64 : vector<8x128xf32>
    %66 = arith.negf %65 : vector<8x128xf32>
    %67 = math.exp %66 : vector<8x128xf32>
    %cst_26 = arith.constant 1.000000e+00 : f32
    %68 = vector.broadcast %cst_26 : f32 to vector<8x128xf32>
    %69 = arith.addf %68, %67 : vector<8x128xf32>
    %70 = arith.divf %68, %69 : vector<8x128xf32>
    %71 = vector.extract_strided_slice %24 {offsets = [0, 256], sizes = [8, 128], strides = [1, 1]} : vector<8x384xf32> to vector<8x128xf32>
    %72 = vector.extract_strided_slice %53 {offsets = [0, 256], sizes = [8, 128], strides = [1, 1]} : vector<8x384xf32> to vector<8x128xf32>
    %73 = arith.mulf %62, %72 : vector<8x128xf32>
    %74 = arith.addf %71, %73 : vector<8x128xf32>
    %75 = math.tanh %74 : vector<8x128xf32>
    %cst_27 = arith.constant 1.000000e+00 : f32
    %76 = vector.broadcast %cst_27 : f32 to vector<8x128xf32>
    %77 = arith.subf %76, %70 : vector<8x128xf32>
    %78 = arith.mulf %77, %75 : vector<8x128xf32>
    %79 = arith.mulf %70, %54 : vector<8x128xf32>
    %80 = arith.addf %78, %79 : vector<8x128xf32>
    %c0_28 = arith.constant 0 : index
    %c0_29 = arith.constant 0 : index
    %81 = vector.load %arg11[%c0_28, %c0_29] : memref<8x256xf32, #tpu.memory_space<vmem>>, vector<8x128xf32>
    tpu.vector_store %arg11[%c0_28, %c0_29], %52 {strides = array<i32>} : memref<8x256xf32, #tpu.memory_space<vmem>>, vector<8x128xf32>,
    %c0_30 = arith.constant 0 : index
    %c128_31 = arith.constant 128 : index
    %82 = vector.load %arg11[%c0_30, %c128_31] : memref<8x256xf32, #tpu.memory_space<vmem>>, vector<8x128xf32>
    tpu.vector_store %arg11[%c0_30, %c128_31], %80 {strides = array<i32>} : memref<8x256xf32, #tpu.memory_space<vmem>>, vector<8x128xf32>,
    %83 = arith.index_cast %15 : i32 to index
    %c0_32 = arith.constant 0 : index
    %84 = vector.load %arg8[%83, %c0_32] : memref<64x256xf32, #tpu.memory_space<vmem>>, vector<8x128xf32>
    tpu.vector_store %arg8[%83, %c0_32], %52 {strides = array<i32>} : memref<64x256xf32, #tpu.memory_space<vmem>>, vector<8x128xf32>,
    %85 = arith.index_cast %17 : i32 to index
    %c128_33 = arith.constant 128 : index
    %86 = vector.load %arg8[%85, %c128_33] : memref<64x256xf32, #tpu.memory_space<vmem>>, vector<8x128xf32>
    tpu.vector_store %arg8[%85, %c128_33], %80 {strides = array<i32>} : memref<64x256xf32, #tpu.memory_space<vmem>>, vector<8x128xf32>,
    %c1_i32 = arith.constant 1 : i32
    %c7_i32_34 = arith.constant 7 : i32
    %87 = arith.subi %c7_i32_34, %c1_i32 : i32
    %c8_i32_35 = arith.constant 8 : i32
    %88 = arith.muli %c1_i32, %c8_i32_35 : i32
    %89 = tpu.assume_multiple %88, 8 : i32
    %c8_i32_36 = arith.constant 8 : i32
    %90 = arith.muli %87, %c8_i32_36 : i32
    %91 = tpu.assume_multiple %90, 8 : i32
    %c0_37 = arith.constant 0 : index
    %c0_38 = arith.constant 0 : index
    %92 = vector.load %arg11[%c0_37, %c0_38] : memref<8x256xf32, #tpu.memory_space<vmem>>, vector<8x256xf32>
    %cst_39 = arith.constant dense<0.000000e+00> : vector<8x768xf32>
    %93 = tpu.matmul %92, %9, %cst_39 {dimension_numbers = #tpu.dot_dimension_numbers<[1], [0], [0], [1], [0, 0, 1, 1], [], []>} : vector<8x256xf32>, vector<256x768xf32>, vector<8x768xf32> -> vector<8x768xf32>
    %94 = arith.addf %93, %12 : vector<8x768xf32>
    %95 = arith.index_cast %89 : i32 to index
    %c0_40 = arith.constant 0 : index
    %96 = vector.load %arg10[%95, %c0_40] : memref<64x768xf32, #tpu.memory_space<vmem>>, vector<8x384xf32>
    %97 = arith.index_cast %91 : i32 to index
    %c384_41 = arith.constant 384 : index
    %98 = vector.load %arg10[%97, %c384_41] : memref<64x768xf32, #tpu.memory_space<vmem>>, vector<8x384xf32>
    %99 = vector.extract_strided_slice %94 {offsets = [0, 0], sizes = [8, 384], strides = [1, 1]} : vector<8x768xf32> to vector<8x384xf32>
    %c0_42 = arith.constant 0 : index
    %c0_43 = arith.constant 0 : index
    %100 = vector.load %arg11[%c0_42, %c0_43] : memref<8x256xf32, #tpu.memory_space<vmem>>, vector<8x128xf32>
    %101 = vector.extract_strided_slice %96 {offsets = [0, 0], sizes = [8, 128], strides = [1, 1]} : vector<8x384xf32> to vector<8x128xf32>
    %102 = vector.extract_strided_slice %99 {offsets = [0, 0], sizes = [8, 128], strides = [1, 1]} : vector<8x384xf32> to vector<8x128xf32>
    %103 = arith.addf %101, %102 : vector<8x128xf32>
    %104 = arith.negf %103 : vector<8x128xf32>
    %105 = math.exp %104 : vector<8x128xf32>
    %cst_44 = arith.constant 1.000000e+00 : f32
    %106 = vector.broadcast %cst_44 : f32 to vector<8x128xf32>
    %107 = arith.addf %106, %105 : vector<8x128xf32>
    %108 = arith.divf %106, %107 : vector<8x128xf32>
    %109 = vector.extract_strided_slice %96 {offsets = [0, 128], sizes = [8, 128], strides = [1, 1]} : vector<8x384xf32> to vector<8x128xf32>
    %110 = vector.extract_strided_slice %99 {offsets = [0, 128], sizes = [8, 128], strides = [1, 1]} : vector<8x384xf32> to vector<8x128xf32>
    %111 = arith.addf %109, %110 : vector<8x128xf32>
    %112 = arith.negf %111 : vector<8x128xf32>
    %113 = math.exp %112 : vector<8x128xf32>
    %cst_45 = arith.constant 1.000000e+00 : f32
    %114 = vector.broadcast %cst_45 : f32 to vector<8x128xf32>
    %115 = arith.addf %114, %113 : vector<8x128xf32>
    %116 = arith.divf %114, %115 : vector<8x128xf32>
    %117 = vector.extract_strided_slice %96 {offsets = [0, 256], sizes = [8, 128], strides = [1, 1]} : vector<8x384xf32> to vector<8x128xf32>
    %118 = vector.extract_strided_slice %99 {offsets = [0, 256], sizes = [8, 128], strides = [1, 1]} : vector<8x384xf32> to vector<8x128xf32>
    %119 = arith.mulf %108, %118 : vector<8x128xf32>
    %120 = arith.addf %117, %119 : vector<8x128xf32>
    %121 = math.tanh %120 : vector<8x128xf32>
    %cst_46 = arith.constant 1.000000e+00 : f32
    %122 = vector.broadcast %cst_46 : f32 to vector<8x128xf32>
    %123 = arith.subf %122, %116 : vector<8x128xf32>
    %124 = arith.mulf %123, %121 : vector<8x128xf32>
    %125 = arith.mulf %116, %100 : vector<8x128xf32>
    %126 = arith.addf %124, %125 : vector<8x128xf32>
    %127 = vector.extract_strided_slice %94 {offsets = [0, 384], sizes = [8, 384], strides = [1, 1]} : vector<8x768xf32> to vector<8x384xf32>
    %c0_47 = arith.constant 0 : index
    %c128_48 = arith.constant 128 : index
    %128 = vector.load %arg11[%c0_47, %c128_48] : memref<8x256xf32, #tpu.memory_space<vmem>>, vector<8x128xf32>
    %129 = vector.extract_strided_slice %98 {offsets = [0, 0], sizes = [8, 128], strides = [1, 1]} : vector<8x384xf32> to vector<8x128xf32>
    %130 = vector.extract_strided_slice %127 {offsets = [0, 0], sizes = [8, 128], strides = [1, 1]} : vector<8x384xf32> to vector<8x128xf32>
    %131 = arith.addf %129, %130 : vector<8x128xf32>
    %132 = arith.negf %131 : vector<8x128xf32>
    %133 = math.exp %132 : vector<8x128xf32>
    %cst_49 = arith.constant 1.000000e+00 : f32
    %134 = vector.broadcast %cst_49 : f32 to vector<8x128xf32>
    %135 = arith.addf %134, %133 : vector<8x128xf32>
    %136 = arith.divf %134, %135 : vector<8x128xf32>
    %137 = vector.extract_strided_slice %98 {offsets = [0, 128], sizes = [8, 128], strides = [1, 1]} : vector<8x384xf32> to vector<8x128xf32>
    %138 = vector.extract_strided_slice %127 {offsets = [0, 128], sizes = [8, 128], strides = [1, 1]} : vector<8x384xf32> to vector<8x128xf32>
    %139 = arith.addf %137, %138 : vector<8x128xf32>
    %140 = arith.negf %139 : vector<8x128xf32>
    %141 = math.exp %140 : vector<8x128xf32>
    %cst_50 = arith.constant 1.000000e+00 : f32
    %142 = vector.broadcast %cst_50 : f32 to vector<8x128xf32>
    %143 = arith.addf %142, %141 : vector<8x128xf32>
    %144 = arith.divf %142, %143 : vector<8x128xf32>
    %145 = vector.extract_strided_slice %98 {offsets = [0, 256], sizes = [8, 128], strides = [1, 1]} : vector<8x384xf32> to vector<8x128xf32>
    %146 = vector.extract_strided_slice %127 {offsets = [0, 256], sizes = [8, 128], strides = [1, 1]} : vector<8x384xf32> to vector<8x128xf32>
    %147 = arith.mulf %136, %146 : vector<8x128xf32>
    %148 = arith.addf %145, %147 : vector<8x128xf32>
    %149 = math.tanh %148 : vector<8x128xf32>
    %cst_51 = arith.constant 1.000000e+00 : f32
    %150 = vector.broadcast %cst_51 : f32 to vector<8x128xf32>
    %151 = arith.subf %150, %144 : vector<8x128xf32>
    %152 = arith.mulf %151, %149 : vector<8x128xf32>
    %153 = arith.mulf %144, %128 : vector<8x128xf32>
    %154 = arith.addf %152, %153 : vector<8x128xf32>
    %c0_52 = arith.constant 0 : index
    %c0_53 = arith.constant 0 : index
    %155 = vector.load %arg11[%c0_52, %c0_53] : memref<8x256xf32, #tpu.memory_space<vmem>>, vector<8x128xf32>
    tpu.vector_store %arg11[%c0_52, %c0_53], %126 {strides = array<i32>} : memref<8x256xf32, #tpu.memory_space<vmem>>, vector<8x128xf32>,
    %c0_54 = arith.constant 0 : index
    %c128_55 = arith.constant 128 : index
    %156 = vector.load %arg11[%c0_54, %c128_55] : memref<8x256xf32, #tpu.memory_space<vmem>>, vector<8x128xf32>
    tpu.vector_store %arg11[%c0_54, %c128_55], %154 {strides = array<i32>} : memref<8x256xf32, #tpu.memory_space<vmem>>, vector<8x128xf32>,
    %157 = arith.index_cast %89 : i32 to index
    %c0_56 = arith.constant 0 : index
    %158 = vector.load %arg8[%157, %c0_56] : memref<64x256xf32, #tpu.memory_space<vmem>>, vector<8x128xf32>
    tpu.vector_store %arg8[%157, %c0_56], %126 {strides = array<i32>} : memref<64x256xf32, #tpu.memory_space<vmem>>, vector<8x128xf32>,
    %159 = arith.index_cast %91 : i32 to index
    %c128_57 = arith.constant 128 : index
    %160 = vector.load %arg8[%159, %c128_57] : memref<64x256xf32, #tpu.memory_space<vmem>>, vector<8x128xf32>
    tpu.vector_store %arg8[%159, %c128_57], %154 {strides = array<i32>} : memref<64x256xf32, #tpu.memory_space<vmem>>, vector<8x128xf32>,
    %c2_i32 = arith.constant 2 : i32
    %c7_i32_58 = arith.constant 7 : i32
    %161 = arith.subi %c7_i32_58, %c2_i32 : i32
    %c8_i32_59 = arith.constant 8 : i32
    %162 = arith.muli %c2_i32, %c8_i32_59 : i32
    %163 = tpu.assume_multiple %162, 8 : i32
    %c8_i32_60 = arith.constant 8 : i32
    %164 = arith.muli %161, %c8_i32_60 : i32
    %165 = tpu.assume_multiple %164, 8 : i32
    %c0_61 = arith.constant 0 : index
    %c0_62 = arith.constant 0 : index
    %166 = vector.load %arg11[%c0_61, %c0_62] : memref<8x256xf32, #tpu.memory_space<vmem>>, vector<8x256xf32>
    %cst_63 = arith.constant dense<0.000000e+00> : vector<8x768xf32>
    %167 = tpu.matmul %166, %9, %cst_63 {dimension_numbers = #tpu.dot_dimension_numbers<[1], [0], [0], [1], [0, 0, 1, 1], [], []>} : vector<8x256xf32>, vector<256x768xf32>, vector<8x768xf32> -> vector<8x768xf32>
    %168 = arith.addf %167, %12 : vector<8x768xf32>
    %169 = arith.index_cast %163 : i32 to index
    %c0_64 = arith.constant 0 : index
    %170 = vector.load %arg10[%169, %c0_64] : memref<64x768xf32, #tpu.memory_space<vmem>>, vector<8x384xf32>
    %171 = arith.index_cast %165 : i32 to index
    %c384_65 = arith.constant 384 : index
    %172 = vector.load %arg10[%171, %c384_65] : memref<64x768xf32, #tpu.memory_space<vmem>>, vector<8x384xf32>
    %173 = vector.extract_strided_slice %168 {offsets = [0, 0], sizes = [8, 384], strides = [1, 1]} : vector<8x768xf32> to vector<8x384xf32>
    %c0_66 = arith.constant 0 : index
    %c0_67 = arith.constant 0 : index
    %174 = vector.load %arg11[%c0_66, %c0_67] : memref<8x256xf32, #tpu.memory_space<vmem>>, vector<8x128xf32>
    %175 = vector.extract_strided_slice %170 {offsets = [0, 0], sizes = [8, 128], strides = [1, 1]} : vector<8x384xf32> to vector<8x128xf32>
    %176 = vector.extract_strided_slice %173 {offsets = [0, 0], sizes = [8, 128], strides = [1, 1]} : vector<8x384xf32> to vector<8x128xf32>
    %177 = arith.addf %175, %176 : vector<8x128xf32>
    %178 = arith.negf %177 : vector<8x128xf32>
    %179 = math.exp %178 : vector<8x128xf32>
    %cst_68 = arith.constant 1.000000e+00 : f32
    %180 = vector.broadcast %cst_68 : f32 to vector<8x128xf32>
    %181 = arith.addf %180, %179 : vector<8x128xf32>
    %182 = arith.divf %180, %181 : vector<8x128xf32>
    %183 = vector.extract_strided_slice %170 {offsets = [0, 128], sizes = [8, 128], strides = [1, 1]} : vector<8x384xf32> to vector<8x128xf32>
    %184 = vector.extract_strided_slice %173 {offsets = [0, 128], sizes = [8, 128], strides = [1, 1]} : vector<8x384xf32> to vector<8x128xf32>
    %185 = arith.addf %183, %184 : vector<8x128xf32>
    %186 = arith.negf %185 : vector<8x128xf32>
    %187 = math.exp %186 : vector<8x128xf32>
    %cst_69 = arith.constant 1.000000e+00 : f32
    %188 = vector.broadcast %cst_69 : f32 to vector<8x128xf32>
    %189 = arith.addf %188, %187 : vector<8x128xf32>
    %190 = arith.divf %188, %189 : vector<8x128xf32>
    %191 = vector.extract_strided_slice %170 {offsets = [0, 256], sizes = [8, 128], strides = [1, 1]} : vector<8x384xf32> to vector<8x128xf32>
    %192 = vector.extract_strided_slice %173 {offsets = [0, 256], sizes = [8, 128], strides = [1, 1]} : vector<8x384xf32> to vector<8x128xf32>
    %193 = arith.mulf %182, %192 : vector<8x128xf32>
    %194 = arith.addf %191, %193 : vector<8x128xf32>
    %195 = math.tanh %194 : vector<8x128xf32>
    %cst_70 = arith.constant 1.000000e+00 : f32
    %196 = vector.broadcast %cst_70 : f32 to vector<8x128xf32>
    %197 = arith.subf %196, %190 : vector<8x128xf32>
    %198 = arith.mulf %197, %195 : vector<8x128xf32>
    %199 = arith.mulf %190, %174 : vector<8x128xf32>
    %200 = arith.addf %198, %199 : vector<8x128xf32>
    %201 = vector.extract_strided_slice %168 {offsets = [0, 384], sizes = [8, 384], strides = [1, 1]} : vector<8x768xf32> to vector<8x384xf32>
    %c0_71 = arith.constant 0 : index
    %c128_72 = arith.constant 128 : index
    %202 = vector.load %arg11[%c0_71, %c128_72] : memref<8x256xf32, #tpu.memory_space<vmem>>, vector<8x128xf32>
    %203 = vector.extract_strided_slice %172 {offsets = [0, 0], sizes = [8, 128], strides = [1, 1]} : vector<8x384xf32> to vector<8x128xf32>
    %204 = vector.extract_strided_slice %201 {offsets = [0, 0], sizes = [8, 128], strides = [1, 1]} : vector<8x384xf32> to vector<8x128xf32>
    %205 = arith.addf %203, %204 : vector<8x128xf32>
    %206 = arith.negf %205 : vector<8x128xf32>
    %207 = math.exp %206 : vector<8x128xf32>
    %cst_73 = arith.constant 1.000000e+00 : f32
    %208 = vector.broadcast %cst_73 : f32 to vector<8x128xf32>
    %209 = arith.addf %208, %207 : vector<8x128xf32>
    %210 = arith.divf %208, %209 : vector<8x128xf32>
    %211 = vector.extract_strided_slice %172 {offsets = [0, 128], sizes = [8, 128], strides = [1, 1]} : vector<8x384xf32> to vector<8x128xf32>
    %212 = vector.extract_strided_slice %201 {offsets = [0, 128], sizes = [8, 128], strides = [1, 1]} : vector<8x384xf32> to vector<8x128xf32>
    %213 = arith.addf %211, %212 : vector<8x128xf32>
    %214 = arith.negf %213 : vector<8x128xf32>
    %215 = math.exp %214 : vector<8x128xf32>
    %cst_74 = arith.constant 1.000000e+00 : f32
    %216 = vector.broadcast %cst_74 : f32 to vector<8x128xf32>
    %217 = arith.addf %216, %215 : vector<8x128xf32>
    %218 = arith.divf %216, %217 : vector<8x128xf32>
    %219 = vector.extract_strided_slice %172 {offsets = [0, 256], sizes = [8, 128], strides = [1, 1]} : vector<8x384xf32> to vector<8x128xf32>
    %220 = vector.extract_strided_slice %201 {offsets = [0, 256], sizes = [8, 128], strides = [1, 1]} : vector<8x384xf32> to vector<8x128xf32>
    %221 = arith.mulf %210, %220 : vector<8x128xf32>
    %222 = arith.addf %219, %221 : vector<8x128xf32>
    %223 = math.tanh %222 : vector<8x128xf32>
    %cst_75 = arith.constant 1.000000e+00 : f32
    %224 = vector.broadcast %cst_75 : f32 to vector<8x128xf32>
    %225 = arith.subf %224, %218 : vector<8x128xf32>
    %226 = arith.mulf %225, %223 : vector<8x128xf32>
    %227 = arith.mulf %218, %202 : vector<8x128xf32>
    %228 = arith.addf %226, %227 : vector<8x128xf32>
    %c0_76 = arith.constant 0 : index
    %c0_77 = arith.constant 0 : index
    %229 = vector.load %arg11[%c0_76, %c0_77] : memref<8x256xf32, #tpu.memory_space<vmem>>, vector<8x128xf32>
    tpu.vector_store %arg11[%c0_76, %c0_77], %200 {strides = array<i32>} : memref<8x256xf32, #tpu.memory_space<vmem>>, vector<8x128xf32>,
    %c0_78 = arith.constant 0 : index
    %c128_79 = arith.constant 128 : index
    %230 = vector.load %arg11[%c0_78, %c128_79] : memref<8x256xf32, #tpu.memory_space<vmem>>, vector<8x128xf32>
    tpu.vector_store %arg11[%c0_78, %c128_79], %228 {strides = array<i32>} : memref<8x256xf32, #tpu.memory_space<vmem>>, vector<8x128xf32>,
    %231 = arith.index_cast %163 : i32 to index
    %c0_80 = arith.constant 0 : index
    %232 = vector.load %arg8[%231, %c0_80] : memref<64x256xf32, #tpu.memory_space<vmem>>, vector<8x128xf32>
    tpu.vector_store %arg8[%231, %c0_80], %200 {strides = array<i32>} : memref<64x256xf32, #tpu.memory_space<vmem>>, vector<8x128xf32>,
    %233 = arith.index_cast %165 : i32 to index
    %c128_81 = arith.constant 128 : index
    %234 = vector.load %arg8[%233, %c128_81] : memref<64x256xf32, #tpu.memory_space<vmem>>, vector<8x128xf32>
    tpu.vector_store %arg8[%233, %c128_81], %228 {strides = array<i32>} : memref<64x256xf32, #tpu.memory_space<vmem>>, vector<8x128xf32>,
    %c3_i32 = arith.constant 3 : i32
    %c7_i32_82 = arith.constant 7 : i32
    %235 = arith.subi %c7_i32_82, %c3_i32 : i32
    %c8_i32_83 = arith.constant 8 : i32
    %236 = arith.muli %c3_i32, %c8_i32_83 : i32
    %237 = tpu.assume_multiple %236, 8 : i32
    %c8_i32_84 = arith.constant 8 : i32
    %238 = arith.muli %235, %c8_i32_84 : i32
    %239 = tpu.assume_multiple %238, 8 : i32
    %c0_85 = arith.constant 0 : index
    %c0_86 = arith.constant 0 : index
    %240 = vector.load %arg11[%c0_85, %c0_86] : memref<8x256xf32, #tpu.memory_space<vmem>>, vector<8x256xf32>
    %cst_87 = arith.constant dense<0.000000e+00> : vector<8x768xf32>
    %241 = tpu.matmul %240, %9, %cst_87 {dimension_numbers = #tpu.dot_dimension_numbers<[1], [0], [0], [1], [0, 0, 1, 1], [], []>} : vector<8x256xf32>, vector<256x768xf32>, vector<8x768xf32> -> vector<8x768xf32>
    %242 = arith.addf %241, %12 : vector<8x768xf32>
    %243 = arith.index_cast %237 : i32 to index
    %c0_88 = arith.constant 0 : index
    %244 = vector.load %arg10[%243, %c0_88] : memref<64x768xf32, #tpu.memory_space<vmem>>, vector<8x384xf32>
    %245 = arith.index_cast %239 : i32 to index
    %c384_89 = arith.constant 384 : index
    %246 = vector.load %arg10[%245, %c384_89] : memref<64x768xf32, #tpu.memory_space<vmem>>, vector<8x384xf32>
    %247 = vector.extract_strided_slice %242 {offsets = [0, 0], sizes = [8, 384], strides = [1, 1]} : vector<8x768xf32> to vector<8x384xf32>
    %c0_90 = arith.constant 0 : index
    %c0_91 = arith.constant 0 : index
    %248 = vector.load %arg11[%c0_90, %c0_91] : memref<8x256xf32, #tpu.memory_space<vmem>>, vector<8x128xf32>
    %249 = vector.extract_strided_slice %244 {offsets = [0, 0], sizes = [8, 128], strides = [1, 1]} : vector<8x384xf32> to vector<8x128xf32>
    %250 = vector.extract_strided_slice %247 {offsets = [0, 0], sizes = [8, 128], strides = [1, 1]} : vector<8x384xf32> to vector<8x128xf32>
    %251 = arith.addf %249, %250 : vector<8x128xf32>
    %252 = arith.negf %251 : vector<8x128xf32>
    %253 = math.exp %252 : vector<8x128xf32>
    %cst_92 = arith.constant 1.000000e+00 : f32
    %254 = vector.broadcast %cst_92 : f32 to vector<8x128xf32>
    %255 = arith.addf %254, %253 : vector<8x128xf32>
    %256 = arith.divf %254, %255 : vector<8x128xf32>
    %257 = vector.extract_strided_slice %244 {offsets = [0, 128], sizes = [8, 128], strides = [1, 1]} : vector<8x384xf32> to vector<8x128xf32>
    %258 = vector.extract_strided_slice %247 {offsets = [0, 128], sizes = [8, 128], strides = [1, 1]} : vector<8x384xf32> to vector<8x128xf32>
    %259 = arith.addf %257, %258 : vector<8x128xf32>
    %260 = arith.negf %259 : vector<8x128xf32>
    %261 = math.exp %260 : vector<8x128xf32>
    %cst_93 = arith.constant 1.000000e+00 : f32
    %262 = vector.broadcast %cst_93 : f32 to vector<8x128xf32>
    %263 = arith.addf %262, %261 : vector<8x128xf32>
    %264 = arith.divf %262, %263 : vector<8x128xf32>
    %265 = vector.extract_strided_slice %244 {offsets = [0, 256], sizes = [8, 128], strides = [1, 1]} : vector<8x384xf32> to vector<8x128xf32>
    %266 = vector.extract_strided_slice %247 {offsets = [0, 256], sizes = [8, 128], strides = [1, 1]} : vector<8x384xf32> to vector<8x128xf32>
    %267 = arith.mulf %256, %266 : vector<8x128xf32>
    %268 = arith.addf %265, %267 : vector<8x128xf32>
    %269 = math.tanh %268 : vector<8x128xf32>
    %cst_94 = arith.constant 1.000000e+00 : f32
    %270 = vector.broadcast %cst_94 : f32 to vector<8x128xf32>
    %271 = arith.subf %270, %264 : vector<8x128xf32>
    %272 = arith.mulf %271, %269 : vector<8x128xf32>
    %273 = arith.mulf %264, %248 : vector<8x128xf32>
    %274 = arith.addf %272, %273 : vector<8x128xf32>
    %275 = vector.extract_strided_slice %242 {offsets = [0, 384], sizes = [8, 384], strides = [1, 1]} : vector<8x768xf32> to vector<8x384xf32>
    %c0_95 = arith.constant 0 : index
    %c128_96 = arith.constant 128 : index
    %276 = vector.load %arg11[%c0_95, %c128_96] : memref<8x256xf32, #tpu.memory_space<vmem>>, vector<8x128xf32>
    %277 = vector.extract_strided_slice %246 {offsets = [0, 0], sizes = [8, 128], strides = [1, 1]} : vector<8x384xf32> to vector<8x128xf32>
    %278 = vector.extract_strided_slice %275 {offsets = [0, 0], sizes = [8, 128], strides = [1, 1]} : vector<8x384xf32> to vector<8x128xf32>
    %279 = arith.addf %277, %278 : vector<8x128xf32>
    %280 = arith.negf %279 : vector<8x128xf32>
    %281 = math.exp %280 : vector<8x128xf32>
    %cst_97 = arith.constant 1.000000e+00 : f32
    %282 = vector.broadcast %cst_97 : f32 to vector<8x128xf32>
    %283 = arith.addf %282, %281 : vector<8x128xf32>
    %284 = arith.divf %282, %283 : vector<8x128xf32>
    %285 = vector.extract_strided_slice %246 {offsets = [0, 128], sizes = [8, 128], strides = [1, 1]} : vector<8x384xf32> to vector<8x128xf32>
    %286 = vector.extract_strided_slice %275 {offsets = [0, 128], sizes = [8, 128], strides = [1, 1]} : vector<8x384xf32> to vector<8x128xf32>
    %287 = arith.addf %285, %286 : vector<8x128xf32>
    %288 = arith.negf %287 : vector<8x128xf32>
    %289 = math.exp %288 : vector<8x128xf32>
    %cst_98 = arith.constant 1.000000e+00 : f32
    %290 = vector.broadcast %cst_98 : f32 to vector<8x128xf32>
    %291 = arith.addf %290, %289 : vector<8x128xf32>
    %292 = arith.divf %290, %291 : vector<8x128xf32>
    %293 = vector.extract_strided_slice %246 {offsets = [0, 256], sizes = [8, 128], strides = [1, 1]} : vector<8x384xf32> to vector<8x128xf32>
    %294 = vector.extract_strided_slice %275 {offsets = [0, 256], sizes = [8, 128], strides = [1, 1]} : vector<8x384xf32> to vector<8x128xf32>
    %295 = arith.mulf %284, %294 : vector<8x128xf32>
    %296 = arith.addf %293, %295 : vector<8x128xf32>
    %297 = math.tanh %296 : vector<8x128xf32>
    %cst_99 = arith.constant 1.000000e+00 : f32
    %298 = vector.broadcast %cst_99 : f32 to vector<8x128xf32>
    %299 = arith.subf %298, %292 : vector<8x128xf32>
    %300 = arith.mulf %299, %297 : vector<8x128xf32>
    %301 = arith.mulf %292, %276 : vector<8x128xf32>
    %302 = arith.addf %300, %301 : vector<8x128xf32>
    %c0_100 = arith.constant 0 : index
    %c0_101 = arith.constant 0 : index
    %303 = vector.load %arg11[%c0_100, %c0_101] : memref<8x256xf32, #tpu.memory_space<vmem>>, vector<8x128xf32>
    tpu.vector_store %arg11[%c0_100, %c0_101], %274 {strides = array<i32>} : memref<8x256xf32, #tpu.memory_space<vmem>>, vector<8x128xf32>,
    %c0_102 = arith.constant 0 : index
    %c128_103 = arith.constant 128 : index
    %304 = vector.load %arg11[%c0_102, %c128_103] : memref<8x256xf32, #tpu.memory_space<vmem>>, vector<8x128xf32>
    tpu.vector_store %arg11[%c0_102, %c128_103], %302 {strides = array<i32>} : memref<8x256xf32, #tpu.memory_space<vmem>>, vector<8x128xf32>,
    %305 = arith.index_cast %237 : i32 to index
    %c0_104 = arith.constant 0 : index
    %306 = vector.load %arg8[%305, %c0_104] : memref<64x256xf32, #tpu.memory_space<vmem>>, vector<8x128xf32>
    tpu.vector_store %arg8[%305, %c0_104], %274 {strides = array<i32>} : memref<64x256xf32, #tpu.memory_space<vmem>>, vector<8x128xf32>,
    %307 = arith.index_cast %239 : i32 to index
    %c128_105 = arith.constant 128 : index
    %308 = vector.load %arg8[%307, %c128_105] : memref<64x256xf32, #tpu.memory_space<vmem>>, vector<8x128xf32>
    tpu.vector_store %arg8[%307, %c128_105], %302 {strides = array<i32>} : memref<64x256xf32, #tpu.memory_space<vmem>>, vector<8x128xf32>,
    %c4_i32 = arith.constant 4 : i32
    %c7_i32_106 = arith.constant 7 : i32
    %309 = arith.subi %c7_i32_106, %c4_i32 : i32
    %c8_i32_107 = arith.constant 8 : i32
    %310 = arith.muli %c4_i32, %c8_i32_107 : i32
    %311 = tpu.assume_multiple %310, 8 : i32
    %c8_i32_108 = arith.constant 8 : i32
    %312 = arith.muli %309, %c8_i32_108 : i32
    %313 = tpu.assume_multiple %312, 8 : i32
    %c0_109 = arith.constant 0 : index
    %c0_110 = arith.constant 0 : index
    %314 = vector.load %arg11[%c0_109, %c0_110] : memref<8x256xf32, #tpu.memory_space<vmem>>, vector<8x256xf32>
    %cst_111 = arith.constant dense<0.000000e+00> : vector<8x768xf32>
    %315 = tpu.matmul %314, %9, %cst_111 {dimension_numbers = #tpu.dot_dimension_numbers<[1], [0], [0], [1], [0, 0, 1, 1], [], []>} : vector<8x256xf32>, vector<256x768xf32>, vector<8x768xf32> -> vector<8x768xf32>
    %316 = arith.addf %315, %12 : vector<8x768xf32>
    %317 = arith.index_cast %311 : i32 to index
    %c0_112 = arith.constant 0 : index
    %318 = vector.load %arg10[%317, %c0_112] : memref<64x768xf32, #tpu.memory_space<vmem>>, vector<8x384xf32>
    %319 = arith.index_cast %313 : i32 to index
    %c384_113 = arith.constant 384 : index
    %320 = vector.load %arg10[%319, %c384_113] : memref<64x768xf32, #tpu.memory_space<vmem>>, vector<8x384xf32>
    %321 = vector.extract_strided_slice %316 {offsets = [0, 0], sizes = [8, 384], strides = [1, 1]} : vector<8x768xf32> to vector<8x384xf32>
    %c0_114 = arith.constant 0 : index
    %c0_115 = arith.constant 0 : index
    %322 = vector.load %arg11[%c0_114, %c0_115] : memref<8x256xf32, #tpu.memory_space<vmem>>, vector<8x128xf32>
    %323 = vector.extract_strided_slice %318 {offsets = [0, 0], sizes = [8, 128], strides = [1, 1]} : vector<8x384xf32> to vector<8x128xf32>
    %324 = vector.extract_strided_slice %321 {offsets = [0, 0], sizes = [8, 128], strides = [1, 1]} : vector<8x384xf32> to vector<8x128xf32>
    %325 = arith.addf %323, %324 : vector<8x128xf32>
    %326 = arith.negf %325 : vector<8x128xf32>
    %327 = math.exp %326 : vector<8x128xf32>
    %cst_116 = arith.constant 1.000000e+00 : f32
    %328 = vector.broadcast %cst_116 : f32 to vector<8x128xf32>
    %329 = arith.addf %328, %327 : vector<8x128xf32>
    %330 = arith.divf %328, %329 : vector<8x128xf32>
    %331 = vector.extract_strided_slice %318 {offsets = [0, 128], sizes = [8, 128], strides = [1, 1]} : vector<8x384xf32> to vector<8x128xf32>
    %332 = vector.extract_strided_slice %321 {offsets = [0, 128], sizes = [8, 128], strides = [1, 1]} : vector<8x384xf32> to vector<8x128xf32>
    %333 = arith.addf %331, %332 : vector<8x128xf32>
    %334 = arith.negf %333 : vector<8x128xf32>
    %335 = math.exp %334 : vector<8x128xf32>
    %cst_117 = arith.constant 1.000000e+00 : f32
    %336 = vector.broadcast %cst_117 : f32 to vector<8x128xf32>
    %337 = arith.addf %336, %335 : vector<8x128xf32>
    %338 = arith.divf %336, %337 : vector<8x128xf32>
    %339 = vector.extract_strided_slice %318 {offsets = [0, 256], sizes = [8, 128], strides = [1, 1]} : vector<8x384xf32> to vector<8x128xf32>
    %340 = vector.extract_strided_slice %321 {offsets = [0, 256], sizes = [8, 128], strides = [1, 1]} : vector<8x384xf32> to vector<8x128xf32>
    %341 = arith.mulf %330, %340 : vector<8x128xf32>
    %342 = arith.addf %339, %341 : vector<8x128xf32>
    %343 = math.tanh %342 : vector<8x128xf32>
    %cst_118 = arith.constant 1.000000e+00 : f32
    %344 = vector.broadcast %cst_118 : f32 to vector<8x128xf32>
    %345 = arith.subf %344, %338 : vector<8x128xf32>
    %346 = arith.mulf %345, %343 : vector<8x128xf32>
    %347 = arith.mulf %338, %322 : vector<8x128xf32>
    %348 = arith.addf %346, %347 : vector<8x128xf32>
    %349 = vector.extract_strided_slice %316 {offsets = [0, 384], sizes = [8, 384], strides = [1, 1]} : vector<8x768xf32> to vector<8x384xf32>
    %c0_119 = arith.constant 0 : index
    %c128_120 = arith.constant 128 : index
    %350 = vector.load %arg11[%c0_119, %c128_120] : memref<8x256xf32, #tpu.memory_space<vmem>>, vector<8x128xf32>
    %351 = vector.extract_strided_slice %320 {offsets = [0, 0], sizes = [8, 128], strides = [1, 1]} : vector<8x384xf32> to vector<8x128xf32>
    %352 = vector.extract_strided_slice %349 {offsets = [0, 0], sizes = [8, 128], strides = [1, 1]} : vector<8x384xf32> to vector<8x128xf32>
    %353 = arith.addf %351, %352 : vector<8x128xf32>
    %354 = arith.negf %353 : vector<8x128xf32>
    %355 = math.exp %354 : vector<8x128xf32>
    %cst_121 = arith.constant 1.000000e+00 : f32
    %356 = vector.broadcast %cst_121 : f32 to vector<8x128xf32>
    %357 = arith.addf %356, %355 : vector<8x128xf32>
    %358 = arith.divf %356, %357 : vector<8x128xf32>
    %359 = vector.extract_strided_slice %320 {offsets = [0, 128], sizes = [8, 128], strides = [1, 1]} : vector<8x384xf32> to vector<8x128xf32>
    %360 = vector.extract_strided_slice %349 {offsets = [0, 128], sizes = [8, 128], strides = [1, 1]} : vector<8x384xf32> to vector<8x128xf32>
    %361 = arith.addf %359, %360 : vector<8x128xf32>
    %362 = arith.negf %361 : vector<8x128xf32>
    %363 = math.exp %362 : vector<8x128xf32>
    %cst_122 = arith.constant 1.000000e+00 : f32
    %364 = vector.broadcast %cst_122 : f32 to vector<8x128xf32>
    %365 = arith.addf %364, %363 : vector<8x128xf32>
    %366 = arith.divf %364, %365 : vector<8x128xf32>
    %367 = vector.extract_strided_slice %320 {offsets = [0, 256], sizes = [8, 128], strides = [1, 1]} : vector<8x384xf32> to vector<8x128xf32>
    %368 = vector.extract_strided_slice %349 {offsets = [0, 256], sizes = [8, 128], strides = [1, 1]} : vector<8x384xf32> to vector<8x128xf32>
    %369 = arith.mulf %358, %368 : vector<8x128xf32>
    %370 = arith.addf %367, %369 : vector<8x128xf32>
    %371 = math.tanh %370 : vector<8x128xf32>
    %cst_123 = arith.constant 1.000000e+00 : f32
    %372 = vector.broadcast %cst_123 : f32 to vector<8x128xf32>
    %373 = arith.subf %372, %366 : vector<8x128xf32>
    %374 = arith.mulf %373, %371 : vector<8x128xf32>
    %375 = arith.mulf %366, %350 : vector<8x128xf32>
    %376 = arith.addf %374, %375 : vector<8x128xf32>
    %c0_124 = arith.constant 0 : index
    %c0_125 = arith.constant 0 : index
    %377 = vector.load %arg11[%c0_124, %c0_125] : memref<8x256xf32, #tpu.memory_space<vmem>>, vector<8x128xf32>
    tpu.vector_store %arg11[%c0_124, %c0_125], %348 {strides = array<i32>} : memref<8x256xf32, #tpu.memory_space<vmem>>, vector<8x128xf32>,
    %c0_126 = arith.constant 0 : index
    %c128_127 = arith.constant 128 : index
    %378 = vector.load %arg11[%c0_126, %c128_127] : memref<8x256xf32, #tpu.memory_space<vmem>>, vector<8x128xf32>
    tpu.vector_store %arg11[%c0_126, %c128_127], %376 {strides = array<i32>} : memref<8x256xf32, #tpu.memory_space<vmem>>, vector<8x128xf32>,
    %379 = arith.index_cast %311 : i32 to index
    %c0_128 = arith.constant 0 : index
    %380 = vector.load %arg8[%379, %c0_128] : memref<64x256xf32, #tpu.memory_space<vmem>>, vector<8x128xf32>
    tpu.vector_store %arg8[%379, %c0_128], %348 {strides = array<i32>} : memref<64x256xf32, #tpu.memory_space<vmem>>, vector<8x128xf32>,
    %381 = arith.index_cast %313 : i32 to index
    %c128_129 = arith.constant 128 : index
    %382 = vector.load %arg8[%381, %c128_129] : memref<64x256xf32, #tpu.memory_space<vmem>>, vector<8x128xf32>
    tpu.vector_store %arg8[%381, %c128_129], %376 {strides = array<i32>} : memref<64x256xf32, #tpu.memory_space<vmem>>, vector<8x128xf32>,
    %c5_i32 = arith.constant 5 : i32
    %c7_i32_130 = arith.constant 7 : i32
    %383 = arith.subi %c7_i32_130, %c5_i32 : i32
    %c8_i32_131 = arith.constant 8 : i32
    %384 = arith.muli %c5_i32, %c8_i32_131 : i32
    %385 = tpu.assume_multiple %384, 8 : i32
    %c8_i32_132 = arith.constant 8 : i32
    %386 = arith.muli %383, %c8_i32_132 : i32
    %387 = tpu.assume_multiple %386, 8 : i32
    %c0_133 = arith.constant 0 : index
    %c0_134 = arith.constant 0 : index
    %388 = vector.load %arg11[%c0_133, %c0_134] : memref<8x256xf32, #tpu.memory_space<vmem>>, vector<8x256xf32>
    %cst_135 = arith.constant dense<0.000000e+00> : vector<8x768xf32>
    %389 = tpu.matmul %388, %9, %cst_135 {dimension_numbers = #tpu.dot_dimension_numbers<[1], [0], [0], [1], [0, 0, 1, 1], [], []>} : vector<8x256xf32>, vector<256x768xf32>, vector<8x768xf32> -> vector<8x768xf32>
    %390 = arith.addf %389, %12 : vector<8x768xf32>
    %391 = arith.index_cast %385 : i32 to index
    %c0_136 = arith.constant 0 : index
    %392 = vector.load %arg10[%391, %c0_136] : memref<64x768xf32, #tpu.memory_space<vmem>>, vector<8x384xf32>
    %393 = arith.index_cast %387 : i32 to index
    %c384_137 = arith.constant 384 : index
    %394 = vector.load %arg10[%393, %c384_137] : memref<64x768xf32, #tpu.memory_space<vmem>>, vector<8x384xf32>
    %395 = vector.extract_strided_slice %390 {offsets = [0, 0], sizes = [8, 384], strides = [1, 1]} : vector<8x768xf32> to vector<8x384xf32>
    %c0_138 = arith.constant 0 : index
    %c0_139 = arith.constant 0 : index
    %396 = vector.load %arg11[%c0_138, %c0_139] : memref<8x256xf32, #tpu.memory_space<vmem>>, vector<8x128xf32>
    %397 = vector.extract_strided_slice %392 {offsets = [0, 0], sizes = [8, 128], strides = [1, 1]} : vector<8x384xf32> to vector<8x128xf32>
    %398 = vector.extract_strided_slice %395 {offsets = [0, 0], sizes = [8, 128], strides = [1, 1]} : vector<8x384xf32> to vector<8x128xf32>
    %399 = arith.addf %397, %398 : vector<8x128xf32>
    %400 = arith.negf %399 : vector<8x128xf32>
    %401 = math.exp %400 : vector<8x128xf32>
    %cst_140 = arith.constant 1.000000e+00 : f32
    %402 = vector.broadcast %cst_140 : f32 to vector<8x128xf32>
    %403 = arith.addf %402, %401 : vector<8x128xf32>
    %404 = arith.divf %402, %403 : vector<8x128xf32>
    %405 = vector.extract_strided_slice %392 {offsets = [0, 128], sizes = [8, 128], strides = [1, 1]} : vector<8x384xf32> to vector<8x128xf32>
    %406 = vector.extract_strided_slice %395 {offsets = [0, 128], sizes = [8, 128], strides = [1, 1]} : vector<8x384xf32> to vector<8x128xf32>
    %407 = arith.addf %405, %406 : vector<8x128xf32>
    %408 = arith.negf %407 : vector<8x128xf32>
    %409 = math.exp %408 : vector<8x128xf32>
    %cst_141 = arith.constant 1.000000e+00 : f32
    %410 = vector.broadcast %cst_141 : f32 to vector<8x128xf32>
    %411 = arith.addf %410, %409 : vector<8x128xf32>
    %412 = arith.divf %410, %411 : vector<8x128xf32>
    %413 = vector.extract_strided_slice %392 {offsets = [0, 256], sizes = [8, 128], strides = [1, 1]} : vector<8x384xf32> to vector<8x128xf32>
    %414 = vector.extract_strided_slice %395 {offsets = [0, 256], sizes = [8, 128], strides = [1, 1]} : vector<8x384xf32> to vector<8x128xf32>
    %415 = arith.mulf %404, %414 : vector<8x128xf32>
    %416 = arith.addf %413, %415 : vector<8x128xf32>
    %417 = math.tanh %416 : vector<8x128xf32>
    %cst_142 = arith.constant 1.000000e+00 : f32
    %418 = vector.broadcast %cst_142 : f32 to vector<8x128xf32>
    %419 = arith.subf %418, %412 : vector<8x128xf32>
    %420 = arith.mulf %419, %417 : vector<8x128xf32>
    %421 = arith.mulf %412, %396 : vector<8x128xf32>
    %422 = arith.addf %420, %421 : vector<8x128xf32>
    %423 = vector.extract_strided_slice %390 {offsets = [0, 384], sizes = [8, 384], strides = [1, 1]} : vector<8x768xf32> to vector<8x384xf32>
    %c0_143 = arith.constant 0 : index
    %c128_144 = arith.constant 128 : index
    %424 = vector.load %arg11[%c0_143, %c128_144] : memref<8x256xf32, #tpu.memory_space<vmem>>, vector<8x128xf32>
    %425 = vector.extract_strided_slice %394 {offsets = [0, 0], sizes = [8, 128], strides = [1, 1]} : vector<8x384xf32> to vector<8x128xf32>
    %426 = vector.extract_strided_slice %423 {offsets = [0, 0], sizes = [8, 128], strides = [1, 1]} : vector<8x384xf32> to vector<8x128xf32>
    %427 = arith.addf %425, %426 : vector<8x128xf32>
    %428 = arith.negf %427 : vector<8x128xf32>
    %429 = math.exp %428 : vector<8x128xf32>
    %cst_145 = arith.constant 1.000000e+00 : f32
    %430 = vector.broadcast %cst_145 : f32 to vector<8x128xf32>
    %431 = arith.addf %430, %429 : vector<8x128xf32>
    %432 = arith.divf %430, %431 : vector<8x128xf32>
    %433 = vector.extract_strided_slice %394 {offsets = [0, 128], sizes = [8, 128], strides = [1, 1]} : vector<8x384xf32> to vector<8x128xf32>
    %434 = vector.extract_strided_slice %423 {offsets = [0, 128], sizes = [8, 128], strides = [1, 1]} : vector<8x384xf32> to vector<8x128xf32>
    %435 = arith.addf %433, %434 : vector<8x128xf32>
    %436 = arith.negf %435 : vector<8x128xf32>
    %437 = math.exp %436 : vector<8x128xf32>
    %cst_146 = arith.constant 1.000000e+00 : f32
    %438 = vector.broadcast %cst_146 : f32 to vector<8x128xf32>
    %439 = arith.addf %438, %437 : vector<8x128xf32>
    %440 = arith.divf %438, %439 : vector<8x128xf32>
    %441 = vector.extract_strided_slice %394 {offsets = [0, 256], sizes = [8, 128], strides = [1, 1]} : vector<8x384xf32> to vector<8x128xf32>
    %442 = vector.extract_strided_slice %423 {offsets = [0, 256], sizes = [8, 128], strides = [1, 1]} : vector<8x384xf32> to vector<8x128xf32>
    %443 = arith.mulf %432, %442 : vector<8x128xf32>
    %444 = arith.addf %441, %443 : vector<8x128xf32>
    %445 = math.tanh %444 : vector<8x128xf32>
    %cst_147 = arith.constant 1.000000e+00 : f32
    %446 = vector.broadcast %cst_147 : f32 to vector<8x128xf32>
    %447 = arith.subf %446, %440 : vector<8x128xf32>
    %448 = arith.mulf %447, %445 : vector<8x128xf32>
    %449 = arith.mulf %440, %424 : vector<8x128xf32>
    %450 = arith.addf %448, %449 : vector<8x128xf32>
    %c0_148 = arith.constant 0 : index
    %c0_149 = arith.constant 0 : index
    %451 = vector.load %arg11[%c0_148, %c0_149] : memref<8x256xf32, #tpu.memory_space<vmem>>, vector<8x128xf32>
    tpu.vector_store %arg11[%c0_148, %c0_149], %422 {strides = array<i32>} : memref<8x256xf32, #tpu.memory_space<vmem>>, vector<8x128xf32>,
    %c0_150 = arith.constant 0 : index
    %c128_151 = arith.constant 128 : index
    %452 = vector.load %arg11[%c0_150, %c128_151] : memref<8x256xf32, #tpu.memory_space<vmem>>, vector<8x128xf32>
    tpu.vector_store %arg11[%c0_150, %c128_151], %450 {strides = array<i32>} : memref<8x256xf32, #tpu.memory_space<vmem>>, vector<8x128xf32>,
    %453 = arith.index_cast %385 : i32 to index
    %c0_152 = arith.constant 0 : index
    %454 = vector.load %arg8[%453, %c0_152] : memref<64x256xf32, #tpu.memory_space<vmem>>, vector<8x128xf32>
    tpu.vector_store %arg8[%453, %c0_152], %422 {strides = array<i32>} : memref<64x256xf32, #tpu.memory_space<vmem>>, vector<8x128xf32>,
    %455 = arith.index_cast %387 : i32 to index
    %c128_153 = arith.constant 128 : index
    %456 = vector.load %arg8[%455, %c128_153] : memref<64x256xf32, #tpu.memory_space<vmem>>, vector<8x128xf32>
    tpu.vector_store %arg8[%455, %c128_153], %450 {strides = array<i32>} : memref<64x256xf32, #tpu.memory_space<vmem>>, vector<8x128xf32>,
    %c6_i32 = arith.constant 6 : i32
    %c7_i32_154 = arith.constant 7 : i32
    %457 = arith.subi %c7_i32_154, %c6_i32 : i32
    %c8_i32_155 = arith.constant 8 : i32
    %458 = arith.muli %c6_i32, %c8_i32_155 : i32
    %459 = tpu.assume_multiple %458, 8 : i32
    %c8_i32_156 = arith.constant 8 : i32
    %460 = arith.muli %457, %c8_i32_156 : i32
    %461 = tpu.assume_multiple %460, 8 : i32
    %c0_157 = arith.constant 0 : index
    %c0_158 = arith.constant 0 : index
    %462 = vector.load %arg11[%c0_157, %c0_158] : memref<8x256xf32, #tpu.memory_space<vmem>>, vector<8x256xf32>
    %cst_159 = arith.constant dense<0.000000e+00> : vector<8x768xf32>
    %463 = tpu.matmul %462, %9, %cst_159 {dimension_numbers = #tpu.dot_dimension_numbers<[1], [0], [0], [1], [0, 0, 1, 1], [], []>} : vector<8x256xf32>, vector<256x768xf32>, vector<8x768xf32> -> vector<8x768xf32>
    %464 = arith.addf %463, %12 : vector<8x768xf32>
    %465 = arith.index_cast %459 : i32 to index
    %c0_160 = arith.constant 0 : index
    %466 = vector.load %arg10[%465, %c0_160] : memref<64x768xf32, #tpu.memory_space<vmem>>, vector<8x384xf32>
    %467 = arith.index_cast %461 : i32 to index
    %c384_161 = arith.constant 384 : index
    %468 = vector.load %arg10[%467, %c384_161] : memref<64x768xf32, #tpu.memory_space<vmem>>, vector<8x384xf32>
    %469 = vector.extract_strided_slice %464 {offsets = [0, 0], sizes = [8, 384], strides = [1, 1]} : vector<8x768xf32> to vector<8x384xf32>
    %c0_162 = arith.constant 0 : index
    %c0_163 = arith.constant 0 : index
    %470 = vector.load %arg11[%c0_162, %c0_163] : memref<8x256xf32, #tpu.memory_space<vmem>>, vector<8x128xf32>
    %471 = vector.extract_strided_slice %466 {offsets = [0, 0], sizes = [8, 128], strides = [1, 1]} : vector<8x384xf32> to vector<8x128xf32>
    %472 = vector.extract_strided_slice %469 {offsets = [0, 0], sizes = [8, 128], strides = [1, 1]} : vector<8x384xf32> to vector<8x128xf32>
    %473 = arith.addf %471, %472 : vector<8x128xf32>
    %474 = arith.negf %473 : vector<8x128xf32>
    %475 = math.exp %474 : vector<8x128xf32>
    %cst_164 = arith.constant 1.000000e+00 : f32
    %476 = vector.broadcast %cst_164 : f32 to vector<8x128xf32>
    %477 = arith.addf %476, %475 : vector<8x128xf32>
    %478 = arith.divf %476, %477 : vector<8x128xf32>
    %479 = vector.extract_strided_slice %466 {offsets = [0, 128], sizes = [8, 128], strides = [1, 1]} : vector<8x384xf32> to vector<8x128xf32>
    %480 = vector.extract_strided_slice %469 {offsets = [0, 128], sizes = [8, 128], strides = [1, 1]} : vector<8x384xf32> to vector<8x128xf32>
    %481 = arith.addf %479, %480 : vector<8x128xf32>
    %482 = arith.negf %481 : vector<8x128xf32>
    %483 = math.exp %482 : vector<8x128xf32>
    %cst_165 = arith.constant 1.000000e+00 : f32
    %484 = vector.broadcast %cst_165 : f32 to vector<8x128xf32>
    %485 = arith.addf %484, %483 : vector<8x128xf32>
    %486 = arith.divf %484, %485 : vector<8x128xf32>
    %487 = vector.extract_strided_slice %466 {offsets = [0, 256], sizes = [8, 128], strides = [1, 1]} : vector<8x384xf32> to vector<8x128xf32>
    %488 = vector.extract_strided_slice %469 {offsets = [0, 256], sizes = [8, 128], strides = [1, 1]} : vector<8x384xf32> to vector<8x128xf32>
    %489 = arith.mulf %478, %488 : vector<8x128xf32>
    %490 = arith.addf %487, %489 : vector<8x128xf32>
    %491 = math.tanh %490 : vector<8x128xf32>
    %cst_166 = arith.constant 1.000000e+00 : f32
    %492 = vector.broadcast %cst_166 : f32 to vector<8x128xf32>
    %493 = arith.subf %492, %486 : vector<8x128xf32>
    %494 = arith.mulf %493, %491 : vector<8x128xf32>
    %495 = arith.mulf %486, %470 : vector<8x128xf32>
    %496 = arith.addf %494, %495 : vector<8x128xf32>
    %497 = vector.extract_strided_slice %464 {offsets = [0, 384], sizes = [8, 384], strides = [1, 1]} : vector<8x768xf32> to vector<8x384xf32>
    %c0_167 = arith.constant 0 : index
    %c128_168 = arith.constant 128 : index
    %498 = vector.load %arg11[%c0_167, %c128_168] : memref<8x256xf32, #tpu.memory_space<vmem>>, vector<8x128xf32>
    %499 = vector.extract_strided_slice %468 {offsets = [0, 0], sizes = [8, 128], strides = [1, 1]} : vector<8x384xf32> to vector<8x128xf32>
    %500 = vector.extract_strided_slice %497 {offsets = [0, 0], sizes = [8, 128], strides = [1, 1]} : vector<8x384xf32> to vector<8x128xf32>
    %501 = arith.addf %499, %500 : vector<8x128xf32>
    %502 = arith.negf %501 : vector<8x128xf32>
    %503 = math.exp %502 : vector<8x128xf32>
    %cst_169 = arith.constant 1.000000e+00 : f32
    %504 = vector.broadcast %cst_169 : f32 to vector<8x128xf32>
    %505 = arith.addf %504, %503 : vector<8x128xf32>
    %506 = arith.divf %504, %505 : vector<8x128xf32>
    %507 = vector.extract_strided_slice %468 {offsets = [0, 128], sizes = [8, 128], strides = [1, 1]} : vector<8x384xf32> to vector<8x128xf32>
    %508 = vector.extract_strided_slice %497 {offsets = [0, 128], sizes = [8, 128], strides = [1, 1]} : vector<8x384xf32> to vector<8x128xf32>
    %509 = arith.addf %507, %508 : vector<8x128xf32>
    %510 = arith.negf %509 : vector<8x128xf32>
    %511 = math.exp %510 : vector<8x128xf32>
    %cst_170 = arith.constant 1.000000e+00 : f32
    %512 = vector.broadcast %cst_170 : f32 to vector<8x128xf32>
    %513 = arith.addf %512, %511 : vector<8x128xf32>
    %514 = arith.divf %512, %513 : vector<8x128xf32>
    %515 = vector.extract_strided_slice %468 {offsets = [0, 256], sizes = [8, 128], strides = [1, 1]} : vector<8x384xf32> to vector<8x128xf32>
    %516 = vector.extract_strided_slice %497 {offsets = [0, 256], sizes = [8, 128], strides = [1, 1]} : vector<8x384xf32> to vector<8x128xf32>
    %517 = arith.mulf %506, %516 : vector<8x128xf32>
    %518 = arith.addf %515, %517 : vector<8x128xf32>
    %519 = math.tanh %518 : vector<8x128xf32>
    %cst_171 = arith.constant 1.000000e+00 : f32
    %520 = vector.broadcast %cst_171 : f32 to vector<8x128xf32>
    %521 = arith.subf %520, %514 : vector<8x128xf32>
    %522 = arith.mulf %521, %519 : vector<8x128xf32>
    %523 = arith.mulf %514, %498 : vector<8x128xf32>
    %524 = arith.addf %522, %523 : vector<8x128xf32>
    %c0_172 = arith.constant 0 : index
    %c0_173 = arith.constant 0 : index
    %525 = vector.load %arg11[%c0_172, %c0_173] : memref<8x256xf32, #tpu.memory_space<vmem>>, vector<8x128xf32>
    tpu.vector_store %arg11[%c0_172, %c0_173], %496 {strides = array<i32>} : memref<8x256xf32, #tpu.memory_space<vmem>>, vector<8x128xf32>,
    %c0_174 = arith.constant 0 : index
    %c128_175 = arith.constant 128 : index
    %526 = vector.load %arg11[%c0_174, %c128_175] : memref<8x256xf32, #tpu.memory_space<vmem>>, vector<8x128xf32>
    tpu.vector_store %arg11[%c0_174, %c128_175], %524 {strides = array<i32>} : memref<8x256xf32, #tpu.memory_space<vmem>>, vector<8x128xf32>,
    %527 = arith.index_cast %459 : i32 to index
    %c0_176 = arith.constant 0 : index
    %528 = vector.load %arg8[%527, %c0_176] : memref<64x256xf32, #tpu.memory_space<vmem>>, vector<8x128xf32>
    tpu.vector_store %arg8[%527, %c0_176], %496 {strides = array<i32>} : memref<64x256xf32, #tpu.memory_space<vmem>>, vector<8x128xf32>,
    %529 = arith.index_cast %461 : i32 to index
    %c128_177 = arith.constant 128 : index
    %530 = vector.load %arg8[%529, %c128_177] : memref<64x256xf32, #tpu.memory_space<vmem>>, vector<8x128xf32>
    tpu.vector_store %arg8[%529, %c128_177], %524 {strides = array<i32>} : memref<64x256xf32, #tpu.memory_space<vmem>>, vector<8x128xf32>,
    %c7_i32_178 = arith.constant 7 : i32
    %c7_i32_179 = arith.constant 7 : i32
    %531 = arith.subi %c7_i32_179, %c7_i32_178 : i32
    %c8_i32_180 = arith.constant 8 : i32
    %532 = arith.muli %c7_i32_178, %c8_i32_180 : i32
    %533 = tpu.assume_multiple %532, 8 : i32
    %c8_i32_181 = arith.constant 8 : i32
    %534 = arith.muli %531, %c8_i32_181 : i32
    %535 = tpu.assume_multiple %534, 8 : i32
    %c0_182 = arith.constant 0 : index
    %c0_183 = arith.constant 0 : index
    %536 = vector.load %arg11[%c0_182, %c0_183] : memref<8x256xf32, #tpu.memory_space<vmem>>, vector<8x256xf32>
    %cst_184 = arith.constant dense<0.000000e+00> : vector<8x768xf32>
    %537 = tpu.matmul %536, %9, %cst_184 {dimension_numbers = #tpu.dot_dimension_numbers<[1], [0], [0], [1], [0, 0, 1, 1], [], []>} : vector<8x256xf32>, vector<256x768xf32>, vector<8x768xf32> -> vector<8x768xf32>
    %538 = arith.addf %537, %12 : vector<8x768xf32>
    %539 = arith.index_cast %533 : i32 to index
    %c0_185 = arith.constant 0 : index
    %540 = vector.load %arg10[%539, %c0_185] : memref<64x768xf32, #tpu.memory_space<vmem>>, vector<8x384xf32>
    %541 = arith.index_cast %535 : i32 to index
    %c384_186 = arith.constant 384 : index
    %542 = vector.load %arg10[%541, %c384_186] : memref<64x768xf32, #tpu.memory_space<vmem>>, vector<8x384xf32>
    %543 = vector.extract_strided_slice %538 {offsets = [0, 0], sizes = [8, 384], strides = [1, 1]} : vector<8x768xf32> to vector<8x384xf32>
    %c0_187 = arith.constant 0 : index
    %c0_188 = arith.constant 0 : index
    %544 = vector.load %arg11[%c0_187, %c0_188] : memref<8x256xf32, #tpu.memory_space<vmem>>, vector<8x128xf32>
    %545 = vector.extract_strided_slice %540 {offsets = [0, 0], sizes = [8, 128], strides = [1, 1]} : vector<8x384xf32> to vector<8x128xf32>
    %546 = vector.extract_strided_slice %543 {offsets = [0, 0], sizes = [8, 128], strides = [1, 1]} : vector<8x384xf32> to vector<8x128xf32>
    %547 = arith.addf %545, %546 : vector<8x128xf32>
    %548 = arith.negf %547 : vector<8x128xf32>
    %549 = math.exp %548 : vector<8x128xf32>
    %cst_189 = arith.constant 1.000000e+00 : f32
    %550 = vector.broadcast %cst_189 : f32 to vector<8x128xf32>
    %551 = arith.addf %550, %549 : vector<8x128xf32>
    %552 = arith.divf %550, %551 : vector<8x128xf32>
    %553 = vector.extract_strided_slice %540 {offsets = [0, 128], sizes = [8, 128], strides = [1, 1]} : vector<8x384xf32> to vector<8x128xf32>
    %554 = vector.extract_strided_slice %543 {offsets = [0, 128], sizes = [8, 128], strides = [1, 1]} : vector<8x384xf32> to vector<8x128xf32>
    %555 = arith.addf %553, %554 : vector<8x128xf32>
    %556 = arith.negf %555 : vector<8x128xf32>
    %557 = math.exp %556 : vector<8x128xf32>
    %cst_190 = arith.constant 1.000000e+00 : f32
    %558 = vector.broadcast %cst_190 : f32 to vector<8x128xf32>
    %559 = arith.addf %558, %557 : vector<8x128xf32>
    %560 = arith.divf %558, %559 : vector<8x128xf32>
    %561 = vector.extract_strided_slice %540 {offsets = [0, 256], sizes = [8, 128], strides = [1, 1]} : vector<8x384xf32> to vector<8x128xf32>
    %562 = vector.extract_strided_slice %543 {offsets = [0, 256], sizes = [8, 128], strides = [1, 1]} : vector<8x384xf32> to vector<8x128xf32>
    %563 = arith.mulf %552, %562 : vector<8x128xf32>
    %564 = arith.addf %561, %563 : vector<8x128xf32>
    %565 = math.tanh %564 : vector<8x128xf32>
    %cst_191 = arith.constant 1.000000e+00 : f32
    %566 = vector.broadcast %cst_191 : f32 to vector<8x128xf32>
    %567 = arith.subf %566, %560 : vector<8x128xf32>
    %568 = arith.mulf %567, %565 : vector<8x128xf32>
    %569 = arith.mulf %560, %544 : vector<8x128xf32>
    %570 = arith.addf %568, %569 : vector<8x128xf32>
    %571 = vector.extract_strided_slice %538 {offsets = [0, 384], sizes = [8, 384], strides = [1, 1]} : vector<8x768xf32> to vector<8x384xf32>
    %c0_192 = arith.constant 0 : index
    %c128_193 = arith.constant 128 : index
    %572 = vector.load %arg11[%c0_192, %c128_193] : memref<8x256xf32, #tpu.memory_space<vmem>>, vector<8x128xf32>
    %573 = vector.extract_strided_slice %542 {offsets = [0, 0], sizes = [8, 128], strides = [1, 1]} : vector<8x384xf32> to vector<8x128xf32>
    %574 = vector.extract_strided_slice %571 {offsets = [0, 0], sizes = [8, 128], strides = [1, 1]} : vector<8x384xf32> to vector<8x128xf32>
    %575 = arith.addf %573, %574 : vector<8x128xf32>
    %576 = arith.negf %575 : vector<8x128xf32>
    %577 = math.exp %576 : vector<8x128xf32>
    %cst_194 = arith.constant 1.000000e+00 : f32
    %578 = vector.broadcast %cst_194 : f32 to vector<8x128xf32>
    %579 = arith.addf %578, %577 : vector<8x128xf32>
    %580 = arith.divf %578, %579 : vector<8x128xf32>
    %581 = vector.extract_strided_slice %542 {offsets = [0, 128], sizes = [8, 128], strides = [1, 1]} : vector<8x384xf32> to vector<8x128xf32>
    %582 = vector.extract_strided_slice %571 {offsets = [0, 128], sizes = [8, 128], strides = [1, 1]} : vector<8x384xf32> to vector<8x128xf32>
    %583 = arith.addf %581, %582 : vector<8x128xf32>
    %584 = arith.negf %583 : vector<8x128xf32>
    %585 = math.exp %584 : vector<8x128xf32>
    %cst_195 = arith.constant 1.000000e+00 : f32
    %586 = vector.broadcast %cst_195 : f32 to vector<8x128xf32>
    %587 = arith.addf %586, %585 : vector<8x128xf32>
    %588 = arith.divf %586, %587 : vector<8x128xf32>
    %589 = vector.extract_strided_slice %542 {offsets = [0, 256], sizes = [8, 128], strides = [1, 1]} : vector<8x384xf32> to vector<8x128xf32>
    %590 = vector.extract_strided_slice %571 {offsets = [0, 256], sizes = [8, 128], strides = [1, 1]} : vector<8x384xf32> to vector<8x128xf32>
    %591 = arith.mulf %580, %590 : vector<8x128xf32>
    %592 = arith.addf %589, %591 : vector<8x128xf32>
    %593 = math.tanh %592 : vector<8x128xf32>
    %cst_196 = arith.constant 1.000000e+00 : f32
    %594 = vector.broadcast %cst_196 : f32 to vector<8x128xf32>
    %595 = arith.subf %594, %588 : vector<8x128xf32>
    %596 = arith.mulf %595, %593 : vector<8x128xf32>
    %597 = arith.mulf %588, %572 : vector<8x128xf32>
    %598 = arith.addf %596, %597 : vector<8x128xf32>
    %c0_197 = arith.constant 0 : index
    %c0_198 = arith.constant 0 : index
    %599 = vector.load %arg11[%c0_197, %c0_198] : memref<8x256xf32, #tpu.memory_space<vmem>>, vector<8x128xf32>
    tpu.vector_store %arg11[%c0_197, %c0_198], %570 {strides = array<i32>} : memref<8x256xf32, #tpu.memory_space<vmem>>, vector<8x128xf32>,
    %c0_199 = arith.constant 0 : index
    %c128_200 = arith.constant 128 : index
    %600 = vector.load %arg11[%c0_199, %c128_200] : memref<8x256xf32, #tpu.memory_space<vmem>>, vector<8x128xf32>
    tpu.vector_store %arg11[%c0_199, %c128_200], %598 {strides = array<i32>} : memref<8x256xf32, #tpu.memory_space<vmem>>, vector<8x128xf32>,
    %601 = arith.index_cast %533 : i32 to index
    %c0_201 = arith.constant 0 : index
    %602 = vector.load %arg8[%601, %c0_201] : memref<64x256xf32, #tpu.memory_space<vmem>>, vector<8x128xf32>
    tpu.vector_store %arg8[%601, %c0_201], %570 {strides = array<i32>} : memref<64x256xf32, #tpu.memory_space<vmem>>, vector<8x128xf32>,
    %603 = arith.index_cast %535 : i32 to index
    %c128_202 = arith.constant 128 : index
    %604 = vector.load %arg8[%603, %c128_202] : memref<64x256xf32, #tpu.memory_space<vmem>>, vector<8x128xf32>
    tpu.vector_store %arg8[%603, %c128_202], %598 {strides = array<i32>} : memref<64x256xf32, #tpu.memory_space<vmem>>, vector<8x128xf32>,
    %c8_i32_203 = arith.constant 8 : i32
    %c0_204 = arith.constant 0 : index
    %c0_205 = arith.constant 0 : index
    %605 = vector.load %arg11[%c0_204, %c0_205] : memref<8x256xf32, #tpu.memory_space<vmem>>, vector<8x256xf32>
    %c0_206 = arith.constant 0 : index
    %c0_207 = arith.constant 0 : index
    %606 = vector.load %arg6[%c0_206, %c0_207] : memref<256x128xf32, #tpu.memory_space<vmem>>, vector<256x128xf32>
    %cst_208 = arith.constant dense<0.000000e+00> : vector<8x128xf32>
    %607 = tpu.matmul %605, %606, %cst_208 {dimension_numbers = #tpu.dot_dimension_numbers<[1], [0], [0], [1], [0, 0, 1, 1], [], []>} : vector<8x256xf32>, vector<256x128xf32>, vector<8x128xf32> -> vector<8x128xf32>
    %c0_209 = arith.constant 0 : index
    %c0_210 = arith.constant 0 : index
    %608 = vector.load %arg7[%c0_209, %c0_210] : memref<1x128xf32, #tpu.memory_space<vmem>>, vector<1x128xf32>
    %609 = vector.broadcast %608 : vector<1x128xf32> to vector<8x128xf32>
    %610 = arith.addf %607, %609 : vector<8x128xf32>
    %611 = math.tanh %610 : vector<8x128xf32>
    %c0_211 = arith.constant 0 : index
    %c0_212 = arith.constant 0 : index
    %612 = vector.load %arg9[%c0_211, %c0_212] : memref<8x128xf32, #tpu.memory_space<vmem>>, vector<8x128xf32>
    tpu.vector_store %arg9[%c0_211, %c0_212], %611 {strides = array<i32>} : memref<8x128xf32, #tpu.memory_space<vmem>>, vector<8x128xf32>,
    return
  }
  func.func @transform_0(%arg0: i32) -> (i32, i32) {
    %c0_i32 = arith.constant 0 : i32
    %c0_i32_0 = arith.constant 0 : i32
    return %arg0, %c0_i32 : i32, i32
  }
  func.func @transform_1(%arg0: i32) -> (i32, i32) {
    %c0_i32 = arith.constant 0 : i32
    %c0_i32_0 = arith.constant 0 : i32
    %c0_i32_1 = arith.constant 0 : i32
    return %c0_i32, %c0_i32_0 : i32, i32
  }
  func.func @transform_2(%arg0: i32) -> (i32, i32) {
    %c0_i32 = arith.constant 0 : i32
    %c0_i32_0 = arith.constant 0 : i32
    %c0_i32_1 = arith.constant 0 : i32
    return %c0_i32, %c0_i32_0 : i32, i32
  }
  func.func @transform_3(%arg0: i32) -> (i32, i32) {
    %c0_i32 = arith.constant 0 : i32
    %c0_i32_0 = arith.constant 0 : i32
    %c0_i32_1 = arith.constant 0 : i32
    return %c0_i32, %c0_i32_0 : i32, i32
  }
  func.func @transform_4(%arg0: i32) -> (i32, i32) {
    %c0_i32 = arith.constant 0 : i32
    %c0_i32_0 = arith.constant 0 : i32
    %c0_i32_1 = arith.constant 0 : i32
    return %c0_i32, %c0_i32_0 : i32, i32
  }
  func.func @transform_5(%arg0: i32) -> (i32, i32) {
    %c0_i32 = arith.constant 0 : i32
    %c0_i32_0 = arith.constant 0 : i32
    %c0_i32_1 = arith.constant 0 : i32
    return %c0_i32, %c0_i32_0 : i32, i32
  }
  func.func @transform_6(%arg0: i32) -> (i32, i32) {
    %c0_i32 = arith.constant 0 : i32
    %c0_i32_0 = arith.constant 0 : i32
    %c0_i32_1 = arith.constant 0 : i32
    return %c0_i32, %c0_i32_0 : i32, i32
  }
  func.func @transform_7(%arg0: i32) -> (i32, i32) {
    %c0_i32 = arith.constant 0 : i32
    %c0_i32_0 = arith.constant 0 : i32
    return %arg0, %c0_i32 : i32, i32
  }
  func.func @transform_8(%arg0: i32) -> (i32, i32) {
    %c0_i32 = arith.constant 0 : i32
    %c0_i32_0 = arith.constant 0 : i32
    return %arg0, %c0_i32 : i32, i32
  }
}

</mosaic_0001>

<bundles_post_ra>
// kernel: encoder_forward.1
= control target key start
LH: loop header
LB: loop body
LE: loop exit
PB: predicated region body
PF: predicated region fallthrough
CT: control target
= control target key end

     0   :  { %v7513_v3 = vmov 0.0   ;;  %s7498_s1 = inlined_call_operand.vmem [shape: f32[128,768], index: 1, kind: input, shape index: {}]   ;;  %s7499_s3 = inlined_call_operand.vmem [shape: f32[256,768], index: 3, kind: input, shape index: {}]   ;;  %s7500_s0 = inlined_call_operand.vmem [shape: f32[64,128], index: 0, kind: input, shape index: {}]   ;;  %s7501_s2 = inlined_call_operand.vmem [shape: f32[1,768], index: 2, kind: input, shape index: {}]   ;;  %s7502_s4 = inlined_call_operand.vmem [shape: f32[1,768], index: 4, kind: input, shape index: {}]   ;;  %s7503_s7 = inlined_call_operand.vmem [shape: f32[64,256], index: 7, kind: output, shape index: {0}]   ;;  %s7504_s5 = inlined_call_operand.vmem [shape: f32[256,128], index: 5, kind: input, shape index: {}]   ;;  %s7505_s6 = inlined_call_operand.vmem [shape: f32[1,128], index: 6, kind: input, shape index: {}]   ;;  %s7506_s8 = inlined_call_operand.vmem [shape: f32[8,128], index: 8, kind: output, shape index: {1}]  }
   0x1   :  { %v37_v0 = vld [vmem:[%s7498_s1 + $0x8] sm:$0xff]  ;;  %v43_v1 = vld [vmem:[%s7498_s1 + $0x38] sm:$0xff]  ;;  %341 = vmatprep.mubr.f32.mxu1 %v7513_v3  ;;  %228 = vmatprep.mubr.f32.mxu0 %v7513_v3  ;;  %v36_v6 = vld [vmem:[%s7498_s1] sm:$0xff] }
   0x2   :  { %v39_v2 = vld [vmem:[%s7498_s1 + $0x18] sm:$0xff]  ;;  %v3186_v4 = vpack.c.bf16 %v43_v1, %v37_v0  ;;  %v45_v5 = vld [vmem:[%s7498_s1 + $0x48] sm:$0xff]  ;;  %v42_v7 = vld [vmem:[%s7498_s1 + $0x30] sm:$0xff] }
   0x3   :  { %v3218_v8 = vpack.c.bf16 %v45_v5, %v39_v2  ;;  %v3188_v9 = vpack.c.bf16 %v42_v7, %v36_v6  ;;  %v38_v10 = vld [vmem:[%s7498_s1 + $0x10] sm:$0xff]  ;;  %v44_v11 = vld [vmem:[%s7498_s1 + $0x40] sm:$0xff]  ;;  %v49_v12 = vld [vmem:[%s7498_s1 + $0x68] sm:$0xff] }
   0x4   :  { %3187 = vmatprep.subr.bf16.mxu0 %v3186_v4  ;;  %v3220_v13 = vpack.c.bf16 %v44_v11, %v38_v10  ;;  %v55_v14 = vld [vmem:[%s7498_s1 + $0x98] sm:$0xff]  ;;  %v57_v16 = vld [vmem:[%s7498_s1 + $0xa8] sm:$0xff]  ;;  %v48_v19 = vld [vmem:[%s7498_s1 + $0x60] sm:$0xff] }
   0x5   :  { %v51_v15 = vld [vmem:[%s7498_s1 + $0x78] sm:$0xff]  ;;  %3219 = vmatprep.subr.bf16.mxu1 %v3218_v8  ;;  %3189 = vmatpush1.bf16.msra.mxu0 %v3188_v9  ;;  %v3190_v17 = vpack.c.bf16 %v55_v14, %v49_v12  ;;  %v54_v20 = vld [vmem:[%s7498_s1 + $0x90] sm:$0xff]  ;;  %v56_v23 = vld [vmem:[%s7498_s1 + $0xa0] sm:$0xff] }
   0x6   :  { %v3222_v18 = vpack.c.bf16 %v57_v16, %v51_v15  ;;  %v50_v21 = vld [vmem:[%s7498_s1 + $0x70] sm:$0xff]  ;;  %3221 = vmatpush1.bf16.msra.mxu1 %v3220_v13  ;;  %v3192_v22 = vpack.c.bf16 %v54_v20, %v48_v19  ;;  %v61_v24 = vld [vmem:[%s7498_s1 + $0xc8] sm:$0xff]  ;;  %v67_v25 = vld [vmem:[%s7498_s1 + $0xf8] sm:$0xff] }
   0x7   :  { %3191 = vmatprep.subr.bf16.mxu0 %v3190_v17  ;;  %v3224_v26 = vpack.c.bf16 %v56_v23, %v50_v21  ;;  %v3194_v27 = vpack.c.bf16 %v67_v25, %v61_v24  ;;  %v63_v28 = vld [vmem:[%s7498_s1 + $0xd8] sm:$0xff]  ;;  %v69_v29 = vld [vmem:[%s7498_s1 + $0x108] sm:$0xff]  ;;  %v60_v30 = vld [vmem:[%s7498_s1 + $0xc0] sm:$0xff] }
   0x8   :  { %3223 = vmatprep.subr.bf16.mxu1 %v3222_v18  ;;  %v3226_v31 = vpack.c.bf16 %v69_v29, %v63_v28  ;;  %v66_v32 = vld [vmem:[%s7498_s1 + $0xf0] sm:$0xff]  ;;  %v68_v34 = vld [vmem:[%s7498_s1 + $0x100] sm:$0xff]  ;;  %v73_v36 = vld [vmem:[%s7498_s1 + $0x128] sm:$0xff] }
   0x9   :  { %v62_v33 = vld [vmem:[%s7498_s1 + $0xd0] sm:$0xff]  ;;  %3193 = vmatpush1.bf16.msra.mxu0 %v3192_v22  ;;  %v3196_v35 = vpack.c.bf16 %v66_v32, %v60_v30  ;;  %v79_v37 = vld [vmem:[%s7498_s1 + $0x158] sm:$0xff]  ;;  %v81_v41 = vld [vmem:[%s7498_s1 + $0x168] sm:$0xff] }
   0xa   :  { %v75_v38 = vld [vmem:[%s7498_s1 + $0x138] sm:$0xff]  ;;  %3225 = vmatpush1.bf16.msra.mxu1 %v3224_v26  ;;  %3195 = vmatprep.subr.bf16.mxu0 %v3194_v27  ;;  %v3228_v39 = vpack.c.bf16 %v68_v34, %v62_v33  ;;  %v3198_v40 = vpack.c.bf16 %v79_v37, %v73_v36  ;;  %v72_v42 = vld [vmem:[%s7498_s1 + $0x120] sm:$0xff]  ;;  %v78_v43 = vld [vmem:[%s7498_s1 + $0x150] sm:$0xff] }
   0xb   :  { %3227 = vmatprep.subr.bf16.mxu1 %v3226_v31  ;;  %v3230_v44 = vpack.c.bf16 %v81_v41, %v75_v38  ;;  %v74_v45 = vld [vmem:[%s7498_s1 + $0x130] sm:$0xff]  ;;  %v80_v46 = vld [vmem:[%s7498_s1 + $0x160] sm:$0xff]  ;;  %v85_v47 = vld [vmem:[%s7498_s1 + $0x188] sm:$0xff]  ;;  %v3200_v51 = vpack.c.bf16 %v78_v43, %v72_v42 }
   0xc   :  { %v91_v48 = vld [vmem:[%s7498_s1 + $0x1b8] sm:$0xff]  ;;  %v93_v50 = vld [vmem:[%s7498_s1 + $0x1c8] sm:$0xff]  ;;  %v3232_v52 = vpack.c.bf16 %v80_v46, %v74_v45  ;;  %v84_v54 = vld [vmem:[%s7498_s1 + $0x180] sm:$0xff] }
   0xd   :  { %v87_v49 = vld [vmem:[%s7498_s1 + $0x198] sm:$0xff]  ;;  %3197 = vmatpush1.bf16.msra.mxu0 %v3196_v35  ;;  %v3202_v53 = vpack.c.bf16 %v91_v48, %v85_v47  ;;  %v90_v55 = vld [vmem:[%s7498_s1 + $0x1b0] sm:$0xff]  ;;  %v92_v58 = vld [vmem:[%s7498_s1 + $0x1c0] sm:$0xff] }
   0xe   :  { %3229 = vmatpush1.bf16.msra.mxu1 %v3228_v39  ;;  %3199 = vmatprep.subr.bf16.mxu0 %v3198_v40  ;;  %v86_v56 = vld [vmem:[%s7498_s1 + $0x190] sm:$0xff]  ;;  %v3234_v57 = vpack.c.bf16 %v93_v50, %v87_v49  ;;  %v97_v59 = vld [vmem:[%s7498_s1 + $0x1e8] sm:$0xff]  ;;  %v103_v60 = vld [vmem:[%s7498_s1 + $0x218] sm:$0xff]  ;;  %v3204_v63 = vpack.c.bf16 %v90_v55, %v84_v54 }
   0xf   :  { %3231 = vmatprep.subr.bf16.mxu1 %v3230_v44  ;;  %v99_v61 = vld [vmem:[%s7498_s1 + $0x1f8] sm:$0xff]  ;;  %v105_v62 = vld [vmem:[%s7498_s1 + $0x228] sm:$0xff]  ;;  %v3236_v0 = vpack.c.bf16 %v92_v58, %v86_v56  ;;  %v3206_v1 = vpack.c.bf16 %v103_v60, %v97_v59  ;;  %v96_v2 = vld [vmem:[%s7498_s1 + $0x1e0] sm:$0xff] }
  0x10   :  { %v102_v4 = vld [vmem:[%s7498_s1 + $0x210] sm:$0xff]  ;;  %v3238_v6 = vpack.c.bf16 %v105_v62, %v99_v61  ;;  %v104_v7 = vld [vmem:[%s7498_s1 + $0x220] sm:$0xff]  ;;  %v109_v8 = vld [vmem:[%s7498_s1 + $0x248] sm:$0xff] }
  0x11   :  { %3201 = vmatpush1.bf16.msra.mxu0 %v3200_v51  ;;  %v98_v5 = vld [vmem:[%s7498_s1 + $0x1f0] sm:$0xff]  ;;  %v115_v9 = vld [vmem:[%s7498_s1 + $0x278] sm:$0xff]  ;;  %v117_v11 = vld [vmem:[%s7498_s1 + $0x288] sm:$0xff]  ;;  %v3208_v12 = vpack.c.bf16 %v102_v4, %v96_v2 }
  0x12   :  { %3233 = vmatpush1.bf16.msra.mxu1 %v3232_v52  ;;  %3203 = vmatprep.subr.bf16.mxu0 %v3202_v53  ;;  %v111_v10 = vld [vmem:[%s7498_s1 + $0x258] sm:$0xff]  ;;  %v3240_v13 = vpack.c.bf16 %v104_v7, %v98_v5  ;;  %v3210_v14 = vpack.c.bf16 %v115_v9, %v109_v8  ;;  %v108_v15 = vld [vmem:[%s7498_s1 + $0x240] sm:$0xff]  ;;  %v114_v16 = vld [vmem:[%s7498_s1 + $0x270] sm:$0xff] }
  0x13   :  { %3235 = vmatprep.subr.bf16.mxu1 %v3234_v57  ;;  %v110_v17 = vld [vmem:[%s7498_s1 + $0x250] sm:$0xff]  ;;  %v3242_v18 = vpack.c.bf16 %v117_v11, %v111_v10  ;;  %v116_v19 = vld [vmem:[%s7498_s1 + $0x280] sm:$0xff]  ;;  %v121_v20 = vld [vmem:[%s7498_s1 + $0x2a8] sm:$0xff]  ;;  %v3212_v24 = vpack.c.bf16 %v114_v16, %v108_v15 }
  0x14   :  { %v127_v21 = vld [vmem:[%s7498_s1 + $0x2d8] sm:$0xff]  ;;  %v129_v23 = vld [vmem:[%s7498_s1 + $0x2e8] sm:$0xff]  ;;  %v3244_v25 = vpack.c.bf16 %v116_v19, %v110_v17  ;;  %v120_v27 = vld [vmem:[%s7498_s1 + $0x2a0] sm:$0xff] }
  0x15   :  { %3205 = vmatpush1.bf16.msra.mxu0 %v3204_v63  ;;  %v123_v22 = vld [vmem:[%s7498_s1 + $0x2b8] sm:$0xff]  ;;  %v3214_v26 = vpack.c.bf16 %v127_v21, %v121_v20  ;;  %v126_v28 = vld [vmem:[%s7498_s1 + $0x2d0] sm:$0xff]  ;;  %v128_v31 = vld [vmem:[%s7498_s1 + $0x2e0] sm:$0xff] }
  0x16   :  { %3237 = vmatpush1.bf16.msra.mxu1 %v3236_v0  ;;  %3207 = vmatprep.subr.bf16.mxu0 %v3206_v1  ;;  %v122_v29 = vld [vmem:[%s7498_s1 + $0x2b0] sm:$0xff]  ;;  %v3246_v30 = vpack.c.bf16 %v129_v23, %v123_v22  ;;  %v41_v32 = vld [vmem:[%s7498_s1 + $0x28] sm:$0xff]  ;;  %v47_v33 = vld [vmem:[%s7498_s1 + $0x58] sm:$0xff]  ;;  %v3216_v36 = vpack.c.bf16 %v126_v28, %v120_v27 }
  0x17   :  { %3239 = vmatprep.subr.bf16.mxu1 %v3238_v6  ;;  %v556_v34 = vld [vmem:[%s7499_s3 + $0x18] sm:$0xff]  ;;  %v562_v35 = vld [vmem:[%s7499_s3 + $0x48] sm:$0xff]  ;;  %v3248_v37 = vpack.c.bf16 %v128_v31, %v122_v29  ;;  %v3250_v38 = vpack.c.bf16 %v47_v33, %v41_v32  ;;  %v40_v39 = vld [vmem:[%s7498_s1 + $0x20] sm:$0xff] }
  0x18   :  { %v46_v40 = vld [vmem:[%s7498_s1 + $0x50] sm:$0xff]  ;;  %v5319_v41 = vpack.c.bf16 %v562_v35, %v556_v34  ;;  %v561_v43 = vld [vmem:[%s7499_s3 + $0x40] sm:$0xff]  ;;  %v53_v44 = vld [vmem:[%s7498_s1 + $0x88] sm:$0xff] }
  0x19   :  { %3209 = vmatpush1.bf16.msra.mxu0 %v3208_v12  ;;  %v555_v42 = vld [vmem:[%s7499_s3 + $0x10] sm:$0xff]  ;;  %v59_v45 = vld [vmem:[%s7498_s1 + $0xb8] sm:$0xff]  ;;  %v574_v47 = vld [vmem:[%s7499_s3 + $0xa8] sm:$0xff]  ;;  %v3252_v49 = vpack.c.bf16 %v46_v40, %v40_v39 }
  0x1a   :  { %3241 = vmatpush1.bf16.msra.mxu1 %v3240_v13  ;;  %3211 = vmatprep.subr.bf16.mxu0 %v3210_v14  ;;  %7782 = vst [vmem:[#allocation4_spill] sm:$0xff] %v5319_v41  ;;  %v568_v46 = vld [vmem:[%s7499_s3 + $0x78] sm:$0xff]  ;;  %v5342_v48 = vld [vmem:[%s7500_s0] sm:$0xff]  ;;  %v5344_v50 = vpack.c.bf16 %v561_v43, %v555_v42  ;;  %v58_v52 = vld [vmem:[%s7498_s1 + $0xb0] sm:$0xff]  ;;  %v3254_v54 = vpack.c.bf16 %v59_v45, %v53_v44 }
  0x1b   :  { %3243 = vmatprep.subr.bf16.mxu1 %v3242_v18  ;;  %v52_v51 = vld [vmem:[%s7498_s1 + $0x80] sm:$0xff]  ;;  %v567_v53 = vld [vmem:[%s7499_s3 + $0x70] sm:$0xff]  ;;  %v5356_v55 = vpack.c.bf16 %v574_v47, %v568_v46  ;;  %v65_v57 = vld [vmem:[%s7498_s1 + $0xe8] sm:$0xff] }
  0x1c   :  { %7783 = vst [vmem:[#allocation5_spill] sm:$0xff] %v5344_v50  ;;  %v573_v56 = vld [vmem:[%s7499_s3 + $0xa0] sm:$0xff]  ;;  %v71_v58 = vld [vmem:[%s7498_s1 + $0x118] sm:$0xff]  ;;  %v586_v60 = vld [vmem:[%s7499_s3 + $0x108] sm:$0xff]  ;;  %v3256_v62 = vpack.c.bf16 %v58_v52, %v52_v51 }
  0x1d   :  { %3213 = vmatpush1.bf16.msra.mxu0 %v3212_v24  ;;  %7784 = vst [vmem:[#allocation6_spill] sm:$0xff] %v5356_v55  ;;  %v580_v59 = vld [vmem:[%s7499_s3 + $0xd8] sm:$0xff]  ;;  %v5378_v61 = vld [vmem:[%s7500_s0 + $0x8] sm:$0xff]  ;;  %v5382_v63 = vpack.c.bf16 %v573_v56, %v567_v53  ;;  %v3258_v0 = vpack.c.bf16 %v71_v58, %v65_v57  ;;  %v64_v1 = vld [vmem:[%s7498_s1 + $0xe0] sm:$0xff] }
  0x1e   :  { %3245 = vmatpush1.bf16.msra.mxu1 %v3244_v25  ;;  %3215 = vmatprep.subr.bf16.mxu0 %v3214_v26  ;;  %v70_v2 = vld [vmem:[%s7498_s1 + $0x110] sm:$0xff]  ;;  %v5394_v5 = vpack.c.bf16 %v586_v60, %v580_v59  ;;  %v585_v6 = vld [vmem:[%s7499_s3 + $0x100] sm:$0xff]  ;;  %v77_v7 = vld [vmem:[%s7498_s1 + $0x148] sm:$0xff] }
  0x1f   :  { %3247 = vmatprep.subr.bf16.mxu1 %v3246_v30  ;;  %7785 = vst [vmem:[#allocation7_spill] sm:$0xff] %v5382_v63  ;;  %v579_v4 = vld [vmem:[%s7499_s3 + $0xd0] sm:$0xff]  ;;  %v83_v8 = vld [vmem:[%s7498_s1 + $0x178] sm:$0xff]  ;;  %v598_v10 = vld [vmem:[%s7499_s3 + $0x168] sm:$0xff]  ;;  %v3260_v12 = vpack.c.bf16 %v70_v2, %v64_v1 }
  0x20   :  { %7786 = vst [vmem:[#allocation8_spill] sm:$0xff] %v5394_v5  ;;  %v592_v9 = vld [vmem:[%s7499_s3 + $0x138] sm:$0xff]  ;;  %v5417_v11 = vld [vmem:[%s7500_s0 + $0x10] sm:$0xff]  ;;  %v5420_v13 = vpack.c.bf16 %v585_v6, %v579_v4  ;;  %v3262_v14 = vpack.c.bf16 %v83_v8, %v77_v7  ;;  %v76_v15 = vld [vmem:[%s7498_s1 + $0x140] sm:$0xff] }
  0x21   :  { %3217 = vmatpush1.bf16.msra.mxu0 %v3216_v36  ;;  %v82_v16 = vld [vmem:[%s7498_s1 + $0x170] sm:$0xff]  ;;  %v5432_v18 = vpack.c.bf16 %v598_v10, %v592_v9  ;;  %v597_v19 = vld [vmem:[%s7499_s3 + $0x160] sm:$0xff]  ;;  %v89_v20 = vld [vmem:[%s7498_s1 + $0x1a8] sm:$0xff] }
  0x22   :  { %3249 = vmatpush1.bf16.msra.mxu1 %v3248_v37  ;;  %3251 = vmatprep.subr.bf16.mxu0 %v3250_v38  ;;  %7787 = vst [vmem:[#allocation9_spill] sm:$0xff] %v5420_v13  ;;  %v591_v17 = vld [vmem:[%s7499_s3 + $0x130] sm:$0xff]  ;;  %v95_v21 = vld [vmem:[%s7498_s1 + $0x1d8] sm:$0xff]  ;;  %v610_v23 = vld [vmem:[%s7499_s3 + $0x1c8] sm:$0xff]  ;;  %v3264_v25 = vpack.c.bf16 %v82_v16, %v76_v15 }
  0x23   :  { %3347 = vmatprep.subr.bf16.mxu1 %v5319_v41  ;;  %7788 = vst [vmem:[#allocation10_spill] sm:$0xff] %v5432_v18  ;;  %v604_v22 = vld [vmem:[%s7499_s3 + $0x198] sm:$0xff]  ;;  %v5459_v26 = vpack.c.bf16 %v597_v19, %v591_v17  ;;  %v3266_v27 = vpack.c.bf16 %v95_v21, %v89_v20  ;;  %v88_v28 = vld [vmem:[%s7498_s1 + $0x1a0] sm:$0xff]  ;;  %v94_v29 = vld [vmem:[%s7498_s1 + $0x1d0] sm:$0xff] }
  0x24   :  { %229 = vmatmul.mubr.f32.vlgmr.msra.gmra.mrb[0].mxu0 %v5342_v48  ;;  %v5456_v24 = vld [vmem:[%s7500_s0 + $0x18] sm:$0xff]  ;;  %v603_v30 = vld [vmem:[%s7499_s3 + $0x190] sm:$0xff]  ;;  %v5471_v31 = vpack.c.bf16 %v610_v23, %v604_v22  ;;  %v609_v32 = vld [vmem:[%s7499_s3 + $0x1c0] sm:$0xff]  ;;  %v3268_v38 = vpack.c.bf16 %v94_v29, %v88_v28 }
  0x25   :  { %342 = vmatmul.mubr.f32.vlgmr.msra.gmra.mrb[0].mxu1 %v5342_v48  ;;  %3253 = vmatpush1.bf16.msra.mxu0 %v3252_v49  ;;  %7789 = vst [vmem:[#allocation11_spill] sm:$0xff] %v5459_v26  ;;  %v101_v33 = vld [vmem:[%s7498_s1 + $0x208] sm:$0xff]  ;;  %v107_v34 = vld [vmem:[%s7498_s1 + $0x238] sm:$0xff]  ;;  %v5495_v37 = vld [vmem:[%s7500_s0 + $0x20] sm:$0xff]  ;;  %v5498_v39 = vpack.c.bf16 %v609_v32, %v603_v30 }
  0x26   :  { %3349 = vmatpush1.bf16.msra.mxu1 %v5344_v50  ;;  %234 = vmatprep.mubr.f32.mxu0 %v7513_v3  ;;  %7790 = vst [vmem:[#allocation12_spill] sm:$0xff] %v5471_v31  ;;  %v616_v35 = vld [vmem:[%s7499_s3 + $0x1f8] sm:$0xff]  ;;  %v622_v36 = vld [vmem:[%s7499_s3 + $0x228] sm:$0xff]  ;;  %v3270_v40 = vpack.c.bf16 %v107_v34, %v101_v33  ;;  %v100_v42 = vld [vmem:[%s7498_s1 + $0x200] sm:$0xff] }
  0x27   :  { %3255 = vmatprep.subr.bf16.mxu0 %v3254_v54  ;;  %3351 = vmatprep.subr.bf16.mxu1 %v5356_v55  ;;  %7791 = vst [vmem:[#allocation13_spill] sm:$0xff] %v5498_v39  ;;  %v106_v43 = vld [vmem:[%s7498_s1 + $0x230] sm:$0xff]  ;;  %v5510_v45 = vpack.c.bf16 %v622_v36, %v616_v35  ;;  %v621_v46 = vld [vmem:[%s7499_s3 + $0x220] sm:$0xff]  ;;  %v113_v47 = vld [vmem:[%s7498_s1 + $0x268] sm:$0xff] }
  0x28   :  { %235 = vmatmul.mubr.f32.gmra.mrb[2].mxu0 %v5378_v61  ;;  %347 = vmatprep.mubr.f32.mxu1 %v7513_v3  ;;  %v615_v44 = vld [vmem:[%s7499_s3 + $0x1f0] sm:$0xff]  ;;  %v119_v49 = vld [vmem:[%s7498_s1 + $0x298] sm:$0xff]  ;;  %v634_v52 = vld [vmem:[%s7499_s3 + $0x288] sm:$0xff]  ;;  %v3272_v54 = vpack.c.bf16 %v106_v43, %v100_v42 }
  0x29   :  { %3257 = vmatpush1.bf16.msra.mxu0 %v3256_v62  ;;  %240 = vmatprep.mubr.f32.mxu0 %v7513_v3  ;;  %7792 = vst [vmem:[#allocation14_spill] sm:$0xff] %v5510_v45  ;;  %v628_v51 = vld [vmem:[%s7499_s3 + $0x258] sm:$0xff]  ;;  %v5534_v53 = vld [vmem:[%s7500_s0 + $0x28] sm:$0xff]  ;;  %v5537_v56 = vpack.c.bf16 %v621_v46, %v615_v44  ;;  %v3274_v57 = vpack.c.bf16 %v119_v49, %v113_v47  ;;  %v112_v58 = vld [vmem:[%s7498_s1 + $0x260] sm:$0xff] }
  0x2a   :  { %3353 = vmatpush1.bf16.msra.mxu1 %v5382_v63  ;;  %3259 = vmatprep.subr.bf16.mxu0 %v3258_v0  ;;  %v118_v59 = vld [vmem:[%s7498_s1 + $0x290] sm:$0xff]  ;;  %v5549_v62 = vpack.c.bf16 %v634_v52, %v628_v51  ;;  %v633_v0 = vld [vmem:[%s7499_s3 + $0x280] sm:$0xff]  ;;  %v125_v1 = vld [vmem:[%s7498_s1 + $0x2c8] sm:$0xff] }
  0x2b   :  { %3355 = vmatprep.subr.bf16.mxu1 %v5394_v5  ;;  %348 = vmatmul.mubr.f32.gmra.mrb[2].mxu1 %v5378_v61  ;;  %7793 = vst [vmem:[#allocation15_spill] sm:$0xff] %v5537_v56  ;;  %v627_v60 = vld [vmem:[%s7499_s3 + $0x250] sm:$0xff]  ;;  %v131_v2 = vld [vmem:[%s7498_s1 + $0x2f8] sm:$0xff]  ;;  %v646_v6 = vld [vmem:[%s7499_s3 + $0x2e8] sm:$0xff]  ;;  %v3276_v8 = vpack.c.bf16 %v118_v59, %v112_v58 }
  0x2c   :  { %241 = vmatmul.mubr.f32.gmra.mrb[4].mxu0 %v5417_v11  ;;  %353 = vmatprep.mubr.f32.mxu1 %v7513_v3  ;;  %7794 = vst [vmem:[#allocation16_spill] sm:$0xff] %v5549_v62  ;;  %v640_v4 = vld [vmem:[%s7499_s3 + $0x2b8] sm:$0xff]  ;;  %v5573_v7 = vld [vmem:[%s7500_s0 + $0x30] sm:$0xff]  ;;  %v5576_v9 = vpack.c.bf16 %v633_v0, %v627_v60  ;;  %v3278_v10 = vpack.c.bf16 %v131_v2, %v125_v1  ;;  %v645_v17 = vld [vmem:[%s7499_s3 + $0x2e0] sm:$0xff] }
  0x2d   :  { %3261 = vmatpush1.bf16.msra.mxu0 %v3260_v12  ;;  %246 = vmatprep.mubr.f32.mxu0 %v7513_v3  ;;  %v124_v12 = vld [vmem:[%s7498_s1 + $0x2c0] sm:$0xff]  ;;  %v639_v15 = vld [vmem:[%s7499_s3 + $0x2b0] sm:$0xff]  ;;  %v5588_v16 = vpack.c.bf16 %v646_v6, %v640_v4  ;;  %v554_v19 = vld [vmem:[%s7499_s3 + $0x8] sm:$0xff] }
  0x2e   :  { %3357 = vmatpush1.bf16.msra.mxu1 %v5420_v13  ;;  %3263 = vmatprep.subr.bf16.mxu0 %v3262_v14  ;;  %7795 = vst [vmem:[#allocation17_spill] sm:$0xff] %v5576_v9  ;;  %v130_v14 = vld [vmem:[%s7498_s1 + $0x2f0] sm:$0xff]  ;;  %v560_v20 = vld [vmem:[%s7499_s3 + $0x38] sm:$0xff]  ;;  %v658_v22 = vld [vmem:[%s7499_s3 + $0x348] sm:$0xff] }
  0x2f   :  { %3359 = vmatprep.subr.bf16.mxu1 %v5432_v18  ;;  %354 = vmatmul.mubr.f32.gmra.mrb[4].mxu1 %v5417_v11  ;;  %7796 = vst [vmem:[#allocation18_spill] sm:$0xff] %v5588_v16  ;;  %v652_v21 = vld [vmem:[%s7499_s3 + $0x318] sm:$0xff]  ;;  %v5617_v28 = vpack.c.bf16 %v560_v20, %v554_v19  ;;  %v553_v29 = vld [vmem:[%s7499_s3] sm:$0xff]  ;;  %v559_v30 = vld [vmem:[%s7499_s3 + $0x30] sm:$0xff] }
  0x30   :  { %247 = vmatmul.mubr.f32.gmra.mrb[6].mxu0 %v5456_v24  ;;  %359 = vmatprep.mubr.f32.mxu1 %v7513_v3  ;;  %v5612_v23 = vld [vmem:[%s7500_s0 + $0x38] sm:$0xff]  ;;  %v651_v32 = vld [vmem:[%s7499_s3 + $0x310] sm:$0xff]  ;;  %v5629_v33 = vpack.c.bf16 %v658_v22, %v652_v21  ;;  %v657_v34 = vld [vmem:[%s7499_s3 + $0x340] sm:$0xff]  ;;  %v5650_v42 = vpack.c.bf16 %v559_v30, %v553_v29 }
  0x31   :  { %3265 = vmatpush1.bf16.msra.mxu0 %v3264_v25  ;;  %252 = vmatprep.mubr.f32.mxu0 %v7513_v3  ;;  %v3280_v25 = vpack.c.bf16 %v130_v14, %v124_v12  ;;  %7798 = vst [vmem:[#allocation20_spill] sm:$0xff] %v5617_v28  ;;  %v566_v35 = vld [vmem:[%s7499_s3 + $0x68] sm:$0xff]  ;;  %v572_v36 = vld [vmem:[%s7499_s3 + $0x98] sm:$0xff]  ;;  %v5654_v43 = vpack.c.bf16 %v657_v34, %v651_v32  ;;  %v565_v46 = vld [vmem:[%s7499_s3 + $0x60] sm:$0xff] }
  0x32   :  { %3361 = vmatpush1.bf16.msra.mxu1 %v5459_v26  ;;  %3267 = vmatprep.subr.bf16.mxu0 %v3266_v27  ;;  %v5615_v27 = vpack.c.bf16 %v645_v17, %v639_v15  ;;  %7799 = vst [vmem:[#allocation21_spill] sm:$0xff] %v5629_v33  ;;  %7800 = vst [vmem:[#allocation22_spill] sm:$0xff] %v5650_v42  ;;  %v5656_v44 = vpack.c.bf16 %v572_v36, %v566_v35  ;;  %v571_v47 = vld [vmem:[%s7499_s3 + $0x90] sm:$0xff]  ;;  %v669_v52 = vld [vmem:[%s7499_s3 + $0x3a0] sm:$0xff] }
  0x33   :  { %3363 = vmatprep.subr.bf16.mxu1 %v5471_v31  ;;  %360 = vmatmul.mubr.f32.gmra.mrb[6].mxu1 %v5456_v24  ;;  %7801 = vst [vmem:[#allocation23_spill] sm:$0xff] %v5654_v43  ;;  %v663_v49 = vld [vmem:[%s7499_s3 + $0x370] sm:$0xff]  ;;  %v676_v58 = vld [vmem:[%s7499_s3 + $0x3d8] sm:$0xff]  ;;  %v682_v59 = vld [vmem:[%s7499_s3 + $0x408] sm:$0xff]  ;;  %v5689_v60 = vpack.c.bf16 %v571_v47, %v565_v46 }
  0x34   :  { %253 = vmatmul.mubr.f32.gmra.mrb[8].mxu0 %v5495_v37  ;;  %365 = vmatprep.mubr.f32.mxu1 %v7513_v3  ;;  %7797 = vst [vmem:[#allocation19_spill] sm:$0xff] %v5615_v27  ;;  %7802 = vst [vmem:[#allocation24_spill] sm:$0xff] %v5656_v44  ;;  %v577_v1 = vld [vmem:[%s7499_s3 + $0xc0] sm:$0xff]  ;;  %v583_v2 = vld [vmem:[%s7499_s3 + $0xf0] sm:$0xff]  ;;  %v5708_v6 = vpack.c.bf16 %v682_v59, %v676_v58 }
  0x35   :  { %3269 = vmatpush1.bf16.msra.mxu0 %v3268_v38  ;;  %258 = vmatprep.mubr.f32.mxu0 %v7513_v3  ;;  %v664_v38 = vld [vmem:[%s7499_s3 + $0x378] sm:$0xff]  ;;  %7804 = vst [vmem:[#allocation26_spill] sm:$0xff] %v5689_v60  ;;  %v675_v4 = vld [vmem:[%s7499_s3 + $0x3d0] sm:$0xff]  ;;  %v694_v15 = vld [vmem:[%s7499_s3 + $0x468] sm:$0xff]  ;;  %v5727_v17 = vpack.c.bf16 %v583_v2, %v577_v1 }
  0x36   :  { %3365 = vmatpush1.bf16.msra.mxu1 %v5498_v39  ;;  %3271 = vmatprep.subr.bf16.mxu0 %v3270_v40  ;;  %v670_v40 = vld [vmem:[%s7499_s3 + $0x3a8] sm:$0xff]  ;;  %7807 = vst [vmem:[#allocation29_spill] sm:$0xff] %v5708_v6  ;;  %v596_v12 = vld [vmem:[%s7499_s3 + $0x158] sm:$0xff]  ;;  %v589_v21 = vld [vmem:[%s7499_s3 + $0x120] sm:$0xff] }
  0x37   :  { %3367 = vmatprep.subr.bf16.mxu1 %v5510_v45  ;;  %366 = vmatmul.mubr.f32.gmra.mrb[8].mxu1 %v5495_v37  ;;  %v5668_v51 = vpack.c.bf16 %v670_v40, %v664_v38  ;;  %v688_v14 = vld [vmem:[%s7499_s3 + $0x438] sm:$0xff]  ;;  %7808 = vst [vmem:[#allocation30_spill] sm:$0xff] %v5727_v17  ;;  %v687_v22 = vld [vmem:[%s7499_s3 + $0x430] sm:$0xff]  ;;  %v693_v29 = vld [vmem:[%s7499_s3 + $0x460] sm:$0xff] }
  0x38   :  { %259 = vmatmul.mubr.f32.gmra.mrb[10].mxu0 %v5534_v53  ;;  %371 = vmatprep.mubr.f32.mxu1 %v7513_v3  ;;  %v602_v30 = vld [vmem:[%s7499_s3 + $0x188] sm:$0xff]  ;;  %v608_v32 = vld [vmem:[%s7499_s3 + $0x1b8] sm:$0xff]  ;;  %v5770_v38 = vpack.c.bf16 %v693_v29, %v687_v22  ;;  %v601_v46 = vld [vmem:[%s7499_s3 + $0x180] sm:$0xff] }
  0x39   :  { %3273 = vmatpush1.bf16.msra.mxu0 %v3272_v54  ;;  %264 = vmatprep.mubr.f32.mxu0 %v7513_v3  ;;  %7803 = vst [vmem:[#allocation25_spill] sm:$0xff] %v5668_v51  ;;  %v578_v54 = vld [vmem:[%s7499_s3 + $0xc8] sm:$0xff]  ;;  %v700_v34 = vld [vmem:[%s7499_s3 + $0x498] sm:$0xff]  ;;  %v5772_v40 = vpack.c.bf16 %v608_v32, %v602_v30  ;;  %v699_v47 = vld [vmem:[%s7499_s3 + $0x490] sm:$0xff] }
  0x3a   :  { %3369 = vmatpush1.bf16.msra.mxu1 %v5537_v56  ;;  %3275 = vmatprep.subr.bf16.mxu0 %v3274_v57  ;;  %v584_v57 = vld [vmem:[%s7499_s3 + $0xf8] sm:$0xff]  ;;  %v706_v35 = vld [vmem:[%s7499_s3 + $0x4c8] sm:$0xff]  ;;  %7813 = vst [vmem:[#allocation35_spill] sm:$0xff] %v5770_v38 }
  0x3b   :  { %3371 = vmatprep.subr.bf16.mxu1 %v5549_v62  ;;  %372 = vmatmul.mubr.f32.gmra.mrb[10].mxu1 %v5534_v53  ;;  %v5696_v0 = vpack.c.bf16 %v584_v57, %v578_v54  ;;  %7814 = vst [vmem:[#allocation36_spill] sm:$0xff] %v5772_v40  ;;  %v614_v54 = vld [vmem:[%s7499_s3 + $0x1e8] sm:$0xff]  ;;  %v620_v57 = vld [vmem:[%s7499_s3 + $0x218] sm:$0xff] }
  0x3c   :  { %265 = vmatmul.mubr.f32.gmra.mrb[12].mxu0 %v5573_v7  ;;  %377 = vmatprep.mubr.f32.mxu1 %v7513_v3  ;;  %v712_v58 = vld [vmem:[%s7499_s3 + $0x4f8] sm:$0xff]  ;;  %v718_v59 = vld [vmem:[%s7499_s3 + $0x528] sm:$0xff] }
  0x3d   :  { %3277 = vmatpush1.bf16.msra.mxu0 %v3276_v8  ;;  %270 = vmatprep.mubr.f32.mxu0 %v7513_v3  ;;  %7806 = vst [vmem:[#allocation28_spill] sm:$0xff] %v5696_v0  ;;  %v681_v8 = vld [vmem:[%s7499_s3 + $0x400] sm:$0xff]  ;;  %v730_v22 = vld [vmem:[%s7499_s3 + $0x588] sm:$0xff] }
  0x3e   :  { %3373 = vmatpush1.bf16.msra.mxu1 %v5576_v9  ;;  %3279 = vmatprep.subr.bf16.mxu0 %v3278_v10  ;;  %v590_v10 = vld [vmem:[%s7499_s3 + $0x128] sm:$0xff]  ;;  %v5732_v19 = vpack.c.bf16 %v681_v8, %v675_v4  ;;  %v5810_v4 = vpack.c.bf16 %v620_v57, %v614_v54  ;;  %v613_v8 = vld [vmem:[%s7499_s3 + $0x1e0] sm:$0xff]  ;;  %v736_v54 = vld [vmem:[%s7499_s3 + $0x5b8] sm:$0xff] }
  0x3f   :  { %3375 = vmatprep.subr.bf16.mxu1 %v5588_v16  ;;  %378 = vmatmul.mubr.f32.gmra.mrb[12].mxu1 %v5573_v7  ;;  %v5734_v20 = vpack.c.bf16 %v596_v12, %v590_v10  ;;  %v711_v10 = vld [vmem:[%s7499_s3 + $0x4f0] sm:$0xff]  ;;  %v5822_v12 = vpack.c.bf16 %v718_v59, %v712_v58  ;;  %v742_v57 = vld [vmem:[%s7499_s3 + $0x5e8] sm:$0xff] }
  0x40   :  { %271 = vmatmul.mubr.f32.gmra.mrb[14].mxu0 %v5612_v23  ;;  %383 = vmatprep.mubr.f32.mxu1 %v7513_v3  ;;  %7809 = vst [vmem:[#allocation31_spill] sm:$0xff] %v5732_v19  ;;  %7818 = vst [vmem:[#allocation40_spill] sm:$0xff] %v5810_v4 }
  0x41   :  { %3281 = vmatpush1.bf16.msra.mxu0 %v3280_v25  ;;  %454 = vmatprep.mubr.f32.mxu0 %v7513_v3  ;;  %7810 = vst [vmem:[#allocation32_spill] sm:$0xff] %v5734_v20  ;;  %v5746_v25 = vpack.c.bf16 %v694_v15, %v688_v14  ;;  %7819 = vst [vmem:[#allocation41_spill] sm:$0xff] %v5822_v12  ;;  %v717_v14 = vld [vmem:[%s7499_s3 + $0x520] sm:$0xff]  ;;  %v626_v15 = vld [vmem:[%s7499_s3 + $0x248] sm:$0xff] }
  0x42   :  { %3377 = vmatpush1.bf16.msra.mxu1 %v5615_v27  ;;  %3283 = vmatprep.subr.bf16.mxu0 %v5617_v28  ;;  %v5846_v30 = vpack.c.bf16 %v717_v14, %v711_v10  ;;  %v735_v10 = vld [vmem:[%s7499_s3 + $0x5b0] sm:$0xff]  ;;  %v5898_v14 = vpack.c.bf16 %v742_v57, %v736_v54 }
  0x43   :  { %3379 = vmatprep.subr.bf16.mxu1 %v5629_v33  ;;  %384 = vmatmul.mubr.f32.gmra.mrb[14].mxu1 %v5612_v23  ;;  %7811 = vst [vmem:[#allocation33_spill] sm:$0xff] %v5746_v25  ;;  %v563_v57 = vld [vmem:[%s7499_s3 + $0x50] sm:$0xff] }
  0x44   :  { %455 = vmatmul.mubr.f32.vlgmr.msra.gmra.mrb[16].mxu0 %v5342_v48  ;;  %914 = vmatprep.mubr.f32.mxu1 %v7513_v3  ;;  %v5694_v48 = vpack.c.bf16 %v669_v52, %v663_v49  ;;  %v5784_v49 = vpack.c.bf16 %v706_v35, %v700_v34  ;;  %v705_v52 = vld [vmem:[%s7499_s3 + $0x4c0] sm:$0xff]  ;;  %7821 = vst [vmem:[#allocation43_spill] sm:$0xff] %v5846_v30  ;;  %v723_v35 = vld [vmem:[%s7499_s3 + $0x550] sm:$0xff]  ;;  %7827 = vst [vmem:[#allocation49_spill] sm:$0xff] %v5898_v14 }
  0x45   :  { %3285 = vmatpush1.bf16.msra.mxu0 %v5650_v42  ;;  %460 = vmatprep.mubr.f32.mxu0 %v7513_v3  ;;  %v5808_v2 = vpack.c.bf16 %v705_v52, %v699_v47  ;;  %v625_v34 = vld [vmem:[%s7499_s3 + $0x240] sm:$0xff]  ;;  %v638_v47 = vld [vmem:[%s7499_s3 + $0x2a8] sm:$0xff]  ;;  %v644_v52 = vld [vmem:[%s7499_s3 + $0x2d8] sm:$0xff] }
  0x46   :  { %3381 = vmatpush1.bf16.msra.mxu1 %v5654_v43  ;;  %3287 = vmatprep.subr.bf16.mxu0 %v5656_v44  ;;  %7805 = vst [vmem:[#allocation27_spill] sm:$0xff] %v5694_v48  ;;  %7815 = vst [vmem:[#allocation37_spill] sm:$0xff] %v5784_v49 }
  0x47   :  { %3383 = vmatprep.subr.bf16.mxu1 %v5668_v51  ;;  %7817 = vst [vmem:[#allocation39_spill] sm:$0xff] %v5808_v2  ;;  %v739_v51 = vld [vmem:[%s7499_s3 + $0x5d0] sm:$0xff] }
  0x48   :  { %461 = vmatmul.mubr.f32.gmra.mrb[18].mxu0 %v5378_v61  ;;  %v595_v61 = vld [vmem:[%s7499_s3 + $0x150] sm:$0xff] }
  0x49   :  { %3289 = vmatpush1.bf16.msra.mxu0 %v5689_v60  ;;  %466 = vmatprep.mubr.f32.mxu0 %v7513_v3  ;;  %v5765_v36 = vpack.c.bf16 %v595_v61, %v589_v21  ;;  %v632_v21 = vld [vmem:[%s7499_s3 + $0x278] sm:$0xff] }
  0x4a   :  { %3385 = vmatpush1.bf16.msra.mxu1 %v5694_v48  ;;  %3291 = vmatprep.subr.bf16.mxu0 %v5696_v0  ;;  %v724_v61 = vld [vmem:[%s7499_s3 + $0x558] sm:$0xff]  ;;  %v5848_v32 = vpack.c.bf16 %v632_v21, %v626_v15  ;;  %v741_v15 = vld [vmem:[%s7499_s3 + $0x5e0] sm:$0xff]  ;;  %v650_v21 = vld [vmem:[%s7499_s3 + $0x308] sm:$0xff] }
  0x4b   :  { %3387 = vmatprep.subr.bf16.mxu1 %v5708_v6  ;;  %7812 = vst [vmem:[#allocation34_spill] sm:$0xff] %v5765_v36  ;;  %v727_v6 = vld [vmem:[%s7499_s3 + $0x570] sm:$0xff]  ;;  %v733_v48 = vld [vmem:[%s7499_s3 + $0x5a0] sm:$0xff] }
  0x4c   :  { %467 = vmatmul.mubr.f32.gmra.mrb[20].mxu0 %v5417_v11  ;;  %v607_v11 = vld [vmem:[%s7499_s3 + $0x1b0] sm:$0xff]  ;;  %7822 = vst [vmem:[#allocation44_spill] sm:$0xff] %v5848_v32 }
  0x4d   :  { %3293 = vmatpush1.bf16.msra.mxu0 %v5727_v17  ;;  %472 = vmatprep.mubr.f32.mxu0 %v7513_v3  ;;  %v5803_v1 = vpack.c.bf16 %v607_v11, %v601_v46  ;;  %v5860_v46 = vpack.c.bf16 %v730_v22, %v724_v61  ;;  %v729_v11 = vld [vmem:[%s7499_s3 + $0x580] sm:$0xff]  ;;  %v656_v61 = vld [vmem:[%s7499_s3 + $0x338] sm:$0xff]  ;;  %v558_v22 = vld [vmem:[%s7499_s3 + $0x28] sm:$0xff] }
  0x4e   :  { %3389 = vmatpush1.bf16.msra.mxu1 %v5732_v19  ;;  %3295 = vmatprep.subr.bf16.mxu0 %v5734_v20  ;;  %v5884_v59 = vpack.c.bf16 %v729_v11, %v723_v35  ;;  %v5922_v35 = vpack.c.bf16 %v741_v15, %v735_v10  ;;  %v5924_v11 = vpack.c.bf16 %v656_v61, %v650_v21  ;;  %v570_v10 = vld [vmem:[%s7499_s3 + $0x88] sm:$0xff]  ;;  %v576_v15 = vld [vmem:[%s7499_s3 + $0xb8] sm:$0xff]  ;;  %v721_v19 = vld [vmem:[%s7499_s3 + $0x540] sm:$0xff] }
  0x4f   :  { %3391 = vmatprep.subr.bf16.mxu1 %v5746_v25  ;;  %7816 = vst [vmem:[#allocation38_spill] sm:$0xff] %v5803_v1  ;;  %7823 = vst [vmem:[#allocation45_spill] sm:$0xff] %v5860_v46  ;;  %v715_v25 = vld [vmem:[%s7499_s3 + $0x510] sm:$0xff] }
  0x50   :  { %473 = vmatmul.mubr.f32.gmra.mrb[22].mxu0 %v5456_v24  ;;  %v619_v24 = vld [vmem:[%s7499_s3 + $0x210] sm:$0xff]  ;;  %7825 = vst [vmem:[#allocation47_spill] sm:$0xff] %v5884_v59  ;;  %7829 = vst [vmem:[#allocation51_spill] sm:$0xff] %v5922_v35 }
  0x51   :  { %3297 = vmatpush1.bf16.msra.mxu0 %v5765_v36  ;;  %478 = vmatprep.mubr.f32.mxu0 %v7513_v3  ;;  %v5841_v29 = vpack.c.bf16 %v619_v24, %v613_v8  ;;  %v5886_v8 = vpack.c.bf16 %v644_v52, %v638_v47  ;;  %v637_v24 = vld [vmem:[%s7499_s3 + $0x2a0] sm:$0xff]  ;;  %7830 = vst [vmem:[#allocation52_spill] sm:$0xff] %v5924_v11 }
  0x52   :  { %3393 = vmatpush1.bf16.msra.mxu1 %v5770_v38  ;;  %3299 = vmatprep.subr.bf16.mxu0 %v5772_v40  ;;  %v649_v47 = vld [vmem:[%s7499_s3 + $0x300] sm:$0xff] }
  0x53   :  { %3395 = vmatprep.subr.bf16.mxu1 %v5784_v49  ;;  %7820 = vst [vmem:[#allocation42_spill] sm:$0xff] %v5841_v29  ;;  %7826 = vst [vmem:[#allocation48_spill] sm:$0xff] %v5886_v8  ;;  %v557_v52 = vld [vmem:[%s7499_s3 + $0x20] sm:$0xff]  ;;  %v703_v49 = vld [vmem:[%s7499_s3 + $0x4b0] sm:$0xff] }
  0x54   :  { %479 = vmatmul.mubr.f32.gmra.mrb[24].mxu0 %v5495_v37  ;;  %v631_v37 = vld [vmem:[%s7499_s3 + $0x270] sm:$0xff]  ;;  %v5960_v61 = vpack.c.bf16 %v563_v57, %v557_v52  ;;  %v674_v57 = vld [vmem:[%s7499_s3 + $0x3c8] sm:$0xff]  ;;  %v709_v38 = vld [vmem:[%s7499_s3 + $0x4e0] sm:$0xff] }
  0x55   :  { %3301 = vmatpush1.bf16.msra.mxu0 %v5803_v1  ;;  %484 = vmatprep.mubr.f32.mxu0 %v7513_v3  ;;  %v5879_v58 = vpack.c.bf16 %v631_v37, %v625_v34  ;;  %v564_v34 = vld [vmem:[%s7499_s3 + $0x58] sm:$0xff]  ;;  %v575_v52 = vld [vmem:[%s7499_s3 + $0xb0] sm:$0xff] }
  0x56   :  { %3397 = vmatpush1.bf16.msra.mxu1 %v5808_v2  ;;  %3303 = vmatprep.subr.bf16.mxu0 %v5810_v4  ;;  %v5936_v54 = vpack.c.bf16 %v564_v34, %v558_v22  ;;  %7833 = vst [vmem:[#allocation55_spill] sm:$0xff] %v5960_v61  ;;  %v661_v34 = vld [vmem:[%s7499_s3 + $0x360] sm:$0xff] }
  0x57   :  { %3399 = vmatprep.subr.bf16.mxu1 %v5822_v12  ;;  %7824 = vst [vmem:[#allocation46_spill] sm:$0xff] %v5879_v58  ;;  %v691_v12 = vld [vmem:[%s7499_s3 + $0x450] sm:$0xff]  ;;  %v697_v2 = vld [vmem:[%s7499_s3 + $0x480] sm:$0xff] }
  0x58   :  { %485 = vmatmul.mubr.f32.gmra.mrb[26].mxu0 %v5534_v53  ;;  %v643_v53 = vld [vmem:[%s7499_s3 + $0x2d0] sm:$0xff]  ;;  %7831 = vst [vmem:[#allocation53_spill] sm:$0xff] %v5936_v54 }
  0x59   :  { %3305 = vmatpush1.bf16.msra.mxu0 %v5841_v29  ;;  %490 = vmatprep.mubr.f32.mxu0 %v7513_v3  ;;  %v5917_v37 = vpack.c.bf16 %v643_v53, %v637_v24  ;;  %v662_v24 = vld [vmem:[%s7499_s3 + $0x368] sm:$0xff]  ;;  %v668_v53 = vld [vmem:[%s7499_s3 + $0x398] sm:$0xff] }
  0x5a   :  { %3401 = vmatpush1.bf16.msra.mxu1 %v5846_v30  ;;  %3307 = vmatprep.subr.bf16.mxu0 %v5848_v32  ;;  %v5962_v22 = vpack.c.bf16 %v668_v53, %v662_v24  ;;  %v680_v24 = vld [vmem:[%s7499_s3 + $0x3f8] sm:$0xff]  ;;  %v582_v53 = vld [vmem:[%s7499_s3 + $0xe8] sm:$0xff]  ;;  %v685_v30 = vld [vmem:[%s7499_s3 + $0x420] sm:$0xff] }
  0x5b   :  { %3403 = vmatprep.subr.bf16.mxu1 %v5860_v46  ;;  %7828 = vst [vmem:[#allocation50_spill] sm:$0xff] %v5917_v37 }
  0x5c   :  { %491 = vmatmul.mubr.f32.gmra.mrb[28].mxu0 %v5573_v7  ;;  %v655_v7 = vld [vmem:[%s7499_s3 + $0x330] sm:$0xff]  ;;  %7834 = vst [vmem:[#allocation56_spill] sm:$0xff] %v5962_v22 }
  0x5d   :  { %3309 = vmatpush1.bf16.msra.mxu0 %v5879_v58  ;;  %496 = vmatprep.mubr.f32.mxu0 %v7513_v3  ;;  %v5955_v21 = vpack.c.bf16 %v655_v7, %v649_v47  ;;  %v569_v47 = vld [vmem:[%s7499_s3 + $0x80] sm:$0xff]  ;;  %v5974_v7 = vpack.c.bf16 %v576_v15, %v570_v10  ;;  %v588_v10 = vld [vmem:[%s7499_s3 + $0x118] sm:$0xff] }
  0x5e   :  { %3405 = vmatpush1.bf16.msra.mxu1 %v5884_v59  ;;  %3311 = vmatprep.subr.bf16.mxu0 %v5886_v8  ;;  %v673_v59 = vld [vmem:[%s7499_s3 + $0x3c0] sm:$0xff] }
  0x5f   :  { %3407 = vmatprep.subr.bf16.mxu1 %v5898_v14  ;;  %7832 = vst [vmem:[#allocation54_spill] sm:$0xff] %v5955_v21  ;;  %7835 = vst [vmem:[#allocation57_spill] sm:$0xff] %v5974_v7  ;;  %v5999_v14 = vpack.c.bf16 %v680_v24, %v674_v57  ;;  %v692_v57 = vld [vmem:[%s7499_s3 + $0x458] sm:$0xff]  ;;  %v7840_v24 = vmov 0.0  }
  0x60   :  { %497 = vmatmul.mubr.f32.gmra.mrb[30].mxu0 %v5612_v23  ;;  %v667_v23 = vld [vmem:[%s7499_s3 + $0x390] sm:$0xff] }
  0x61   :  { %3313 = vmatpush1.bf16.msra.mxu0 %v5917_v37  ;;  %843 = vmatprep.mubr.f32.mxu0 %v7513_v3  ;;  %v5993_v15 = vpack.c.bf16 %v667_v23, %v661_v34  ;;  %7838 = vst [vmem:[#allocation60_spill] sm:$0xff] %v5999_v14  ;;  %v581_v34 = vld [vmem:[%s7499_s3 + $0xe0] sm:$0xff]  ;;  %v6011_v23 = vpack.c.bf16 %v588_v10, %v582_v53  ;;  %v600_v53 = vld [vmem:[%s7499_s3 + $0x178] sm:$0xff] }
  0x62   :  { %3409 = vmatpush1.bf16.msra.mxu1 %v5922_v35  ;;  %3315 = vmatprep.subr.bf16.mxu0 %v5924_v11  ;;  %v5997_v35 = vpack.c.bf16 %v575_v52, %v569_v47  ;;  %v587_v47 = vld [vmem:[%s7499_s3 + $0x110] sm:$0xff]  ;;  %v686_v52 = vld [vmem:[%s7499_s3 + $0x428] sm:$0xff] }
  0x63   :  { %3411 = vmatprep.subr.bf16.mxu1 %v5936_v54  ;;  %7836 = vst [vmem:[#allocation58_spill] sm:$0xff] %v5993_v15  ;;  %7839 = vst [vmem:[#allocation61_spill] sm:$0xff] %v6011_v23  ;;  %v6036_v46 = vpack.c.bf16 %v692_v57, %v686_v52  ;;  %v704_v52 = vld [vmem:[%s7499_s3 + $0x4b8] sm:$0xff]  ;;  %v606_v57 = vld [vmem:[%s7499_s3 + $0x1a8] sm:$0xff] }
  0x64   :  { %7837 = vst [vmem:[#allocation59_spill] sm:$0xff] %v5997_v35 }
  0x65   :  { %915 = vmatmul.mubr.f32.vlgmr.msra.gmra.mrb[16].mxu1 %v7513_v3  ;;  %3317 = vmatpush1.bf16.msra.mxu0 %v5955_v21  ;;  %v679_v3 = vld [vmem:[%s7499_s3 + $0x3f0] sm:$0xff]  ;;  %7843 = vst [vmem:[#allocation64_spill] sm:$0xff] %v6036_v46 }
  0x66   :  { %3413 = vmatpush1.bf16.msra.mxu1 %v5960_v61  ;;  %3319 = vmatprep.subr.bf16.mxu0 %v5962_v22  ;;  %v6030_v10 = vpack.c.bf16 %v679_v3, %v673_v59  ;;  %v6034_v61 = vpack.c.bf16 %v587_v47, %v581_v34  ;;  %v593_v3 = vld [vmem:[%s7499_s3 + $0x140] sm:$0xff]  ;;  %v599_v34 = vld [vmem:[%s7499_s3 + $0x170] sm:$0xff]  ;;  %v698_v47 = vld [vmem:[%s7499_s3 + $0x488] sm:$0xff] }
  0x67   :  { %3415 = vmatprep.subr.bf16.mxu1 %v5974_v7  ;;  %985 = vmatprep.mubr.f32.mxu1 %v7840_v24  ;;  %v594_v7 = vld [vmem:[%s7499_s3 + $0x148] sm:$0xff] }
  0x68   :  { %7841 = vst [vmem:[#allocation62_spill] sm:$0xff] %v6030_v10  ;;  %7842 = vst [vmem:[#allocation63_spill] sm:$0xff] %v6034_v61  ;;  %v6048_v59 = vpack.c.bf16 %v600_v53, %v594_v7  ;;  %v612_v7 = vld [vmem:[%s7499_s3 + $0x1d8] sm:$0xff]  ;;  %v6066_v53 = vpack.c.bf16 %v691_v12, %v685_v30  ;;  %v605_v12 = vld [vmem:[%s7499_s3 + $0x1a0] sm:$0xff] }
  0x69   :  { %3321 = vmatpush1.bf16.msra.mxu0 %v5993_v15  ;;  %v6084_v30 = vpack.c.bf16 %v612_v7, %v606_v57  ;;  %v624_v57 = vld [vmem:[%s7499_s3 + $0x238] sm:$0xff]  ;;  %v6102_v7 = vpack.c.bf16 %v703_v49, %v697_v2  ;;  %v617_v49 = vld [vmem:[%s7499_s3 + $0x200] sm:$0xff] }
  0x6a   :  { %3417 = vmatpush1.bf16.msra.mxu1 %v5997_v35  ;;  %3323 = vmatprep.subr.bf16.mxu0 %v5999_v14  ;;  %7844 = vst [vmem:[#allocation65_spill] sm:$0xff] %v6048_v59  ;;  %7845 = vst [vmem:[#allocation66_spill] sm:$0xff] %v6066_v53  ;;  %v6072_v35 = vpack.c.bf16 %v704_v52, %v698_v47  ;;  %v716_v47 = vld [vmem:[%s7499_s3 + $0x518] sm:$0xff]  ;;  %v618_v52 = vld [vmem:[%s7499_s3 + $0x208] sm:$0xff] }
  0x6b   :  { %3419 = vmatprep.subr.bf16.mxu1 %v6011_v23  ;;  %v6070_v23 = vpack.c.bf16 %v599_v34, %v593_v3  ;;  %7848 = vst [vmem:[#allocation69_spill] sm:$0xff] %v6084_v30  ;;  %v611_v3 = vld [vmem:[%s7499_s3 + $0x1d0] sm:$0xff]  ;;  %v710_v34 = vld [vmem:[%s7499_s3 + $0x4e8] sm:$0xff]  ;;  %7849 = vst [vmem:[#allocation70_spill] sm:$0xff] %v6102_v7  ;;  %v6120_v2 = vpack.c.bf16 %v624_v57, %v618_v52  ;;  %v6138_v57 = vpack.c.bf16 %v715_v25, %v709_v38 }
  0x6c   :  { %7847 = vst [vmem:[#allocation68_spill] sm:$0xff] %v6072_v35  ;;  %v636_v52 = vld [vmem:[%s7499_s3 + $0x298] sm:$0xff]  ;;  %v629_v25 = vld [vmem:[%s7499_s3 + $0x260] sm:$0xff] }
  0x6d   :  { %3325 = vmatpush1.bf16.msra.mxu0 %v6030_v10  ;;  %7846 = vst [vmem:[#allocation67_spill] sm:$0xff] %v6070_v23  ;;  %7852 = vst [vmem:[#allocation73_spill] sm:$0xff] %v6120_v2 }
  0x6e   :  { %3421 = vmatpush1.bf16.msra.mxu1 %v6034_v61  ;;  %3327 = vmatprep.subr.bf16.mxu0 %v6036_v46  ;;  %v6108_v61 = vpack.c.bf16 %v716_v47, %v710_v34  ;;  %v728_v34 = vld [vmem:[%s7499_s3 + $0x578] sm:$0xff]  ;;  %v630_v47 = vld [vmem:[%s7499_s3 + $0x268] sm:$0xff]  ;;  %7853 = vst [vmem:[#allocation74_spill] sm:$0xff] %v6138_v57 }
  0x6f   :  { %3423 = vmatprep.subr.bf16.mxu1 %v6048_v59  ;;  %v6106_v59 = vpack.c.bf16 %v611_v3, %v605_v12  ;;  %v623_v12 = vld [vmem:[%s7499_s3 + $0x230] sm:$0xff]  ;;  %v722_v3 = vld [vmem:[%s7499_s3 + $0x548] sm:$0xff]  ;;  %v6156_v38 = vpack.c.bf16 %v636_v52, %v630_v47  ;;  %v648_v47 = vld [vmem:[%s7499_s3 + $0x2f8] sm:$0xff]  ;;  %v6174_v52 = vpack.c.bf16 %v727_v6, %v721_v19 }
  0x70   :  { %7851 = vst [vmem:[#allocation72_spill] sm:$0xff] %v6108_v61  ;;  %v641_v19 = vld [vmem:[%s7499_s3 + $0x2c0] sm:$0xff] }
  0x71   :  { %3329 = vmatpush1.bf16.msra.mxu0 %v6066_v53  ;;  %7850 = vst [vmem:[#allocation71_spill] sm:$0xff] %v6106_v59  ;;  %7856 = vst [vmem:[#allocation77_spill] sm:$0xff] %v6156_v38 }
  0x72   :  { %3425 = vmatpush1.bf16.msra.mxu1 %v6070_v23  ;;  %3331 = vmatprep.subr.bf16.mxu0 %v6072_v35  ;;  %v6144_v23 = vpack.c.bf16 %v728_v34, %v722_v3  ;;  %v740_v3 = vld [vmem:[%s7499_s3 + $0x5d8] sm:$0xff]  ;;  %v642_v34 = vld [vmem:[%s7499_s3 + $0x2c8] sm:$0xff]  ;;  %7857 = vst [vmem:[#allocation78_spill] sm:$0xff] %v6174_v52 }
  0x73   :  { %3427 = vmatprep.subr.bf16.mxu1 %v6084_v30  ;;  %v6142_v30 = vpack.c.bf16 %v623_v12, %v617_v49  ;;  %v635_v49 = vld [vmem:[%s7499_s3 + $0x290] sm:$0xff]  ;;  %v734_v12 = vld [vmem:[%s7499_s3 + $0x5a8] sm:$0xff]  ;;  %v6189_v6 = vpack.c.bf16 %v648_v47, %v642_v34 }
  0x74   :  { %7855 = vst [vmem:[#allocation76_spill] sm:$0xff] %v6144_v23 }
  0x75   :  { %3333 = vmatpush1.bf16.msra.mxu0 %v6102_v7  ;;  %7854 = vst [vmem:[#allocation75_spill] sm:$0xff] %v6142_v30 }
  0x76   :  { %3429 = vmatpush1.bf16.msra.mxu1 %v6106_v59  ;;  %3335 = vmatprep.subr.bf16.mxu0 %v6108_v61  ;;  %v6180_v59 = vpack.c.bf16 %v740_v3, %v734_v12  ;;  %v660_v12 = vld [vmem:[%s7499_s3 + $0x358] sm:$0xff]  ;;  %v6204_v3 = vpack.c.bf16 %v739_v51, %v733_v48  ;;  %v666_v51 = vld [vmem:[%s7499_s3 + $0x388] sm:$0xff] }
  0x77   :  { %3431 = vmatprep.subr.bf16.mxu1 %v6120_v2  ;;  %v6178_v2 = vpack.c.bf16 %v635_v49, %v629_v25  ;;  %v647_v25 = vld [vmem:[%s7499_s3 + $0x2f0] sm:$0xff]  ;;  %v654_v49 = vld [vmem:[%s7499_s3 + $0x328] sm:$0xff]  ;;  %v672_v48 = vld [vmem:[%s7499_s3 + $0x3b8] sm:$0xff] }
  0x78   :  { %7858 = vst [vmem:[#allocation79_spill] sm:$0xff] %v6180_v59  ;;  %7859 = vst [vmem:[#allocation80_spill] sm:$0xff] %v6204_v3  ;;  %v6208_v34 = vpack.c.bf16 %v647_v25, %v641_v19  ;;  %v6211_v47 = vpack.c.bf16 %v660_v12, %v654_v49  ;;  %v6231_v25 = vpack.c.bf16 %v672_v48, %v666_v51  ;;  %v665_v49 = vld [vmem:[%s7499_s3 + $0x380] sm:$0xff]  ;;  %v671_v12 = vld [vmem:[%s7499_s3 + $0x3b0] sm:$0xff] }
  0x79   :  { %3337 = vmatpush1.bf16.msra.mxu0 %v6138_v57  ;;  %v6248_v51 = vpack.c.bf16 %v671_v12, %v665_v49  ;;  %v696_v49 = vld [vmem:[%s7499_s3 + $0x478] sm:$0xff] }
  0x7a   :  { %3433 = vmatpush1.bf16.msra.mxu1 %v6142_v30  ;;  %3339 = vmatprep.subr.bf16.mxu0 %v6144_v23  ;;  %7860 = vst [vmem:[#allocation81_spill] sm:$0xff] %v6211_v47  ;;  %v659_v30 = vld [vmem:[%s7499_s3 + $0x350] sm:$0xff] }
  0x7b   :  { %3435 = vmatprep.subr.bf16.mxu1 %v6156_v38  ;;  %v653_v38 = vld [vmem:[%s7499_s3 + $0x320] sm:$0xff] }
  0x7c   :  { %v6227_v19 = vpack.c.bf16 %v659_v30, %v653_v38  ;;  %v678_v30 = vld [vmem:[%s7499_s3 + $0x3e8] sm:$0xff]  ;;  %v684_v38 = vld [vmem:[%s7499_s3 + $0x418] sm:$0xff] }
  0x7d   :  { %3341 = vmatpush1.bf16.msra.mxu0 %v6174_v52  ;;  %v6252_v48 = vpack.c.bf16 %v684_v38, %v678_v30  ;;  %v689_v38 = vld [vmem:[%s7499_s3 + $0x440] sm:$0xff] }
  0x7e   :  { %3437 = vmatpush1.bf16.msra.mxu1 %v6178_v2  ;;  %3343 = vmatprep.subr.bf16.mxu0 %v6180_v59 }
  0x7f   :  { %3439 = vmatprep.subr.bf16.mxu1 %v6189_v6 }
  0x81   :  { %3345 = vmatpush1.bf16.msra.mxu0 %v6204_v3 }
  0x82   :  { %3441 = vmatpush1.bf16.msra.mxu1 %v6208_v34  ;;  %3475 = vmatprep.subr.bf16.mxu0 %v5617_v28  ;;  %v677_v28 = vld [vmem:[%s7499_s3 + $0x3e0] sm:$0xff] }
  0x83   :  { %3443 = vmatprep.subr.bf16.mxu1 %v6211_v47  ;;  %v683_v47 = vld [vmem:[%s7499_s3 + $0x410] sm:$0xff] }
  0x84   :  { %844 = vmatmul.mubr.f32.vlgmr.msra.gmra.mrb[0].mxu0 %v7840_v24  ;;  %v6268_v12 = vpack.c.bf16 %v683_v47, %v677_v28  ;;  %v708_v28 = vld [vmem:[%s7499_s3 + $0x4d8] sm:$0xff] }
  0x85   :  { %3477 = vmatpush1.bf16.msra.mxu0 %v5650_v42  ;;  %v690_v42 = vld [vmem:[%s7499_s3 + $0x448] sm:$0xff] }
  0x86   :  { %3445 = vmatpush1.bf16.msra.mxu1 %v6227_v19  ;;  %3479 = vmatprep.subr.bf16.mxu0 %v5656_v44  ;;  %7861 = vst [vmem:[#allocation82_spill] sm:$0xff] %v6268_v12  ;;  %v6272_v30 = vpack.c.bf16 %v696_v49, %v690_v42  ;;  %v695_v44 = vld [vmem:[%s7499_s3 + $0x470] sm:$0xff]  ;;  %v701_v49 = vld [vmem:[%s7499_s3 + $0x4a0] sm:$0xff] }
  0x87   :  { %3447 = vmatprep.subr.bf16.mxu1 %v6231_v25  ;;  %v6288_v42 = vpack.c.bf16 %v695_v44, %v689_v38  ;;  %v720_v44 = vld [vmem:[%s7499_s3 + $0x538] sm:$0xff] }
  0x88   :  { %7862 = vst [vmem:[#allocation83_spill] sm:$0xff] %v6272_v30 }
  0x89   :  { %3481 = vmatpush1.bf16.msra.mxu0 %v5689_v60  ;;  %v702_v60 = vld [vmem:[%s7499_s3 + $0x4a8] sm:$0xff]  ;;  %7863 = vst [vmem:[#allocation84_spill] sm:$0xff] %v6288_v42 }
  0x8a   :  { %3449 = vmatpush1.bf16.msra.mxu1 %v6248_v51  ;;  %3483 = vmatprep.subr.bf16.mxu0 %v5696_v0  ;;  %v6292_v47 = vpack.c.bf16 %v708_v28, %v702_v60  ;;  %v707_v0 = vld [vmem:[%s7499_s3 + $0x4d0] sm:$0xff]  ;;  %v713_v28 = vld [vmem:[%s7499_s3 + $0x500] sm:$0xff] }
  0x8b   :  { %3451 = vmatprep.subr.bf16.mxu1 %v6252_v48  ;;  %v6308_v60 = vpack.c.bf16 %v707_v0, %v701_v49  ;;  %v732_v0 = vld [vmem:[%s7499_s3 + $0x598] sm:$0xff] }
  0x8c   :  { %7864 = vst [vmem:[#allocation85_spill] sm:$0xff] %v6292_v47 }
  0x8d   :  { %3485 = vmatpush1.bf16.msra.mxu0 %v5727_v17  ;;  %v714_v17 = vld [vmem:[%s7499_s3 + $0x508] sm:$0xff]  ;;  %7865 = vst [vmem:[#allocation86_spill] sm:$0xff] %v6308_v60 }
  0x8e   :  { %3453 = vmatpush1.bf16.msra.mxu1 %v6268_v12  ;;  %3487 = vmatprep.subr.bf16.mxu0 %v5734_v20  ;;  %v6312_v38 = vpack.c.bf16 %v720_v44, %v714_v17  ;;  %v719_v20 = vld [vmem:[%s7499_s3 + $0x530] sm:$0xff]  ;;  %v725_v44 = vld [vmem:[%s7499_s3 + $0x560] sm:$0xff] }
  0x8f   :  { %3455 = vmatprep.subr.bf16.mxu1 %v6272_v30  ;;  %v6328_v17 = vpack.c.bf16 %v719_v20, %v713_v28  ;;  %v744_v20 = vld [vmem:[%s7499_s3 + $0x5f8] sm:$0xff] }
  0x90   :  { %7866 = vst [vmem:[#allocation87_spill] sm:$0xff] %v6312_v38 }
  0x91   :  { %3489 = vmatpush1.bf16.msra.mxu0 %v5765_v36  ;;  %v726_v36 = vld [vmem:[%s7499_s3 + $0x568] sm:$0xff]  ;;  %7867 = vst [vmem:[#allocation88_spill] sm:$0xff] %v6328_v17 }
  0x92   :  { %3457 = vmatpush1.bf16.msra.mxu1 %v6288_v42  ;;  %3491 = vmatprep.subr.bf16.mxu0 %v5772_v40  ;;  %v6332_v49 = vpack.c.bf16 %v732_v0, %v726_v36  ;;  %v731_v40 = vld [vmem:[%s7499_s3 + $0x590] sm:$0xff]  ;;  %v737_v0 = vld [vmem:[%s7499_s3 + $0x5c0] sm:$0xff] }
  0x93   :  { %3459 = vmatprep.subr.bf16.mxu1 %v6292_v47  ;;  %v6348_v36 = vpack.c.bf16 %v731_v40, %v725_v44  ;;  %v7875_v44 = vld [vmem:[#allocation31_spill] sm:$0xff] }
  0x94   :  { %7868 = vst [vmem:[#allocation89_spill] sm:$0xff] %v6332_v49 }
  0x95   :  { %3493 = vmatpush1.bf16.msra.mxu0 %v5803_v1  ;;  %v738_v1 = vld [vmem:[%s7499_s3 + $0x5c8] sm:$0xff]  ;;  %7869 = vst [vmem:[#allocation90_spill] sm:$0xff] %v6348_v36 }
  0x96   :  { %3461 = vmatpush1.bf16.msra.mxu1 %v6308_v60  ;;  %3495 = vmatprep.subr.bf16.mxu0 %v5810_v4  ;;  %v6352_v28 = vpack.c.bf16 %v744_v20, %v738_v1  ;;  %v743_v4 = vld [vmem:[%s7499_s3 + $0x5f0] sm:$0xff]  ;;  %v7872_v1 = vld [vmem:[#allocation25_spill] sm:$0xff] }
  0x97   :  { %3463 = vmatprep.subr.bf16.mxu1 %v6312_v38  ;;  %v6362_v40 = vpack.c.bf16 %v743_v4, %v737_v0  ;;  %v7873_v4 = vld [vmem:[#allocation27_spill] sm:$0xff]  ;;  %v7876_v20 = vld [vmem:[#allocation33_spill] sm:$0xff] }
  0x98   :  { %7870 = vst [vmem:[#allocation91_spill] sm:$0xff] %v6352_v28  ;;  %v7877_v0 = vld [vmem:[#allocation35_spill] sm:$0xff] }
  0x99   :  { %3497 = vmatpush1.bf16.msra.mxu0 %v5841_v29  ;;  %7871 = vst [vmem:[#allocation92_spill] sm:$0xff] %v6362_v40 }
  0x9a   :  { %3465 = vmatpush1.bf16.msra.mxu1 %v6328_v17  ;;  %3499 = vmatprep.subr.bf16.mxu0 %v5848_v32 }
  0x9b   :  { %3467 = vmatprep.subr.bf16.mxu1 %v6332_v49 }
  0x9d   :  { %3501 = vmatpush1.bf16.msra.mxu0 %v5879_v58 }
  0x9e   :  { %3469 = vmatpush1.bf16.msra.mxu1 %v6348_v36  ;;  %3503 = vmatprep.subr.bf16.mxu0 %v5886_v8 }
  0x9f   :  { %3471 = vmatprep.subr.bf16.mxu1 %v6352_v28 }
  0xa1   :  { %3505 = vmatpush1.bf16.msra.mxu0 %v5917_v37 }
  0xa2   :  { %3473 = vmatpush1.bf16.msra.mxu1 %v6362_v40  ;;  %3507 = vmatprep.subr.bf16.mxu0 %v5924_v11 }
  0xa3   :  { %3539 = vmatprep.subr.bf16.mxu1 %v5319_v41 }
  0xa5   :  { %986 = vmatmul.mubr.f32.vlgmr.msra.gmra.mrb[18].mxu1 %v7840_v24  ;;  %3509 = vmatpush1.bf16.msra.mxu0 %v5955_v21  ;;  %v7874_v24 = vld [vmem:[#allocation29_spill] sm:$0xff] }
  0xa6   :  { %3541 = vmatpush1.bf16.msra.mxu1 %v5344_v50  ;;  %3511 = vmatprep.subr.bf16.mxu0 %v5962_v22 }
  0xa7   :  { %3543 = vmatprep.subr.bf16.mxu1 %v5356_v55 }
  0xa9   :  { %3513 = vmatpush1.bf16.msra.mxu0 %v5993_v15 }
  0xaa   :  { %3545 = vmatpush1.bf16.msra.mxu1 %v5382_v63  ;;  %3515 = vmatprep.subr.bf16.mxu0 %v5999_v14  ;;  %v6425_v14 = vld [vmem:[%s7501_s2] sm:$0x3f] }
  0xab   :  { %3547 = vmatprep.subr.bf16.mxu1 %v5394_v5 }
  0xad   :  { %3517 = vmatpush1.bf16.msra.mxu0 %v6030_v10 }
  0xae   :  { %3549 = vmatpush1.bf16.msra.mxu1 %v5420_v13  ;;  %3519 = vmatprep.subr.bf16.mxu0 %v6036_v46 }
  0xaf   :  { %3551 = vmatprep.subr.bf16.mxu1 %v5432_v18 }
  0xb1   :  { %3521 = vmatpush1.bf16.msra.mxu0 %v6066_v53  ;;  %v134_v53 = vlaneseq }
  0xb2   :  { %3553 = vmatpush1.bf16.msra.mxu1 %v5459_v26  ;;  %3523 = vmatprep.subr.bf16.mxu0 %v6072_v35  ;;  %v7885_v35 = vld [vmem:[#allocation51_spill] sm:$0xff] }
  0xb3   :  { %3555 = vmatprep.subr.bf16.mxu1 %v5471_v31  ;;  %v6419_v46 = vshrl.u32 %v134_v53, 7 }
  0xb5   :  { %3525 = vmatpush1.bf16.msra.mxu0 %v6102_v7  ;;  %v7884_v7 = vld [vmem:[#allocation49_spill] sm:$0xff]  ;;  %v7625_v10 = vsub.s32 3, %v6419_v46  ;;  %v7632_v21 = vsub.s32 2, %v6419_v46 }
  0xb6   :  { %3557 = vmatpush1.bf16.msra.mxu1 %v5498_v39  ;;  %3527 = vmatprep.subr.bf16.mxu0 %v6108_v61  ;;  %v7883_v61 = vld [vmem:[#allocation47_spill] sm:$0xff] }
  0xb7   :  { %3559 = vmatprep.subr.bf16.mxu1 %v5510_v45  ;;  %v6430_v15 = vrot.slane %v6425_v14, %v7625_v10  ;;  %v6441_v11 = vrot.slane %v6425_v14, %v7632_v21 }
  0xb9   :  { %3529 = vmatpush1.bf16.msra.mxu0 %v6138_v57  ;;  %v7882_v57 = vld [vmem:[#allocation45_spill] sm:$0xff] }
  0xba   :  { %3561 = vmatpush1.bf16.msra.mxu1 %v5537_v56  ;;  %3531 = vmatprep.subr.bf16.mxu0 %v6144_v23  ;;  %v7881_v23 = vld [vmem:[#allocation43_spill] sm:$0xff] }
  0xbb   :  { %3563 = vmatprep.subr.bf16.mxu1 %v5549_v62 }
  0xbd   :  { %3533 = vmatpush1.bf16.msra.mxu0 %v6174_v52  ;;  %v7880_v52 = vld [vmem:[#allocation41_spill] sm:$0xff] }
  0xbe   :  { %3565 = vmatpush1.bf16.msra.mxu1 %v5576_v9  ;;  %3535 = vmatprep.subr.bf16.mxu0 %v6180_v59  ;;  %v7879_v59 = vld [vmem:[#allocation39_spill] sm:$0xff] }
  0xbf   :  { %3567 = vmatprep.subr.bf16.mxu1 %v5588_v16 }
  0xc1   :  { %3537 = vmatpush1.bf16.msra.mxu0 %v6204_v3  ;;  %v7878_v3 = vld [vmem:[#allocation37_spill] sm:$0xff] }
  0xc2   :  { %3569 = vmatpush1.bf16.msra.mxu1 %v5615_v27  ;;  %3603 = vmatprep.subr.bf16.mxu0 %v5936_v54 }
  0xc3   :  { %3571 = vmatprep.subr.bf16.mxu1 %v5629_v33 }
  0xc6   :  { %3573 = vmatpush1.bf16.msra.mxu1 %v5654_v43 }
  0xc7   :  { %3575 = vmatprep.subr.bf16.mxu1 %v7872_v1 }
  0xca   :  { %3577 = vmatpush1.bf16.msra.mxu1 %v7873_v4 }
  0xcb   :  { %3579 = vmatprep.subr.bf16.mxu1 %v7874_v24 }
  0xce   :  { %3581 = vmatpush1.bf16.msra.mxu1 %v7875_v44 }
  0xcf   :  { %3583 = vmatprep.subr.bf16.mxu1 %v7876_v20 }
  0xd2   :  { %3585 = vmatpush1.bf16.msra.mxu1 %v7877_v0 }
  0xd3   :  { %3587 = vmatprep.subr.bf16.mxu1 %v7878_v3 }
  0xd6   :  { %3589 = vmatpush1.bf16.msra.mxu1 %v7879_v59 }
  0xd7   :  { %3591 = vmatprep.subr.bf16.mxu1 %v7880_v52 }
  0xda   :  { %3593 = vmatpush1.bf16.msra.mxu1 %v7881_v23 }
  0xdb   :  { %3595 = vmatprep.subr.bf16.mxu1 %v7882_v57 }
  0xde   :  { %3597 = vmatpush1.bf16.msra.mxu1 %v7883_v61 }
  0xdf   :  { %3599 = vmatprep.subr.bf16.mxu1 %v7884_v7 }
  0xe2   :  { %3601 = vmatpush1.bf16.msra.mxu1 %v7885_v35 }
  0xe3   :  { %3731 = vmatprep.subr.bf16.mxu1 %v5319_v41 }
  0xf8   :  { %v6432_v22 = vpop.f32.mrb[0].mxu1 }
  0xf9   :  { %v345_v41 = vpop.f32.mrb[1].mxu1 }
  0xfa   :  { %v6436_v53 = vadd.f32 %v345_v41, %v6430_v15 }
  0xfc   :  { %7886 = vst [vmem:[#allocation93_spill] sm:$0xff] %v6436_v53 }
  0xfe   :  { %v349_v37 = vpop.f32.mrb[2].mxu1 }
  0xff   :  { %v6444_v8 = vadd.f32 %v349_v37, %v6441_v11  ;;  %v351_v58 = vpop.f32.mrb[3].mxu1 }
 0x100   :  { %v6447_v10 = vadd.f32 %v351_v58, %v6430_v15 }
 0x101   :  { %7887 = vst [vmem:[#allocation94_spill] sm:$0xff] %v6444_v8 }
 0x102   :  { %7888 = vst [vmem:[#allocation95_spill] sm:$0xff] %v6447_v10  ;;  %v355_v32 = vpop.f32.mrb[4].mxu1 }
 0x103   :  { %v6450_v29 = vadd.f32 %v355_v32, %v6441_v11  ;;  %v357_v54 = vpop.f32.mrb[5].mxu1 }
 0x104   :  { %v6453_v41 = vadd.f32 %v357_v54, %v6430_v15 }
 0x105   :  { %7889 = vst [vmem:[#allocation96_spill] sm:$0xff] %v6450_v29 }
 0x106   :  { %7890 = vst [vmem:[#allocation97_spill] sm:$0xff] %v6453_v41  ;;  %v361_v53 = vpop.f32.mrb[6].mxu1 }
 0x107   :  { %v6456_v21 = vadd.f32 %v361_v53, %v6441_v11  ;;  %v363_v35 = vpop.f32.mrb[7].mxu1 }
 0x108   :  { %v6459_v37 = vadd.f32 %v363_v35, %v6430_v15  ;;  %v7636_v35 = vsub.s32 5, %v6419_v46 }
 0x109   :  { %7891 = vst [vmem:[#allocation98_spill] sm:$0xff] %v6456_v21  ;;  %v7635_v21 = vsub.s32 4, %v6419_v46 }
 0x10a   :  { %7892 = vst [vmem:[#allocation99_spill] sm:$0xff] %v6459_v37  ;;  %v367_v8 = vpop.f32.mrb[8].mxu1 }
 0x10b   :  { %v6462_v58 = vadd.f32 %v367_v8, %v6441_v11  ;;  %v369_v10 = vpop.f32.mrb[9].mxu1 }
 0x10c   :  { %v6465_v32 = vadd.f32 %v369_v10, %v6430_v15  ;;  %v6481_v10 = vrot.slane %v6425_v14, %v7635_v21 }
 0x10d   :  { %7893 = vst [vmem:[#allocation100_spill] sm:$0xff] %v6462_v58 }
 0x10e   :  { %7894 = vst [vmem:[#allocation101_spill] sm:$0xff] %v6465_v32  ;;  %v373_v29 = vpop.f32.mrb[10].mxu1 }
 0x10f   :  { %v6468_v54 = vadd.f32 %v373_v29, %v6441_v11  ;;  %v375_v41 = vpop.f32.mrb[11].mxu1 }
 0x110   :  { %v6471_v53 = vadd.f32 %v375_v41, %v6430_v15  ;;  %v6489_v41 = vrot.slane %v6425_v14, %v7636_v35 }
 0x111   :  { %7895 = vst [vmem:[#allocation102_spill] sm:$0xff] %v6468_v54 }
 0x112   :  { %7896 = vst [vmem:[#allocation103_spill] sm:$0xff] %v6471_v53  ;;  %v379_v37 = vpop.f32.mrb[12].mxu1 }
 0x113   :  { %v6476_v8 = vadd.f32 %v379_v37, %v6441_v11  ;;  %v381_v58 = vpop.f32.mrb[13].mxu1 }
 0x114   :  { %v6484_v29 = vadd.f32 %v381_v58, %v6430_v15 }
 0x115   :  { %7897 = vst [vmem:[#allocation104_spill] sm:$0xff] %v6476_v8 }
 0x116   :  { %7898 = vst [vmem:[#allocation105_spill] sm:$0xff] %v6484_v29  ;;  %v385_v54 = vpop.f32.mrb[14].mxu1 }
 0x117   :  { %v456_v32 = vpop.f32.mrb[16].mxu0  ;;  %v6492_v53 = vadd.f32 %v385_v54, %v6441_v11  ;;  %v387_v37 = vpop.f32.mrb[15].mxu1 }
 0x118   :  { %v6495_v8 = vadd.f32 %v456_v32, %v6481_v10  ;;  %v458_v40 = vpop.f32.mrb[17].mxu0  ;;  %v388_v28 = vadd.f32 %v387_v37, %v6430_v15 }
 0x119   :  { %7899 = vst [vmem:[#allocation106_spill] sm:$0xff] %v6492_v53  ;;  %v6498_v21 = vadd.f32 %v458_v40, %v6489_v41 }
 0x11a   :  { %7900 = vst [vmem:[#allocation107_spill] sm:$0xff] %v6495_v8 }
 0x11b   :  { %7901 = vst [vmem:[#allocation108_spill] sm:$0xff] %v6498_v21  ;;  %v462_v58 = vpop.f32.mrb[18].mxu0 }
 0x11c   :  { %v6501_v29 = vadd.f32 %v462_v58, %v6481_v10  ;;  %v464_v7 = vpop.f32.mrb[19].mxu0 }
 0x11d   :  { %v6504_v35 = vadd.f32 %v464_v7, %v6489_v41 }
 0x11e   :  { %7902 = vst [vmem:[#allocation109_spill] sm:$0xff] %v6501_v29 }
 0x11f   :  { %7903 = vst [vmem:[#allocation110_spill] sm:$0xff] %v6504_v35  ;;  %v468_v61 = vpop.f32.mrb[20].mxu0 }
 0x120   :  { %v6507_v54 = vadd.f32 %v468_v61, %v6481_v10  ;;  %v470_v53 = vpop.f32.mrb[21].mxu0 }
 0x121   :  { %v6510_v32 = vadd.f32 %v470_v53, %v6489_v41 }
 0x122   :  { %7904 = vst [vmem:[#allocation111_spill] sm:$0xff] %v6507_v54 }
 0x123   :  { %7905 = vst [vmem:[#allocation112_spill] sm:$0xff] %v6510_v32  ;;  %v474_v8 = vpop.f32.mrb[22].mxu0 }
 0x124   :  { %v6513_v40 = vadd.f32 %v474_v8, %v6481_v10  ;;  %v476_v21 = vpop.f32.mrb[23].mxu0 }
 0x125   :  { %v6516_v58 = vadd.f32 %v476_v21, %v6489_v41 }
 0x126   :  { %7906 = vst [vmem:[#allocation113_spill] sm:$0xff] %v6513_v40 }
 0x127   :  { %7907 = vst [vmem:[#allocation114_spill] sm:$0xff] %v6516_v58  ;;  %v480_v29 = vpop.f32.mrb[24].mxu0 }
 0x128   :  { %v6519_v7 = vadd.f32 %v480_v29, %v6481_v10  ;;  %v482_v35 = vpop.f32.mrb[25].mxu0 }
 0x129   :  { %v6522_v61 = vadd.f32 %v482_v35, %v6489_v41  ;;  %v745_v35 = vld [vmem:[%s7502_s4] sm:$0x3f] }
 0x12a   :  { %7908 = vst [vmem:[#allocation115_spill] sm:$0xff] %v6519_v7 }
 0x12b   :  { %7909 = vst [vmem:[#allocation116_spill] sm:$0xff] %v6522_v61  ;;  %v486_v54 = vpop.f32.mrb[26].mxu0 }
 0x12c   :  { %v6525_v53 = vadd.f32 %v486_v54, %v6481_v10  ;;  %v488_v32 = vpop.f32.mrb[27].mxu0  ;;  %v7914_v54 = vsub.s32 3, %v6419_v46 }
 0x12d   :  { %v6528_v8 = vadd.f32 %v488_v32, %v6489_v41 }
 0x12e   :  { %7910 = vst [vmem:[#allocation117_spill] sm:$0xff] %v6525_v53  ;;  %v6541_v53 = vrot.slane %v745_v35, %v7914_v54 }
 0x12f   :  { %7911 = vst [vmem:[#allocation118_spill] sm:$0xff] %v6528_v8  ;;  %v492_v40 = vpop.f32.mrb[28].mxu0 }
 0x130   :  { %v6531_v21 = vadd.f32 %v492_v40, %v6481_v10  ;;  %v494_v58 = vpop.f32.mrb[29].mxu0  ;;  %7915 = vst [vmem:[#allocation121_spill] sm:$0xff] %v6541_v53 }
 0x131   :  { %v6534_v29 = vadd.f32 %v494_v58, %v6489_v41  ;;  %v136_v58 = vsub.s32 0, %v6419_v46 }
 0x132   :  { %7912 = vst [vmem:[#allocation119_spill] sm:$0xff] %v6531_v21 }
 0x133   :  { %7913 = vst [vmem:[#allocation120_spill] sm:$0xff] %v6534_v29  ;;  %v498_v61 = vpop.f32.mrb[30].mxu0  ;;  %v140_v29 = vsub.s32 1, %v6419_v46  ;;  %v137_v36 = vrot.slane %v6425_v14, %v136_v58  ;;  %v750_v57 = vrot.slane %v745_v35, %v136_v58 }
 0x134   :  { %v500_v7 = vpop.f32.mrb[31].mxu0 }
 0x135   :  { %v141_v23 = vrot.slane %v6425_v14, %v140_v29  ;;  %v754_v49 = vrot.slane %v745_v35, %v140_v29  ;;  %v6549_v17 = vadd.f32 %v750_v57, %v137_v36 }
 0x137   :  { %7916 = vst [vmem:[#allocation122_spill] sm:$0xff] %v6549_v17  ;;  %v6551_v52 = vadd.f32 %v754_v49, %v141_v23  ;;  %v7917_v23 = vsub.s32 2, %v6419_v46 }
 0x138   :  { %v916_v32 = vpop.f32.mrb[16].mxu1 }
 0x139   :  { %v918_v8 = vpop.f32.mrb[17].mxu1  ;;  %v6557_v49 = vrot.slane %v745_v35, %v7917_v23  ;;  %v501_v23 = vadd.f32 %v500_v7, %v6489_v41 }
 0x13a   :  { %v919_v40 = vadd.f32 %v918_v8, %v6541_v53 }
 0x13c   :  { %v1026_v21 = vadd.f32 %v919_v40, %v388_v28 }
 0x13e   :  { %v3106_v40 = vmul.f32 -1.442695, %v1026_v21  ;;  %v344_v21 = vadd.f32 %v6432_v22, %v6441_v11 }
 0x157   :  { %v845_v54 = vpop.f32.mrb[0].mxu0 }
 0x158   :  { %v4851_v15 = vadd.f32 %v6549_v17, %v845_v54  ;;  %v847_v37 = vpop.f32.mrb[1].mxu0  ;;  %v917_v54 = vadd.f32 %v916_v32, %v6557_v49 }
 0x159   :  { %v4853_v28 = vadd.f32 %v6551_v52, %v847_v37 }
 0x15a   :  { %v3104_v8 = vmul.f32 -1.442695, %v4851_v15 }
 0x15b   :  { %v3105_v53 = vmul.f32 -1.442695, %v4853_v28  ;;  %v7919_v28 = vsub.s32 5, %v6419_v46 }
 0x15c   :  { %4899 = vpow2.f32 %v3104_v8 }
 0x15d   :  { %4901 = vpow2.f32 %v3106_v40  ;;  %v6568_v40 = vrot.slane %v745_v35, %v7919_v28 }
 0x15e   :  { %4903 = vpow2.f32 %v3105_v53  ;;  %v7918_v53 = vsub.s32 4, %v6419_v46 }
 0x166   :  { %v4900_v58 = vpop.eup %4899 }
 0x167   :  { %v1009_v59 = vadd.f32 1.0, %v4900_v58  ;;  %v4902_v14 = vpop.eup %4901 }
 0x168   :  { %v4904_v57 = vpop.eup %4903  ;;  %v1030_v36 = vadd.f32 1.0, %v4902_v14  ;;  %v499_v14 = vadd.f32 %v498_v61, %v6481_v10 }
 0x169   :  { %4905 = vrcp.f32 %v1009_v59  ;;  %v1016_v29 = vadd.f32 1.0, %v4904_v57  ;;  %v6564_v59 = vrot.slane %v745_v35, %v7918_v53 }
 0x16a   :  { %4907 = vrcp.f32 %v1030_v36 }
 0x16b   :  { %4909 = vrcp.f32 %v1016_v29 }
 0x173   :  { %v4906_v15 = vpop.eup %4905 }
 0x174   :  { %v1019_v37 = vmul.f32 %v4906_v15, %v917_v54  ;;  %v4908_v22 = vpop.eup %4907 }
 0x175   :  { %v4910_v15 = vpop.eup %4909 }
 0x176   :  { %v1020_v8 = vadd.f32 %v1019_v37, %v344_v21  ;;  %v1022_v46 = vsub.f32 1.0, %v4910_v15  ;;  %v1024_v53 = vmul.f32 0.0, %v4910_v15  ;;  %v7927_v15 = vld [vmem:[#allocation69_spill] sm:$0xff] }
 0x178   :  { %4911 = vtanh.f32 %v1020_v8  ;;  %v987_v58 = vpop.f32.mrb[18].mxu1 }
 0x179   :  { %v988_v32 = vadd.f32 %v987_v58, %v6564_v59  ;;  %v989_v57 = vpop.f32.mrb[19].mxu1 }
 0x17a   :  { %v990_v11 = vadd.f32 %v989_v57, %v6568_v40  ;;  %v7920_v57 = vld [vmem:[#allocation55_spill] sm:$0xff] }
 0x17b   :  { %v1033_v36 = vadd.f32 %v988_v32, %v499_v14 }
 0x17c   :  { %v1040_v29 = vmul.f32 %v4908_v22, %v990_v11  ;;  %v7921_v11 = vld [vmem:[#allocation57_spill] sm:$0xff]  ;;  %v7922_v22 = vld [vmem:[#allocation59_spill] sm:$0xff] }
 0x17d   :  { %v3107_v54 = vmul.f32 -1.442695, %v1033_v36  ;;  %v7923_v36 = vld [vmem:[#allocation61_spill] sm:$0xff] }
 0x17e   :  { %v1041_v21 = vadd.f32 %v1040_v29, %v501_v23  ;;  %v7924_v23 = vld [vmem:[#allocation63_spill] sm:$0xff]  ;;  %v7925_v29 = vld [vmem:[#allocation65_spill] sm:$0xff] }
 0x17f   :  { %4913 = vpow2.f32 %v3107_v54  ;;  %v7926_v54 = vld [vmem:[#allocation67_spill] sm:$0xff] }
 0x182   :  { %v4912_v35 = vpop.eup %4911 }
 0x183   :  { %v1023_v37 = vmul.f32 %v4912_v35, %v1022_v46  ;;  %v7929_v46 = vld [vmem:[#allocation73_spill] sm:$0xff]  ;;  %v7930_v35 = vld [vmem:[#allocation75_spill] sm:$0xff] }
 0x185   :  { %v6574_v8 = vadd.f32 %v1024_v53, %v1023_v37  ;;  %v7931_v37 = vld [vmem:[#allocation77_spill] sm:$0xff] }
 0x186   :  { %v7932_v53 = vld [vmem:[#allocation81_spill] sm:$0xff] }
 0x187   :  { %1052 = vst [vmem:[%s7503_s7] sm:$0xff] %v6574_v8 }
 0x189   :  { %v4914_v10 = vpop.eup %4913 }
 0x18a   :  { %v1037_v61 = vadd.f32 1.0, %v4914_v10  ;;  %v7933_v10 = vld [vmem:[#allocation39_spill] sm:$0xff] }
 0x18c   :  { %4915 = vrcp.f32 %v1037_v61  ;;  %v7934_v61 = vld [vmem:[#allocation41_spill] sm:$0xff] }
 0x18d   :  { %4917 = vtanh.f32 %v1041_v21  ;;  %v7928_v21 = vld [vmem:[#allocation71_spill] sm:$0xff] }
 0x196   :  { %v4916_v41 = vpop.eup %4915 }
 0x197   :  { %v1043_v7 = vsub.f32 1.0, %v4916_v41  ;;  %v4918_v28 = vpop.eup %4917  ;;  %v1045_v14 = vmul.f32 0.0, %v4916_v41  ;;  %v7935_v41 = vld [vmem:[#allocation88_spill] sm:$0xff] }
 0x199   :  { %v1044_v58 = vmul.f32 %v4918_v28, %v1043_v7  ;;  %v7936_v7 = vld [vmem:[#allocation89_spill] sm:$0xff]  ;;  %v7937_v28 = vld [vmem:[#allocation43_spill] sm:$0xff] }
 0x19b   :  { %v6580_v32 = vadd.f32 %v1045_v14, %v1044_v58  ;;  %v7938_v58 = vld [vmem:[#allocation45_spill] sm:$0xff]  ;;  %v7939_v14 = vld [vmem:[#allocation90_spill] sm:$0xff] }
 0x19d   :  { %3108 = vst [vmem:[%s7503_s7 + $0x78] sm:$0xff] %v6580_v32  ;;  %1123 = vmatprep.mubr.f32.mxu0 %v6580_v32  ;;  %1194 = vmatprep.mubr.f32.mxu1 %v6580_v32 }
 0x19e   :  { %1124 = vmatmul.mubr.f32.vlgmr.msra.gmra.mrb[2].mxu0 %v6574_v8  ;;  %1195 = vmatmul.mubr.f32.vlgmr.msra.gmra.mrb[20].mxu1 %v6574_v8 }
 0x19f   :  { %3605 = vmatpush1.bf16.msra.mxu0 %v7920_v57  ;;  %1265 = vmatprep.mubr.f32.mxu0 %v6580_v32 }
 0x1a0   :  { %3607 = vmatprep.subr.bf16.mxu0 %v7921_v11  ;;  %3733 = vmatpush1.bf16.msra.mxu1 %v5344_v50  ;;  %v7970_v50 = vld [vmem:[#allocation68_spill] sm:$0xff] }
 0x1a1   :  { %3735 = vmatprep.subr.bf16.mxu1 %v5356_v55  ;;  %v7969_v55 = vld [vmem:[#allocation66_spill] sm:$0xff] }
 0x1a3   :  { %3609 = vmatpush1.bf16.msra.mxu0 %v7922_v22 }
 0x1a4   :  { %3611 = vmatprep.subr.bf16.mxu0 %v7923_v36  ;;  %3737 = vmatpush1.bf16.msra.mxu1 %v5382_v63  ;;  %v7968_v63 = vld [vmem:[#allocation64_spill] sm:$0xff] }
 0x1a5   :  { %3739 = vmatprep.subr.bf16.mxu1 %v5394_v5  ;;  %v7967_v5 = vld [vmem:[#allocation62_spill] sm:$0xff] }
 0x1a7   :  { %3613 = vmatpush1.bf16.msra.mxu0 %v7924_v23 }
 0x1a8   :  { %3615 = vmatprep.subr.bf16.mxu0 %v7925_v29  ;;  %3741 = vmatpush1.bf16.msra.mxu1 %v5420_v13  ;;  %v7966_v13 = vld [vmem:[#allocation60_spill] sm:$0xff] }
 0x1a9   :  { %3743 = vmatprep.subr.bf16.mxu1 %v5432_v18  ;;  %v7965_v18 = vld [vmem:[#allocation58_spill] sm:$0xff] }
 0x1ab   :  { %3617 = vmatpush1.bf16.msra.mxu0 %v7926_v54 }
 0x1ac   :  { %3619 = vmatprep.subr.bf16.mxu0 %v7927_v15  ;;  %3745 = vmatpush1.bf16.msra.mxu1 %v5459_v26  ;;  %v7964_v26 = vld [vmem:[#allocation56_spill] sm:$0xff] }
 0x1ad   :  { %3747 = vmatprep.subr.bf16.mxu1 %v5471_v31  ;;  %v7963_v31 = vld [vmem:[#allocation54_spill] sm:$0xff] }
 0x1af   :  { %3621 = vmatpush1.bf16.msra.mxu0 %v7928_v21 }
 0x1b0   :  { %3623 = vmatprep.subr.bf16.mxu0 %v7929_v46  ;;  %3749 = vmatpush1.bf16.msra.mxu1 %v5498_v39  ;;  %v7962_v39 = vld [vmem:[#allocation52_spill] sm:$0xff] }
 0x1b1   :  { %3751 = vmatprep.subr.bf16.mxu1 %v5510_v45  ;;  %v7961_v45 = vld [vmem:[#allocation50_spill] sm:$0xff] }
 0x1b3   :  { %3625 = vmatpush1.bf16.msra.mxu0 %v7930_v35 }
 0x1b4   :  { %3627 = vmatprep.subr.bf16.mxu0 %v7931_v37  ;;  %3753 = vmatpush1.bf16.msra.mxu1 %v5537_v56  ;;  %v7960_v56 = vld [vmem:[#allocation48_spill] sm:$0xff] }
 0x1b5   :  { %3755 = vmatprep.subr.bf16.mxu1 %v5549_v62  ;;  %v7959_v62 = vld [vmem:[#allocation46_spill] sm:$0xff] }
 0x1b7   :  { %3629 = vmatpush1.bf16.msra.mxu0 %v6178_v2 }
 0x1b8   :  { %3631 = vmatprep.subr.bf16.mxu0 %v6189_v6  ;;  %3757 = vmatpush1.bf16.msra.mxu1 %v5576_v9  ;;  %v7958_v9 = vld [vmem:[#allocation44_spill] sm:$0xff] }
 0x1b9   :  { %3759 = vmatprep.subr.bf16.mxu1 %v5588_v16  ;;  %v7957_v16 = vld [vmem:[#allocation42_spill] sm:$0xff] }
 0x1bb   :  { %3633 = vmatpush1.bf16.msra.mxu0 %v6208_v34 }
 0x1bc   :  { %3635 = vmatprep.subr.bf16.mxu0 %v7932_v53  ;;  %3761 = vmatpush1.bf16.msra.mxu1 %v5615_v27  ;;  %v7956_v27 = vld [vmem:[#allocation40_spill] sm:$0xff] }
 0x1bd   :  { %3763 = vmatprep.subr.bf16.mxu1 %v5629_v33  ;;  %v7954_v33 = vld [vmem:[#allocation36_spill] sm:$0xff] }
 0x1bf   :  { %3637 = vmatpush1.bf16.msra.mxu0 %v6227_v19 }
 0x1c0   :  { %3639 = vmatprep.subr.bf16.mxu0 %v6231_v25  ;;  %3765 = vmatpush1.bf16.msra.mxu1 %v5654_v43  ;;  %v7953_v43 = vld [vmem:[#allocation34_spill] sm:$0xff] }
 0x1c1   :  { %3767 = vmatprep.subr.bf16.mxu1 %v7872_v1  ;;  %v7950_v1 = vld [vmem:[#allocation28_spill] sm:$0xff] }
 0x1c3   :  { %3641 = vmatpush1.bf16.msra.mxu0 %v6248_v51 }
 0x1c4   :  { %3643 = vmatprep.subr.bf16.mxu0 %v6252_v48  ;;  %3769 = vmatpush1.bf16.msra.mxu1 %v7873_v4  ;;  %v7949_v4 = vld [vmem:[#allocation26_spill] sm:$0xff] }
 0x1c5   :  { %3771 = vmatprep.subr.bf16.mxu1 %v7874_v24  ;;  %v7946_v24 = vld [vmem:[#allocation53_spill] sm:$0xff] }
 0x1c7   :  { %3645 = vmatpush1.bf16.msra.mxu0 %v6268_v12 }
 0x1c8   :  { %3647 = vmatprep.subr.bf16.mxu0 %v6272_v30  ;;  %3773 = vmatpush1.bf16.msra.mxu1 %v7875_v44  ;;  %v7943_v44 = vld [vmem:[#allocation92_spill] sm:$0xff] }
 0x1c9   :  { %3775 = vmatprep.subr.bf16.mxu1 %v7876_v20  ;;  %v7942_v20 = vld [vmem:[#allocation49_spill] sm:$0xff] }
 0x1cb   :  { %3649 = vmatpush1.bf16.msra.mxu0 %v6288_v42  ;;  %v7978_v42 = vld [vmem:[#allocation121_spill] sm:$0xff] }
 0x1cc   :  { %3651 = vmatprep.subr.bf16.mxu0 %v6292_v47  ;;  %3777 = vmatpush1.bf16.msra.mxu1 %v7877_v0  ;;  %v7940_v0 = vld [vmem:[#allocation91_spill] sm:$0xff] }
 0x1cd   :  { %3779 = vmatprep.subr.bf16.mxu1 %v7878_v3  ;;  %v7941_v3 = vld [vmem:[#allocation47_spill] sm:$0xff] }
 0x1cf   :  { %3653 = vmatpush1.bf16.msra.mxu0 %v6308_v60 }
 0x1d0   :  { %3655 = vmatprep.subr.bf16.mxu0 %v6312_v38  ;;  %3781 = vmatpush1.bf16.msra.mxu1 %v7933_v10  ;;  %v7944_v10 = vld [vmem:[#allocation20_spill] sm:$0xff] }
 0x1d1   :  { %3783 = vmatprep.subr.bf16.mxu1 %v7934_v61  ;;  %v7945_v61 = vld [vmem:[#allocation51_spill] sm:$0xff]  ;;  %v7977_v38 = vld [vmem:[#allocation80_spill] sm:$0xff] }
 0x1d3   :  { %3657 = vmatpush1.bf16.msra.mxu0 %v7935_v41  ;;  %v7976_v41 = vld [vmem:[#allocation79_spill] sm:$0xff] }
 0x1d4   :  { %3659 = vmatprep.subr.bf16.mxu0 %v7936_v7  ;;  %3785 = vmatpush1.bf16.msra.mxu1 %v7937_v28  ;;  %v7947_v28 = vld [vmem:[#allocation22_spill] sm:$0xff] }
 0x1d5   :  { %3787 = vmatprep.subr.bf16.mxu1 %v7938_v58  ;;  %v7948_v58 = vld [vmem:[#allocation24_spill] sm:$0xff]  ;;  %v7975_v7 = vld [vmem:[#allocation78_spill] sm:$0xff] }
 0x1d7   :  { %3661 = vmatpush1.bf16.msra.mxu0 %v7939_v14  ;;  %v7974_v14 = vld [vmem:[#allocation76_spill] sm:$0xff] }
 0x1d8   :  { %3663 = vmatprep.subr.bf16.mxu0 %v7940_v0  ;;  %3789 = vmatpush1.bf16.msra.mxu1 %v7941_v3  ;;  %v7951_v3 = vld [vmem:[#allocation30_spill] sm:$0xff] }
 0x1d9   :  { %3791 = vmatprep.subr.bf16.mxu1 %v7942_v20  ;;  %v7952_v20 = vld [vmem:[#allocation32_spill] sm:$0xff]  ;;  %v7973_v0 = vld [vmem:[#allocation74_spill] sm:$0xff] }
 0x1db   :  { %3665 = vmatpush1.bf16.msra.mxu0 %v7943_v44  ;;  %v7972_v44 = vld [vmem:[#allocation72_spill] sm:$0xff] }
 0x1dc   :  { %3667 = vmatprep.subr.bf16.mxu0 %v7944_v10  ;;  %3793 = vmatpush1.bf16.msra.mxu1 %v7945_v61  ;;  %v7955_v61 = vld [vmem:[#allocation38_spill] sm:$0xff] }
 0x1dd   :  { %3795 = vmatprep.subr.bf16.mxu1 %v7946_v24  ;;  %v7971_v24 = vld [vmem:[#allocation70_spill] sm:$0xff] }
 0x1de   :  { %1266 = vmatmul.mubr.f32.vlgmr.msra.gmra.mrb[32].mxu0 %v6574_v8 }
 0x1df   :  { %3669 = vmatpush1.bf16.msra.mxu0 %v7947_v28 }
 0x1e0   :  { %3671 = vmatprep.subr.bf16.mxu0 %v7948_v58 }
 0x1e3   :  { %3673 = vmatpush1.bf16.msra.mxu0 %v7949_v4 }
 0x1e4   :  { %3675 = vmatprep.subr.bf16.mxu0 %v7950_v1 }
 0x1e7   :  { %3677 = vmatpush1.bf16.msra.mxu0 %v7951_v3 }
 0x1e8   :  { %3679 = vmatprep.subr.bf16.mxu0 %v7952_v20 }
 0x1eb   :  { %3681 = vmatpush1.bf16.msra.mxu0 %v7953_v43 }
 0x1ec   :  { %3683 = vmatprep.subr.bf16.mxu0 %v7954_v33 }
 0x1ef   :  { %3685 = vmatpush1.bf16.msra.mxu0 %v7955_v61 }
 0x1f0   :  { %3687 = vmatprep.subr.bf16.mxu0 %v7956_v27 }
 0x1f3   :  { %3689 = vmatpush1.bf16.msra.mxu0 %v7957_v16 }
 0x1f4   :  { %3691 = vmatprep.subr.bf16.mxu0 %v7958_v9 }
 0x1f7   :  { %3693 = vmatpush1.bf16.msra.mxu0 %v7959_v62 }
 0x1f8   :  { %3695 = vmatprep.subr.bf16.mxu0 %v7960_v56 }
 0x1fb   :  { %3697 = vmatpush1.bf16.msra.mxu0 %v7961_v45 }
 0x1fc   :  { %3699 = vmatprep.subr.bf16.mxu0 %v7962_v39 }
 0x1ff   :  { %3701 = vmatpush1.bf16.msra.mxu0 %v7963_v31 }
 0x200   :  { %3703 = vmatprep.subr.bf16.mxu0 %v7964_v26 }
 0x203   :  { %3705 = vmatpush1.bf16.msra.mxu0 %v7965_v18 }
 0x204   :  { %3707 = vmatprep.subr.bf16.mxu0 %v7966_v13  ;;  %v7980_v13 = vld [vmem:[#allocation94_spill] sm:$0xff] }
 0x207   :  { %3709 = vmatpush1.bf16.msra.mxu0 %v7967_v5 }
 0x208   :  { %3711 = vmatprep.subr.bf16.mxu0 %v7968_v63 }
 0x20b   :  { %3713 = vmatpush1.bf16.msra.mxu0 %v7969_v55 }
 0x20c   :  { %3715 = vmatprep.subr.bf16.mxu0 %v7970_v50 }
 0x20f   :  { %3717 = vmatpush1.bf16.msra.mxu0 %v7971_v24 }
 0x210   :  { %3719 = vmatprep.subr.bf16.mxu0 %v7972_v44 }
 0x213   :  { %3721 = vmatpush1.bf16.msra.mxu0 %v7973_v0 }
 0x214   :  { %3723 = vmatprep.subr.bf16.mxu0 %v7974_v14  ;;  %v7979_v14 = vld [vmem:[#allocation105_spill] sm:$0xff] }
 0x217   :  { %3725 = vmatpush1.bf16.msra.mxu0 %v7975_v7 }
 0x218   :  { %3727 = vmatprep.subr.bf16.mxu0 %v7976_v41 }
 0x21b   :  { %3729 = vmatpush1.bf16.msra.mxu0 %v7977_v38 }
 0x21c   :  { %3859 = vmatprep.subr.bf16.mxu0 %v7944_v10 }
 0x271   :  { %v1125_v60 = vpop.f32.mrb[2].mxu0  ;;  %v1196_v55 = vpop.f32.mrb[20].mxu1 }
 0x272   :  { %v4855_v50 = vadd.f32 %v6549_v17, %v1125_v60  ;;  %v1127_v47 = vpop.f32.mrb[3].mxu0  ;;  %v1198_v24 = vpop.f32.mrb[21].mxu1  ;;  %v1197_v12 = vadd.f32 %v1196_v55, %v6557_v49 }
 0x273   :  { %v1199_v44 = vadd.f32 %v1198_v24, %v7978_v42  ;;  %v4857_v0 = vadd.f32 %v6551_v52, %v1127_v47 }
 0x274   :  { %v3109_v63 = vmul.f32 -1.442695, %v4855_v50 }
 0x275   :  { %v1306_v5 = vadd.f32 %v1199_v44, %v7979_v14  ;;  %v3110_v7 = vmul.f32 -1.442695, %v4857_v0 }
 0x276   :  { %4919 = vpow2.f32 %v3109_v63 }
 0x277   :  { %4921 = vpow2.f32 %v3110_v7  ;;  %v3111_v50 = vmul.f32 -1.442695, %v1306_v5 }
 0x280   :  { %v4920_v41 = vpop.eup %4919 }
 0x281   :  { %v1289_v38 = vadd.f32 1.0, %v4920_v41  ;;  %v4922_v10 = vpop.eup %4921 }
 0x282   :  { %v1296_v30 = vadd.f32 1.0, %v4922_v10  ;;  %v7981_v10 = vld [vmem:[#allocation119_spill] sm:$0xff] }
 0x283   :  { %4923 = vrcp.f32 %v1289_v38 }
 0x284   :  { %4925 = vrcp.f32 %v1296_v30 }
 0x28d   :  { %v4924_v60 = vpop.eup %4923 }
 0x28e   :  { %v1299_v17 = vmul.f32 %v4924_v60, %v1197_v12  ;;  %v4926_v47 = vpop.eup %4925 }
 0x28f   :  { %v1302_v44 = vsub.f32 1.0, %v4926_v47  ;;  %v1304_v7 = vmul.f32 %v4926_v47, %v6574_v8 }
 0x290   :  { %v1300_v24 = vadd.f32 %v1299_v17, %v7980_v13 }
 0x292   :  { %4927 = vtanh.f32 %v1300_v24  ;;  %v7982_v24 = vld [vmem:[#allocation120_spill] sm:$0xff] }
 0x293   :  { %4929 = vpow2.f32 %v3111_v50 }
 0x29c   :  { %v4928_v63 = vpop.eup %4927 }
 0x29d   :  { %v1303_v0 = vmul.f32 %v4928_v63, %v1302_v44  ;;  %v4930_v55 = vpop.eup %4929 }
 0x29e   :  { %v1310_v12 = vadd.f32 1.0, %v4930_v55 }
 0x29f   :  { %v6695_v41 = vadd.f32 %v1304_v7, %v1303_v0 }
 0x2a0   :  { %4931 = vrcp.f32 %v1310_v12 }
 0x2a1   :  { %3113 = vst [vmem:[%s7503_s7 + $0x10] sm:$0xff] %v6695_v41 }
 0x2aa   :  { %v4932_v17 = vpop.eup %4931 }
 0x2b1   :  { %v1267_v13 = vpop.f32.mrb[32].mxu0 }
 0x2b2   :  { %v1268_v5 = vadd.f32 %v1267_v13, %v6564_v59  ;;  %v1269_v30 = vpop.f32.mrb[33].mxu0 }
 0x2b3   :  { %v1270_v38 = vadd.f32 %v1269_v30, %v6568_v40  ;;  %v7985_v30 = vld [vmem:[#allocation83_spill] sm:$0xff] }
 0x2b4   :  { %v1313_v14 = vadd.f32 %v1268_v5, %v7981_v10  ;;  %v7984_v5 = vld [vmem:[#allocation82_spill] sm:$0xff]  ;;  %v7988_v10 = vld [vmem:[#allocation84_spill] sm:$0xff] }
 0x2b5   :  { %v1320_v8 = vmul.f32 %v4932_v17, %v1270_v38  ;;  %v7986_v38 = vld [vmem:[#allocation62_spill] sm:$0xff]  ;;  %v7987_v17 = vld [vmem:[#allocation64_spill] sm:$0xff] }
 0x2b6   :  { %v3112_v60 = vmul.f32 -1.442695, %v1313_v14  ;;  %v7989_v14 = vld [vmem:[#allocation85_spill] sm:$0xff] }
 0x2b7   :  { %v1321_v50 = vadd.f32 %v1320_v8, %v7982_v24  ;;  %v7990_v8 = vld [vmem:[#allocation66_spill] sm:$0xff] }
 0x2b8   :  { %4933 = vpow2.f32 %v3112_v60  ;;  %v7991_v60 = vld [vmem:[#allocation68_spill] sm:$0xff]  ;;  %v7992_v24 = vld [vmem:[#allocation86_spill] sm:$0xff] }
 0x2c2   :  { %v4934_v47 = vpop.eup %4933 }
 0x2c3   :  { %v1317_v44 = vadd.f32 1.0, %v4934_v47  ;;  %v7994_v47 = vld [vmem:[#allocation70_spill] sm:$0xff] }
 0x2c5   :  { %4935 = vrcp.f32 %v1317_v44  ;;  %v7995_v44 = vld [vmem:[#allocation72_spill] sm:$0xff] }
 0x2c6   :  { %4937 = vtanh.f32 %v1321_v50  ;;  %v7993_v50 = vld [vmem:[#allocation87_spill] sm:$0xff] }
 0x2cf   :  { %v4936_v63 = vpop.eup %4935 }
 0x2d0   :  { %v1323_v0 = vsub.f32 1.0, %v4936_v63  ;;  %v4938_v7 = vpop.eup %4937  ;;  %v1325_v12 = vmul.f32 %v4936_v63, %v6580_v32  ;;  %v7983_v32 = vld [vmem:[#allocation60_spill] sm:$0xff] }
 0x2d1   :  { %v7996_v63 = vld [vmem:[#allocation88_spill] sm:$0xff] }
 0x2d2   :  { %v1324_v55 = vmul.f32 %v4938_v7, %v1323_v0  ;;  %v7997_v0 = vld [vmem:[#allocation89_spill] sm:$0xff]  ;;  %v7998_v7 = vld [vmem:[#allocation74_spill] sm:$0xff] }
 0x2d4   :  { %v6706_v13 = vadd.f32 %v1325_v12, %v1324_v55  ;;  %v7999_v55 = vld [vmem:[#allocation76_spill] sm:$0xff]  ;;  %v8000_v12 = vld [vmem:[#allocation90_spill] sm:$0xff] }
 0x2d6   :  { %3114 = vst [vmem:[%s7503_s7 + $0x68] sm:$0xff] %v6706_v13  ;;  %1403 = vmatprep.mubr.f32.mxu0 %v6706_v13  ;;  %1474 = vmatprep.mubr.f32.mxu1 %v6706_v13 }
 0x2d7   :  { %1404 = vmatmul.mubr.f32.vlgmr.msra.gmra.mrb[4].mxu0 %v6695_v41  ;;  %1475 = vmatmul.mubr.f32.vlgmr.msra.gmra.mrb[22].mxu1 %v6695_v41 }
 0x2d8   :  { %3797 = vmatpush1.bf16.msra.mxu1 %v7920_v57  ;;  %1545 = vmatprep.mubr.f32.mxu1 %v6706_v13 }
 0x2d9   :  { %3799 = vmatprep.subr.bf16.mxu1 %v7921_v11  ;;  %3861 = vmatpush1.bf16.msra.mxu0 %v7947_v28  ;;  %v8031_v28 = vld [vmem:[#allocation37_spill] sm:$0xff] }
 0x2da   :  { %3863 = vmatprep.subr.bf16.mxu0 %v7948_v58  ;;  %v8030_v58 = vld [vmem:[#allocation35_spill] sm:$0xff] }
 0x2dc   :  { %3801 = vmatpush1.bf16.msra.mxu1 %v7922_v22 }
 0x2dd   :  { %3803 = vmatprep.subr.bf16.mxu1 %v7923_v36  ;;  %3865 = vmatpush1.bf16.msra.mxu0 %v7949_v4  ;;  %v8029_v4 = vld [vmem:[#allocation33_spill] sm:$0xff] }
 0x2de   :  { %3867 = vmatprep.subr.bf16.mxu0 %v7950_v1  ;;  %v8028_v1 = vld [vmem:[#allocation31_spill] sm:$0xff] }
 0x2e0   :  { %3805 = vmatpush1.bf16.msra.mxu1 %v7924_v23 }
 0x2e1   :  { %3807 = vmatprep.subr.bf16.mxu1 %v7925_v29  ;;  %3869 = vmatpush1.bf16.msra.mxu0 %v7951_v3  ;;  %v8027_v3 = vld [vmem:[#allocation29_spill] sm:$0xff] }
 0x2e2   :  { %3871 = vmatprep.subr.bf16.mxu0 %v7952_v20  ;;  %v8026_v20 = vld [vmem:[#allocation27_spill] sm:$0xff] }
 0x2e4   :  { %3809 = vmatpush1.bf16.msra.mxu1 %v7926_v54 }
 0x2e5   :  { %3811 = vmatprep.subr.bf16.mxu1 %v7927_v15  ;;  %3873 = vmatpush1.bf16.msra.mxu0 %v7953_v43  ;;  %v8025_v43 = vld [vmem:[#allocation25_spill] sm:$0xff] }
 0x2e6   :  { %3875 = vmatprep.subr.bf16.mxu0 %v7954_v33  ;;  %v8024_v33 = vld [vmem:[#allocation23_spill] sm:$0xff] }
 0x2e8   :  { %3813 = vmatpush1.bf16.msra.mxu1 %v7928_v21 }
 0x2e9   :  { %3815 = vmatprep.subr.bf16.mxu1 %v7929_v46  ;;  %3877 = vmatpush1.bf16.msra.mxu0 %v7955_v61  ;;  %v8023_v61 = vld [vmem:[#allocation21_spill] sm:$0xff] }
 0x2ea   :  { %3879 = vmatprep.subr.bf16.mxu0 %v7956_v27  ;;  %v8022_v27 = vld [vmem:[#allocation19_spill] sm:$0xff] }
 0x2ec   :  { %3817 = vmatpush1.bf16.msra.mxu1 %v7930_v35 }
 0x2ed   :  { %3819 = vmatprep.subr.bf16.mxu1 %v7931_v37  ;;  %3881 = vmatpush1.bf16.msra.mxu0 %v7957_v16  ;;  %v8021_v16 = vld [vmem:[#allocation18_spill] sm:$0xff] }
 0x2ee   :  { %3883 = vmatprep.subr.bf16.mxu0 %v7958_v9  ;;  %v8020_v9 = vld [vmem:[#allocation17_spill] sm:$0xff] }
 0x2f0   :  { %3821 = vmatpush1.bf16.msra.mxu1 %v6178_v2 }
 0x2f1   :  { %3823 = vmatprep.subr.bf16.mxu1 %v6189_v6  ;;  %3885 = vmatpush1.bf16.msra.mxu0 %v7959_v62  ;;  %v8019_v62 = vld [vmem:[#allocation16_spill] sm:$0xff] }
 0x2f2   :  { %3887 = vmatprep.subr.bf16.mxu0 %v7960_v56  ;;  %v8018_v56 = vld [vmem:[#allocation15_spill] sm:$0xff] }
 0x2f4   :  { %3825 = vmatpush1.bf16.msra.mxu1 %v6208_v34 }
 0x2f5   :  { %3827 = vmatprep.subr.bf16.mxu1 %v7932_v53  ;;  %3889 = vmatpush1.bf16.msra.mxu0 %v7961_v45  ;;  %v8017_v45 = vld [vmem:[#allocation14_spill] sm:$0xff] }
 0x2f6   :  { %3891 = vmatprep.subr.bf16.mxu0 %v7962_v39  ;;  %v8015_v39 = vld [vmem:[#allocation12_spill] sm:$0xff] }
 0x2f8   :  { %3829 = vmatpush1.bf16.msra.mxu1 %v6227_v19 }
 0x2f9   :  { %3831 = vmatprep.subr.bf16.mxu1 %v6231_v25  ;;  %3893 = vmatpush1.bf16.msra.mxu0 %v7963_v31  ;;  %v8014_v31 = vld [vmem:[#allocation11_spill] sm:$0xff] }
 0x2fa   :  { %3895 = vmatprep.subr.bf16.mxu0 %v7964_v26  ;;  %v8011_v26 = vld [vmem:[#allocation8_spill] sm:$0xff] }
 0x2fc   :  { %3833 = vmatpush1.bf16.msra.mxu1 %v6248_v51 }
 0x2fd   :  { %3835 = vmatprep.subr.bf16.mxu1 %v6252_v48  ;;  %3897 = vmatpush1.bf16.msra.mxu0 %v7965_v18  ;;  %v8010_v18 = vld [vmem:[#allocation7_spill] sm:$0xff] }
 0x2fe   :  { %3899 = vmatprep.subr.bf16.mxu0 %v7983_v32  ;;  %v8007_v32 = vld [vmem:[#allocation53_spill] sm:$0xff] }
 0x300   :  { %3837 = vmatpush1.bf16.msra.mxu1 %v7984_v5 }
 0x301   :  { %3839 = vmatprep.subr.bf16.mxu1 %v7985_v30  ;;  %3901 = vmatpush1.bf16.msra.mxu0 %v7986_v38  ;;  %v8004_v38 = vld [vmem:[#allocation92_spill] sm:$0xff] }
 0x302   :  { %3903 = vmatprep.subr.bf16.mxu0 %v7987_v17  ;;  %v8003_v17 = vld [vmem:[#allocation79_spill] sm:$0xff] }
 0x304   :  { %3841 = vmatpush1.bf16.msra.mxu1 %v7988_v10 }
 0x305   :  { %3843 = vmatprep.subr.bf16.mxu1 %v7989_v14  ;;  %3905 = vmatpush1.bf16.msra.mxu0 %v7990_v8  ;;  %v8001_v8 = vld [vmem:[#allocation91_spill] sm:$0xff]  ;;  %v8039_v14 = vld [vmem:[#allocation122_spill] sm:$0xff] }
 0x306   :  { %3907 = vmatprep.subr.bf16.mxu0 %v7991_v60  ;;  %v8002_v60 = vld [vmem:[#allocation78_spill] sm:$0xff] }
 0x308   :  { %3845 = vmatpush1.bf16.msra.mxu1 %v7992_v24 }
 0x309   :  { %3847 = vmatprep.subr.bf16.mxu1 %v7993_v50  ;;  %3909 = vmatpush1.bf16.msra.mxu0 %v7994_v47  ;;  %v8005_v47 = vld [vmem:[#allocation4_spill] sm:$0xff]  ;;  %v8038_v50 = vld [vmem:[#allocation51_spill] sm:$0xff] }
 0x30a   :  { %3911 = vmatprep.subr.bf16.mxu0 %v7995_v44  ;;  %v8006_v44 = vld [vmem:[#allocation80_spill] sm:$0xff] }
 0x30c   :  { %3849 = vmatpush1.bf16.msra.mxu1 %v7996_v63  ;;  %v8037_v63 = vld [vmem:[#allocation49_spill] sm:$0xff] }
 0x30d   :  { %3851 = vmatprep.subr.bf16.mxu1 %v7997_v0  ;;  %3913 = vmatpush1.bf16.msra.mxu0 %v7998_v7  ;;  %v8008_v7 = vld [vmem:[#allocation5_spill] sm:$0xff]  ;;  %v8036_v0 = vld [vmem:[#allocation47_spill] sm:$0xff] }
 0x30e   :  { %3915 = vmatprep.subr.bf16.mxu0 %v7999_v55  ;;  %v8009_v55 = vld [vmem:[#allocation6_spill] sm:$0xff] }
 0x310   :  { %3853 = vmatpush1.bf16.msra.mxu1 %v8000_v12  ;;  %v8035_v12 = vld [vmem:[#allocation45_spill] sm:$0xff] }
 0x311   :  { %3855 = vmatprep.subr.bf16.mxu1 %v8001_v8  ;;  %3917 = vmatpush1.bf16.msra.mxu0 %v8002_v60  ;;  %v8012_v60 = vld [vmem:[#allocation9_spill] sm:$0xff]  ;;  %v8034_v8 = vld [vmem:[#allocation43_spill] sm:$0xff] }
 0x312   :  { %3919 = vmatprep.subr.bf16.mxu0 %v8003_v17  ;;  %v8013_v17 = vld [vmem:[#allocation10_spill] sm:$0xff] }
 0x314   :  { %3857 = vmatpush1.bf16.msra.mxu1 %v8004_v38  ;;  %v8033_v38 = vld [vmem:[#allocation41_spill] sm:$0xff] }
 0x315   :  { %3923 = vmatprep.subr.bf16.mxu1 %v8005_v47  ;;  %3921 = vmatpush1.bf16.msra.mxu0 %v8006_v44  ;;  %v8016_v44 = vld [vmem:[#allocation13_spill] sm:$0xff] }
 0x316   :  { %3987 = vmatprep.subr.bf16.mxu0 %v8007_v32  ;;  %v8032_v32 = vld [vmem:[#allocation39_spill] sm:$0xff] }
 0x317   :  { %1546 = vmatmul.mubr.f32.vlgmr.msra.gmra.mrb[24].mxu1 %v6695_v41 }
 0x318   :  { %3925 = vmatpush1.bf16.msra.mxu1 %v8008_v7 }
 0x319   :  { %3927 = vmatprep.subr.bf16.mxu1 %v8009_v55 }
 0x31c   :  { %3929 = vmatpush1.bf16.msra.mxu1 %v8010_v18 }
 0x31d   :  { %3931 = vmatprep.subr.bf16.mxu1 %v8011_v26 }
 0x320   :  { %3933 = vmatpush1.bf16.msra.mxu1 %v8012_v60 }
 0x321   :  { %3935 = vmatprep.subr.bf16.mxu1 %v8013_v17 }
 0x324   :  { %3937 = vmatpush1.bf16.msra.mxu1 %v8014_v31 }
 0x325   :  { %3939 = vmatprep.subr.bf16.mxu1 %v8015_v39 }
 0x328   :  { %3941 = vmatpush1.bf16.msra.mxu1 %v8016_v44 }
 0x329   :  { %3943 = vmatprep.subr.bf16.mxu1 %v8017_v45 }
 0x32c   :  { %3945 = vmatpush1.bf16.msra.mxu1 %v8018_v56 }
 0x32d   :  { %3947 = vmatprep.subr.bf16.mxu1 %v8019_v62 }
 0x330   :  { %3949 = vmatpush1.bf16.msra.mxu1 %v8020_v9 }
 0x331   :  { %3951 = vmatprep.subr.bf16.mxu1 %v8021_v16 }
 0x334   :  { %3953 = vmatpush1.bf16.msra.mxu1 %v8022_v27 }
 0x335   :  { %3955 = vmatprep.subr.bf16.mxu1 %v8023_v61 }
 0x338   :  { %3957 = vmatpush1.bf16.msra.mxu1 %v8024_v33 }
 0x339   :  { %3959 = vmatprep.subr.bf16.mxu1 %v8025_v43 }
 0x33c   :  { %3961 = vmatpush1.bf16.msra.mxu1 %v8026_v20 }
 0x33d   :  { %3963 = vmatprep.subr.bf16.mxu1 %v8027_v3  ;;  %v8041_v3 = vld [vmem:[#allocation96_spill] sm:$0xff] }
 0x340   :  { %3965 = vmatpush1.bf16.msra.mxu1 %v8028_v1 }
 0x341   :  { %3967 = vmatprep.subr.bf16.mxu1 %v8029_v4 }
 0x344   :  { %3969 = vmatpush1.bf16.msra.mxu1 %v8030_v58 }
 0x345   :  { %3971 = vmatprep.subr.bf16.mxu1 %v8031_v28 }
 0x348   :  { %3973 = vmatpush1.bf16.msra.mxu1 %v8032_v32 }
 0x349   :  { %3975 = vmatprep.subr.bf16.mxu1 %v8033_v38 }
 0x34c   :  { %3977 = vmatpush1.bf16.msra.mxu1 %v8034_v8 }
 0x34d   :  { %3979 = vmatprep.subr.bf16.mxu1 %v8035_v12  ;;  %v8040_v12 = vld [vmem:[#allocation103_spill] sm:$0xff] }
 0x350   :  { %3981 = vmatpush1.bf16.msra.mxu1 %v8036_v0 }
 0x351   :  { %3983 = vmatprep.subr.bf16.mxu1 %v8037_v63 }
 0x354   :  { %3985 = vmatpush1.bf16.msra.mxu1 %v8038_v50 }
 0x355   :  { %4115 = vmatprep.subr.bf16.mxu1 %v8005_v47 }
 0x3aa   :  { %v1405_v24 = vpop.f32.mrb[4].mxu0  ;;  %v1476_v58 = vpop.f32.mrb[22].mxu1 }
 0x3ab   :  { %v4859_v28 = vadd.f32 %v8039_v14, %v1405_v24  ;;  %v1407_v10 = vpop.f32.mrb[5].mxu0  ;;  %v1478_v32 = vpop.f32.mrb[23].mxu1  ;;  %v1477_v5 = vadd.f32 %v1476_v58, %v6557_v49 }
 0x3ac   :  { %v1479_v38 = vadd.f32 %v1478_v32, %v7978_v42  ;;  %v4861_v8 = vadd.f32 %v6551_v52, %v1407_v10 }
 0x3ad   :  { %v3115_v4 = vmul.f32 -1.442695, %v4859_v28 }
 0x3ae   :  { %v1586_v1 = vadd.f32 %v1479_v38, %v8040_v12  ;;  %v3116_v0 = vmul.f32 -1.442695, %v4861_v8 }
 0x3af   :  { %4939 = vpow2.f32 %v3115_v4 }
 0x3b0   :  { %4941 = vpow2.f32 %v3116_v0  ;;  %v3117_v28 = vmul.f32 -1.442695, %v1586_v1 }
 0x3b9   :  { %v4940_v63 = vpop.eup %4939 }
 0x3ba   :  { %v1569_v50 = vadd.f32 1.0, %v4940_v63  ;;  %v4942_v47 = vpop.eup %4941 }
 0x3bb   :  { %v1576_v30 = vadd.f32 1.0, %v4942_v47  ;;  %v8042_v47 = vld [vmem:[#allocation117_spill] sm:$0xff] }
 0x3bc   :  { %4943 = vrcp.f32 %v1569_v50 }
 0x3bd   :  { %4945 = vrcp.f32 %v1576_v30 }
 0x3c6   :  { %v4944_v24 = vpop.eup %4943 }
 0x3c7   :  { %v1579_v14 = vmul.f32 %v4944_v24, %v1477_v5  ;;  %v4946_v10 = vpop.eup %4945 }
 0x3c8   :  { %v1582_v38 = vsub.f32 1.0, %v4946_v10  ;;  %v1584_v0 = vmul.f32 %v4946_v10, %v6695_v41 }
 0x3c9   :  { %v1580_v32 = vadd.f32 %v1579_v14, %v8041_v3 }
 0x3cb   :  { %4947 = vtanh.f32 %v1580_v32  ;;  %v8043_v32 = vld [vmem:[#allocation118_spill] sm:$0xff] }
 0x3cc   :  { %4949 = vpow2.f32 %v3117_v28 }
 0x3d5   :  { %v4948_v4 = vpop.eup %4947 }
 0x3d6   :  { %v1583_v8 = vmul.f32 %v4948_v4, %v1582_v38  ;;  %v4950_v58 = vpop.eup %4949 }
 0x3d7   :  { %v1590_v5 = vadd.f32 1.0, %v4950_v58 }
 0x3d8   :  { %v6821_v63 = vadd.f32 %v1584_v0, %v1583_v8 }
 0x3d9   :  { %4951 = vrcp.f32 %v1590_v5 }
 0x3da   :  { %3119 = vst [vmem:[%s7503_s7 + $0x20] sm:$0xff] %v6821_v63 }
 0x3e3   :  { %v4952_v50 = vpop.eup %4951 }
 0x3ea   :  { %v1547_v3 = vpop.f32.mrb[24].mxu1 }
 0x3eb   :  { %v1548_v1 = vadd.f32 %v1547_v3, %v6564_v59  ;;  %v1549_v30 = vpop.f32.mrb[25].mxu1 }
 0x3ec   :  { %v1550_v14 = vadd.f32 %v1549_v30, %v6568_v40  ;;  %v8046_v30 = vld [vmem:[#allocation83_spill] sm:$0xff] }
 0x3ed   :  { %v1593_v12 = vadd.f32 %v1548_v1, %v8042_v47  ;;  %v8045_v1 = vld [vmem:[#allocation82_spill] sm:$0xff]  ;;  %v8049_v47 = vld [vmem:[#allocation84_spill] sm:$0xff] }
 0x3ee   :  { %v1600_v41 = vmul.f32 %v4952_v50, %v1550_v14  ;;  %v8047_v14 = vld [vmem:[#allocation31_spill] sm:$0xff]  ;;  %v8048_v50 = vld [vmem:[#allocation33_spill] sm:$0xff] }
 0x3ef   :  { %v3118_v24 = vmul.f32 -1.442695, %v1593_v12  ;;  %v8050_v12 = vld [vmem:[#allocation85_spill] sm:$0xff] }
 0x3f0   :  { %v1601_v28 = vadd.f32 %v1600_v41, %v8043_v32  ;;  %v8051_v41 = vld [vmem:[#allocation35_spill] sm:$0xff]  ;;  %v8053_v32 = vld [vmem:[#allocation86_spill] sm:$0xff] }
 0x3f1   :  { %4953 = vpow2.f32 %v3118_v24  ;;  %v8052_v24 = vld [vmem:[#allocation37_spill] sm:$0xff] }
 0x3fb   :  { %v4954_v10 = vpop.eup %4953 }
 0x3fc   :  { %v1597_v38 = vadd.f32 1.0, %v4954_v10  ;;  %v8055_v10 = vld [vmem:[#allocation39_spill] sm:$0xff] }
 0x3fe   :  { %4955 = vrcp.f32 %v1597_v38  ;;  %v8056_v38 = vld [vmem:[#allocation41_spill] sm:$0xff] }
 0x3ff   :  { %4957 = vtanh.f32 %v1601_v28  ;;  %v8054_v28 = vld [vmem:[#allocation87_spill] sm:$0xff] }
 0x408   :  { %v4956_v4 = vpop.eup %4955 }
 0x409   :  { %v1603_v8 = vsub.f32 1.0, %v4956_v4  ;;  %v4958_v0 = vpop.eup %4957  ;;  %v1605_v5 = vmul.f32 %v4956_v4, %v6706_v13  ;;  %v8044_v13 = vld [vmem:[#allocation29_spill] sm:$0xff]  ;;  %v8057_v4 = vld [vmem:[#allocation88_spill] sm:$0xff] }
 0x40b   :  { %v1604_v58 = vmul.f32 %v4958_v0, %v1603_v8  ;;  %v8058_v8 = vld [vmem:[#allocation89_spill] sm:$0xff]  ;;  %v8059_v0 = vld [vmem:[#allocation43_spill] sm:$0xff] }
 0x40d   :  { %v6832_v3 = vadd.f32 %v1605_v5, %v1604_v58  ;;  %v8060_v58 = vld [vmem:[#allocation45_spill] sm:$0xff]  ;;  %v8061_v5 = vld [vmem:[#allocation90_spill] sm:$0xff] }
 0x40f   :  { %3120 = vst [vmem:[%s7503_s7 + $0x58] sm:$0xff] %v6832_v3  ;;  %1683 = vmatprep.mubr.f32.mxu0 %v6832_v3  ;;  %1754 = vmatprep.mubr.f32.mxu1 %v6832_v3 }
 0x410   :  { %1684 = vmatmul.mubr.f32.vlgmr.msra.gmra.mrb[6].mxu0 %v6821_v63  ;;  %1755 = vmatmul.mubr.f32.vlgmr.msra.gmra.mrb[26].mxu1 %v6821_v63 }
 0x411   :  { %3989 = vmatpush1.bf16.msra.mxu0 %v7920_v57  ;;  %1825 = vmatprep.mubr.f32.mxu0 %v6832_v3 }
 0x412   :  { %3991 = vmatprep.subr.bf16.mxu0 %v7921_v11  ;;  %4117 = vmatpush1.bf16.msra.mxu1 %v8008_v7  ;;  %v8092_v7 = vld [vmem:[#allocation68_spill] sm:$0xff] }
 0x413   :  { %4119 = vmatprep.subr.bf16.mxu1 %v8009_v55  ;;  %v8091_v55 = vld [vmem:[#allocation66_spill] sm:$0xff] }
 0x415   :  { %3993 = vmatpush1.bf16.msra.mxu0 %v7922_v22 }
 0x416   :  { %3995 = vmatprep.subr.bf16.mxu0 %v7923_v36  ;;  %4121 = vmatpush1.bf16.msra.mxu1 %v8010_v18  ;;  %v8090_v18 = vld [vmem:[#allocation64_spill] sm:$0xff] }
 0x417   :  { %4123 = vmatprep.subr.bf16.mxu1 %v8011_v26  ;;  %v8089_v26 = vld [vmem:[#allocation62_spill] sm:$0xff] }
 0x419   :  { %3997 = vmatpush1.bf16.msra.mxu0 %v7924_v23 }
 0x41a   :  { %3999 = vmatprep.subr.bf16.mxu0 %v7925_v29  ;;  %4125 = vmatpush1.bf16.msra.mxu1 %v8012_v60  ;;  %v8088_v60 = vld [vmem:[#allocation60_spill] sm:$0xff] }
 0x41b   :  { %4127 = vmatprep.subr.bf16.mxu1 %v8013_v17  ;;  %v8087_v17 = vld [vmem:[#allocation58_spill] sm:$0xff] }
 0x41d   :  { %4001 = vmatpush1.bf16.msra.mxu0 %v7926_v54 }
 0x41e   :  { %4003 = vmatprep.subr.bf16.mxu0 %v7927_v15  ;;  %4129 = vmatpush1.bf16.msra.mxu1 %v8014_v31  ;;  %v8086_v31 = vld [vmem:[#allocation56_spill] sm:$0xff] }
 0x41f   :  { %4131 = vmatprep.subr.bf16.mxu1 %v8015_v39  ;;  %v8085_v39 = vld [vmem:[#allocation54_spill] sm:$0xff] }
 0x421   :  { %4005 = vmatpush1.bf16.msra.mxu0 %v7928_v21 }
 0x422   :  { %4007 = vmatprep.subr.bf16.mxu0 %v7929_v46  ;;  %4133 = vmatpush1.bf16.msra.mxu1 %v8016_v44  ;;  %v8084_v44 = vld [vmem:[#allocation52_spill] sm:$0xff] }
 0x423   :  { %4135 = vmatprep.subr.bf16.mxu1 %v8017_v45  ;;  %v8083_v45 = vld [vmem:[#allocation50_spill] sm:$0xff] }
 0x425   :  { %4009 = vmatpush1.bf16.msra.mxu0 %v7930_v35 }
 0x426   :  { %4011 = vmatprep.subr.bf16.mxu0 %v7931_v37  ;;  %4137 = vmatpush1.bf16.msra.mxu1 %v8018_v56  ;;  %v8082_v56 = vld [vmem:[#allocation48_spill] sm:$0xff] }
 0x427   :  { %4139 = vmatprep.subr.bf16.mxu1 %v8019_v62  ;;  %v8081_v62 = vld [vmem:[#allocation46_spill] sm:$0xff] }
 0x429   :  { %4013 = vmatpush1.bf16.msra.mxu0 %v6178_v2 }
 0x42a   :  { %4015 = vmatprep.subr.bf16.mxu0 %v6189_v6  ;;  %4141 = vmatpush1.bf16.msra.mxu1 %v8020_v9  ;;  %v8080_v9 = vld [vmem:[#allocation44_spill] sm:$0xff] }
 0x42b   :  { %4143 = vmatprep.subr.bf16.mxu1 %v8021_v16  ;;  %v8079_v16 = vld [vmem:[#allocation42_spill] sm:$0xff] }
 0x42d   :  { %4017 = vmatpush1.bf16.msra.mxu0 %v6208_v34 }
 0x42e   :  { %4019 = vmatprep.subr.bf16.mxu0 %v7932_v53  ;;  %4145 = vmatpush1.bf16.msra.mxu1 %v8022_v27  ;;  %v8078_v27 = vld [vmem:[#allocation40_spill] sm:$0xff] }
 0x42f   :  { %4147 = vmatprep.subr.bf16.mxu1 %v8023_v61  ;;  %v8076_v61 = vld [vmem:[#allocation36_spill] sm:$0xff] }
 0x431   :  { %4021 = vmatpush1.bf16.msra.mxu0 %v6227_v19 }
 0x432   :  { %4023 = vmatprep.subr.bf16.mxu0 %v6231_v25  ;;  %4149 = vmatpush1.bf16.msra.mxu1 %v8024_v33  ;;  %v8075_v33 = vld [vmem:[#allocation34_spill] sm:$0xff] }
 0x433   :  { %4151 = vmatprep.subr.bf16.mxu1 %v8025_v43  ;;  %v8072_v43 = vld [vmem:[#allocation28_spill] sm:$0xff] }
 0x435   :  { %4025 = vmatpush1.bf16.msra.mxu0 %v6248_v51 }
 0x436   :  { %4027 = vmatprep.subr.bf16.mxu0 %v6252_v48  ;;  %4153 = vmatpush1.bf16.msra.mxu1 %v8026_v20  ;;  %v8071_v20 = vld [vmem:[#allocation26_spill] sm:$0xff] }
 0x437   :  { %4155 = vmatprep.subr.bf16.mxu1 %v8044_v13  ;;  %v8068_v13 = vld [vmem:[#allocation53_spill] sm:$0xff] }
 0x439   :  { %4029 = vmatpush1.bf16.msra.mxu0 %v8045_v1 }
 0x43a   :  { %4031 = vmatprep.subr.bf16.mxu0 %v8046_v30  ;;  %4157 = vmatpush1.bf16.msra.mxu1 %v8047_v14  ;;  %v8065_v14 = vld [vmem:[#allocation92_spill] sm:$0xff] }
 0x43b   :  { %4159 = vmatprep.subr.bf16.mxu1 %v8048_v50  ;;  %v8064_v50 = vld [vmem:[#allocation49_spill] sm:$0xff] }
 0x43d   :  { %4033 = vmatpush1.bf16.msra.mxu0 %v8049_v47 }
 0x43e   :  { %4035 = vmatprep.subr.bf16.mxu0 %v8050_v12  ;;  %4161 = vmatpush1.bf16.msra.mxu1 %v8051_v41  ;;  %v8062_v41 = vld [vmem:[#allocation91_spill] sm:$0xff]  ;;  %v8100_v12 = vld [vmem:[#allocation122_spill] sm:$0xff] }
 0x43f   :  { %4163 = vmatprep.subr.bf16.mxu1 %v8052_v24  ;;  %v8063_v24 = vld [vmem:[#allocation47_spill] sm:$0xff] }
 0x441   :  { %4037 = vmatpush1.bf16.msra.mxu0 %v8053_v32 }
 0x442   :  { %4039 = vmatprep.subr.bf16.mxu0 %v8054_v28  ;;  %4165 = vmatpush1.bf16.msra.mxu1 %v8055_v10  ;;  %v8066_v10 = vld [vmem:[#allocation20_spill] sm:$0xff] }
 0x443   :  { %4167 = vmatprep.subr.bf16.mxu1 %v8056_v38  ;;  %v8067_v38 = vld [vmem:[#allocation51_spill] sm:$0xff]  ;;  %v8099_v28 = vld [vmem:[#allocation80_spill] sm:$0xff] }
 0x445   :  { %4041 = vmatpush1.bf16.msra.mxu0 %v8057_v4  ;;  %v8098_v4 = vld [vmem:[#allocation79_spill] sm:$0xff] }
 0x446   :  { %4043 = vmatprep.subr.bf16.mxu0 %v8058_v8  ;;  %4169 = vmatpush1.bf16.msra.mxu1 %v8059_v0  ;;  %v8069_v0 = vld [vmem:[#allocation22_spill] sm:$0xff] }
 0x447   :  { %4171 = vmatprep.subr.bf16.mxu1 %v8060_v58  ;;  %v8070_v58 = vld [vmem:[#allocation24_spill] sm:$0xff]  ;;  %v8097_v8 = vld [vmem:[#allocation78_spill] sm:$0xff] }
 0x449   :  { %4045 = vmatpush1.bf16.msra.mxu0 %v8061_v5  ;;  %v8096_v5 = vld [vmem:[#allocation76_spill] sm:$0xff] }
 0x44a   :  { %4047 = vmatprep.subr.bf16.mxu0 %v8062_v41  ;;  %4173 = vmatpush1.bf16.msra.mxu1 %v8063_v24  ;;  %v8073_v24 = vld [vmem:[#allocation30_spill] sm:$0xff] }
 0x44b   :  { %4175 = vmatprep.subr.bf16.mxu1 %v8064_v50  ;;  %v8074_v50 = vld [vmem:[#allocation32_spill] sm:$0xff]  ;;  %v8095_v41 = vld [vmem:[#allocation74_spill] sm:$0xff] }
 0x44d   :  { %4049 = vmatpush1.bf16.msra.mxu0 %v8065_v14  ;;  %v8094_v14 = vld [vmem:[#allocation72_spill] sm:$0xff] }
 0x44e   :  { %4051 = vmatprep.subr.bf16.mxu0 %v8066_v10  ;;  %4177 = vmatpush1.bf16.msra.mxu1 %v8067_v38  ;;  %v8077_v38 = vld [vmem:[#allocation38_spill] sm:$0xff] }
 0x44f   :  { %4179 = vmatprep.subr.bf16.mxu1 %v8068_v13  ;;  %v8093_v13 = vld [vmem:[#allocation70_spill] sm:$0xff] }
 0x450   :  { %1826 = vmatmul.mubr.f32.vlgmr.msra.gmra.mrb[34].mxu0 %v6821_v63 }
 0x451   :  { %4053 = vmatpush1.bf16.msra.mxu0 %v8069_v0 }
 0x452   :  { %4055 = vmatprep.subr.bf16.mxu0 %v8070_v58 }
 0x455   :  { %4057 = vmatpush1.bf16.msra.mxu0 %v8071_v20 }
 0x456   :  { %4059 = vmatprep.subr.bf16.mxu0 %v8072_v43 }
 0x459   :  { %4061 = vmatpush1.bf16.msra.mxu0 %v8073_v24 }
 0x45a   :  { %4063 = vmatprep.subr.bf16.mxu0 %v8074_v50 }
 0x45d   :  { %4065 = vmatpush1.bf16.msra.mxu0 %v8075_v33 }
 0x45e   :  { %4067 = vmatprep.subr.bf16.mxu0 %v8076_v61 }
 0x461   :  { %4069 = vmatpush1.bf16.msra.mxu0 %v8077_v38 }
 0x462   :  { %4071 = vmatprep.subr.bf16.mxu0 %v8078_v27 }
 0x465   :  { %4073 = vmatpush1.bf16.msra.mxu0 %v8079_v16 }
 0x466   :  { %4075 = vmatprep.subr.bf16.mxu0 %v8080_v9 }
 0x469   :  { %4077 = vmatpush1.bf16.msra.mxu0 %v8081_v62 }
 0x46a   :  { %4079 = vmatprep.subr.bf16.mxu0 %v8082_v56 }
 0x46d   :  { %4081 = vmatpush1.bf16.msra.mxu0 %v8083_v45 }
 0x46e   :  { %4083 = vmatprep.subr.bf16.mxu0 %v8084_v44 }
 0x471   :  { %4085 = vmatpush1.bf16.msra.mxu0 %v8085_v39 }
 0x472   :  { %4087 = vmatprep.subr.bf16.mxu0 %v8086_v31 }
 0x475   :  { %4089 = vmatpush1.bf16.msra.mxu0 %v8087_v17 }
 0x476   :  { %4091 = vmatprep.subr.bf16.mxu0 %v8088_v60  ;;  %v8102_v60 = vld [vmem:[#allocation98_spill] sm:$0xff] }
 0x479   :  { %4093 = vmatpush1.bf16.msra.mxu0 %v8089_v26 }
 0x47a   :  { %4095 = vmatprep.subr.bf16.mxu0 %v8090_v18 }
 0x47d   :  { %4097 = vmatpush1.bf16.msra.mxu0 %v8091_v55 }
 0x47e   :  { %4099 = vmatprep.subr.bf16.mxu0 %v8092_v7 }
 0x481   :  { %4101 = vmatpush1.bf16.msra.mxu0 %v8093_v13 }
 0x482   :  { %4103 = vmatprep.subr.bf16.mxu0 %v8094_v14 }
 0x485   :  { %4105 = vmatpush1.bf16.msra.mxu0 %v8095_v41 }
 0x486   :  { %4107 = vmatprep.subr.bf16.mxu0 %v8096_v5  ;;  %v8101_v5 = vld [vmem:[#allocation101_spill] sm:$0xff] }
 0x489   :  { %4109 = vmatpush1.bf16.msra.mxu0 %v8097_v8 }
 0x48a   :  { %4111 = vmatprep.subr.bf16.mxu0 %v8098_v4 }
 0x48d   :  { %4113 = vmatpush1.bf16.msra.mxu0 %v8099_v28 }
 0x48e   :  { %4243 = vmatprep.subr.bf16.mxu0 %v8066_v10 }
 0x4e3   :  { %v1685_v32 = vpop.f32.mrb[6].mxu0  ;;  %v1756_v55 = vpop.f32.mrb[26].mxu1 }
 0x4e4   :  { %v4863_v7 = vadd.f32 %v8100_v12, %v1685_v32  ;;  %v1687_v47 = vpop.f32.mrb[7].mxu0  ;;  %v1758_v13 = vpop.f32.mrb[27].mxu1  ;;  %v1757_v1 = vadd.f32 %v1756_v55, %v6557_v49 }
 0x4e5   :  { %v1759_v14 = vadd.f32 %v1758_v13, %v7978_v42  ;;  %v4865_v41 = vadd.f32 %v6551_v52, %v1687_v47 }
 0x4e6   :  { %v3121_v18 = vmul.f32 -1.442695, %v4863_v7 }
 0x4e7   :  { %v1866_v26 = vadd.f32 %v1759_v14, %v8101_v5  ;;  %v3122_v8 = vmul.f32 -1.442695, %v4865_v41 }
 0x4e8   :  { %4959 = vpow2.f32 %v3121_v18 }
 0x4e9   :  { %4961 = vpow2.f32 %v3122_v8  ;;  %v3123_v7 = vmul.f32 -1.442695, %v1866_v26 }
 0x4f2   :  { %v4960_v4 = vpop.eup %4959 }
 0x4f3   :  { %v1849_v28 = vadd.f32 1.0, %v4960_v4  ;;  %v4962_v10 = vpop.eup %4961 }
 0x4f4   :  { %v1856_v30 = vadd.f32 1.0, %v4962_v10  ;;  %v8103_v10 = vld [vmem:[#allocation115_spill] sm:$0xff] }
 0x4f5   :  { %4963 = vrcp.f32 %v1849_v28 }
 0x4f6   :  { %4965 = vrcp.f32 %v1856_v30 }
 0x4ff   :  { %v4964_v32 = vpop.eup %4963 }
 0x500   :  { %v1859_v12 = vmul.f32 %v4964_v32, %v1757_v1  ;;  %v4966_v47 = vpop.eup %4965 }
 0x501   :  { %v1862_v14 = vsub.f32 1.0, %v4966_v47  ;;  %v1864_v8 = vmul.f32 %v4966_v47, %v6821_v63 }
 0x502   :  { %v1860_v13 = vadd.f32 %v1859_v12, %v8102_v60 }
 0x504   :  { %4967 = vtanh.f32 %v1860_v13  ;;  %v8104_v13 = vld [vmem:[#allocation116_spill] sm:$0xff] }
 0x505   :  { %4969 = vpow2.f32 %v3123_v7 }
 0x50e   :  { %v4968_v18 = vpop.eup %4967 }
 0x50f   :  { %v1863_v41 = vmul.f32 %v4968_v18, %v1862_v14  ;;  %v4970_v55 = vpop.eup %4969 }
 0x510   :  { %v1870_v1 = vadd.f32 1.0, %v4970_v55 }
 0x511   :  { %v6947_v4 = vadd.f32 %v1864_v8, %v1863_v41 }
 0x512   :  { %4971 = vrcp.f32 %v1870_v1 }
 0x513   :  { %3125 = vst [vmem:[%s7503_s7 + $0x30] sm:$0xff] %v6947_v4 }
 0x51c   :  { %v4972_v28 = vpop.eup %4971 }
 0x523   :  { %v1827_v60 = vpop.f32.mrb[34].mxu0 }
 0x524   :  { %v1828_v26 = vadd.f32 %v1827_v60, %v6564_v59  ;;  %v1829_v30 = vpop.f32.mrb[35].mxu0 }
 0x525   :  { %v1830_v12 = vadd.f32 %v1829_v30, %v6568_v40  ;;  %v8107_v30 = vld [vmem:[#allocation83_spill] sm:$0xff] }
 0x526   :  { %v1873_v5 = vadd.f32 %v1828_v26, %v8103_v10  ;;  %v8106_v26 = vld [vmem:[#allocation82_spill] sm:$0xff]  ;;  %v8110_v10 = vld [vmem:[#allocation84_spill] sm:$0xff] }
 0x527   :  { %v1880_v63 = vmul.f32 %v4972_v28, %v1830_v12  ;;  %v8108_v12 = vld [vmem:[#allocation62_spill] sm:$0xff]  ;;  %v8109_v28 = vld [vmem:[#allocation64_spill] sm:$0xff] }
 0x528   :  { %v3124_v32 = vmul.f32 -1.442695, %v1873_v5  ;;  %v8111_v5 = vld [vmem:[#allocation85_spill] sm:$0xff] }
 0x529   :  { %v1881_v7 = vadd.f32 %v1880_v63, %v8104_v13  ;;  %v8112_v63 = vld [vmem:[#allocation66_spill] sm:$0xff] }
 0x52a   :  { %4973 = vpow2.f32 %v3124_v32  ;;  %v8113_v32 = vld [vmem:[#allocation68_spill] sm:$0xff]  ;;  %v8114_v13 = vld [vmem:[#allocation86_spill] sm:$0xff] }
 0x534   :  { %v4974_v47 = vpop.eup %4973 }
 0x535   :  { %v1877_v14 = vadd.f32 1.0, %v4974_v47  ;;  %v8116_v47 = vld [vmem:[#allocation70_spill] sm:$0xff] }
 0x537   :  { %4975 = vrcp.f32 %v1877_v14  ;;  %v8117_v14 = vld [vmem:[#allocation72_spill] sm:$0xff] }
 0x538   :  { %4977 = vtanh.f32 %v1881_v7  ;;  %v8115_v7 = vld [vmem:[#allocation87_spill] sm:$0xff] }
 0x541   :  { %v4976_v18 = vpop.eup %4975 }
 0x542   :  { %v1883_v41 = vsub.f32 1.0, %v4976_v18  ;;  %v4978_v8 = vpop.eup %4977  ;;  %v1885_v1 = vmul.f32 %v4976_v18, %v6832_v3  ;;  %v8105_v3 = vld [vmem:[#allocation60_spill] sm:$0xff] }
 0x543   :  { %v8118_v18 = vld [vmem:[#allocation88_spill] sm:$0xff] }
 0x544   :  { %v1884_v55 = vmul.f32 %v4978_v8, %v1883_v41  ;;  %v8119_v41 = vld [vmem:[#allocation89_spill] sm:$0xff]  ;;  %v8120_v8 = vld [vmem:[#allocation74_spill] sm:$0xff] }
 0x546   :  { %v6958_v60 = vadd.f32 %v1885_v1, %v1884_v55  ;;  %v8121_v55 = vld [vmem:[#allocation76_spill] sm:$0xff]  ;;  %v8122_v1 = vld [vmem:[#allocation90_spill] sm:$0xff] }
 0x548   :  { %3126 = vst [vmem:[%s7503_s7 + $0x48] sm:$0xff] %v6958_v60  ;;  %1963 = vmatprep.mubr.f32.mxu0 %v6958_v60  ;;  %2034 = vmatprep.mubr.f32.mxu1 %v6958_v60 }
 0x549   :  { %1964 = vmatmul.mubr.f32.vlgmr.msra.gmra.mrb[8].mxu0 %v6947_v4  ;;  %2035 = vmatmul.mubr.f32.vlgmr.msra.gmra.mrb[28].mxu1 %v6947_v4 }
 0x54a   :  { %4181 = vmatpush1.bf16.msra.mxu1 %v7920_v57  ;;  %2105 = vmatprep.mubr.f32.mxu1 %v6958_v60 }
 0x54b   :  { %4183 = vmatprep.subr.bf16.mxu1 %v7921_v11  ;;  %4245 = vmatpush1.bf16.msra.mxu0 %v8069_v0  ;;  %v8153_v0 = vld [vmem:[#allocation37_spill] sm:$0xff] }
 0x54c   :  { %4247 = vmatprep.subr.bf16.mxu0 %v8070_v58  ;;  %v8152_v58 = vld [vmem:[#allocation35_spill] sm:$0xff] }
 0x54e   :  { %4185 = vmatpush1.bf16.msra.mxu1 %v7922_v22 }
 0x54f   :  { %4187 = vmatprep.subr.bf16.mxu1 %v7923_v36  ;;  %4249 = vmatpush1.bf16.msra.mxu0 %v8071_v20  ;;  %v8151_v20 = vld [vmem:[#allocation33_spill] sm:$0xff] }
 0x550   :  { %4251 = vmatprep.subr.bf16.mxu0 %v8072_v43  ;;  %v8150_v43 = vld [vmem:[#allocation31_spill] sm:$0xff] }
 0x552   :  { %4189 = vmatpush1.bf16.msra.mxu1 %v7924_v23 }
 0x553   :  { %4191 = vmatprep.subr.bf16.mxu1 %v7925_v29  ;;  %4253 = vmatpush1.bf16.msra.mxu0 %v8073_v24  ;;  %v8149_v24 = vld [vmem:[#allocation29_spill] sm:$0xff] }
 0x554   :  { %4255 = vmatprep.subr.bf16.mxu0 %v8074_v50  ;;  %v8148_v50 = vld [vmem:[#allocation27_spill] sm:$0xff] }
 0x556   :  { %4193 = vmatpush1.bf16.msra.mxu1 %v7926_v54 }
 0x557   :  { %4195 = vmatprep.subr.bf16.mxu1 %v7927_v15  ;;  %4257 = vmatpush1.bf16.msra.mxu0 %v8075_v33  ;;  %v8147_v33 = vld [vmem:[#allocation25_spill] sm:$0xff] }
 0x558   :  { %4259 = vmatprep.subr.bf16.mxu0 %v8076_v61  ;;  %v8146_v61 = vld [vmem:[#allocation23_spill] sm:$0xff] }
 0x55a   :  { %4197 = vmatpush1.bf16.msra.mxu1 %v7928_v21 }
 0x55b   :  { %4199 = vmatprep.subr.bf16.mxu1 %v7929_v46  ;;  %4261 = vmatpush1.bf16.msra.mxu0 %v8077_v38  ;;  %v8145_v38 = vld [vmem:[#allocation21_spill] sm:$0xff] }
 0x55c   :  { %4263 = vmatprep.subr.bf16.mxu0 %v8078_v27  ;;  %v8144_v27 = vld [vmem:[#allocation19_spill] sm:$0xff] }
 0x55e   :  { %4201 = vmatpush1.bf16.msra.mxu1 %v7930_v35 }
 0x55f   :  { %4203 = vmatprep.subr.bf16.mxu1 %v7931_v37  ;;  %4265 = vmatpush1.bf16.msra.mxu0 %v8079_v16  ;;  %v8143_v16 = vld [vmem:[#allocation18_spill] sm:$0xff] }
 0x560   :  { %4267 = vmatprep.subr.bf16.mxu0 %v8080_v9  ;;  %v8142_v9 = vld [vmem:[#allocation17_spill] sm:$0xff] }
 0x562   :  { %4205 = vmatpush1.bf16.msra.mxu1 %v6178_v2 }
 0x563   :  { %4207 = vmatprep.subr.bf16.mxu1 %v6189_v6  ;;  %4269 = vmatpush1.bf16.msra.mxu0 %v8081_v62  ;;  %v8141_v62 = vld [vmem:[#allocation16_spill] sm:$0xff] }
 0x564   :  { %4271 = vmatprep.subr.bf16.mxu0 %v8082_v56  ;;  %v8140_v56 = vld [vmem:[#allocation15_spill] sm:$0xff] }
 0x566   :  { %4209 = vmatpush1.bf16.msra.mxu1 %v6208_v34 }
 0x567   :  { %4211 = vmatprep.subr.bf16.mxu1 %v7932_v53  ;;  %4273 = vmatpush1.bf16.msra.mxu0 %v8083_v45  ;;  %v8139_v45 = vld [vmem:[#allocation14_spill] sm:$0xff] }
 0x568   :  { %4275 = vmatprep.subr.bf16.mxu0 %v8084_v44  ;;  %v8137_v44 = vld [vmem:[#allocation12_spill] sm:$0xff] }
 0x56a   :  { %4213 = vmatpush1.bf16.msra.mxu1 %v6227_v19 }
 0x56b   :  { %4215 = vmatprep.subr.bf16.mxu1 %v6231_v25  ;;  %4277 = vmatpush1.bf16.msra.mxu0 %v8085_v39  ;;  %v8136_v39 = vld [vmem:[#allocation11_spill] sm:$0xff] }
 0x56c   :  { %4279 = vmatprep.subr.bf16.mxu0 %v8086_v31  ;;  %v8133_v31 = vld [vmem:[#allocation8_spill] sm:$0xff] }
 0x56e   :  { %4217 = vmatpush1.bf16.msra.mxu1 %v6248_v51 }
 0x56f   :  { %4219 = vmatprep.subr.bf16.mxu1 %v6252_v48  ;;  %4281 = vmatpush1.bf16.msra.mxu0 %v8087_v17  ;;  %v8132_v17 = vld [vmem:[#allocation7_spill] sm:$0xff] }
 0x570   :  { %4283 = vmatprep.subr.bf16.mxu0 %v8105_v3  ;;  %v8129_v3 = vld [vmem:[#allocation53_spill] sm:$0xff] }
 0x572   :  { %4221 = vmatpush1.bf16.msra.mxu1 %v8106_v26 }
 0x573   :  { %4223 = vmatprep.subr.bf16.mxu1 %v8107_v30  ;;  %4285 = vmatpush1.bf16.msra.mxu0 %v8108_v12  ;;  %v8126_v12 = vld [vmem:[#allocation92_spill] sm:$0xff] }
 0x574   :  { %4287 = vmatprep.subr.bf16.mxu0 %v8109_v28  ;;  %v8125_v28 = vld [vmem:[#allocation79_spill] sm:$0xff] }
 0x576   :  { %4225 = vmatpush1.bf16.msra.mxu1 %v8110_v10 }
 0x577   :  { %4227 = vmatprep.subr.bf16.mxu1 %v8111_v5  ;;  %4289 = vmatpush1.bf16.msra.mxu0 %v8112_v63  ;;  %v8123_v63 = vld [vmem:[#allocation91_spill] sm:$0xff]  ;;  %v8161_v5 = vld [vmem:[#allocation122_spill] sm:$0xff] }
 0x578   :  { %4291 = vmatprep.subr.bf16.mxu0 %v8113_v32  ;;  %v8124_v32 = vld [vmem:[#allocation78_spill] sm:$0xff] }
 0x57a   :  { %4229 = vmatpush1.bf16.msra.mxu1 %v8114_v13 }
 0x57b   :  { %4231 = vmatprep.subr.bf16.mxu1 %v8115_v7  ;;  %4293 = vmatpush1.bf16.msra.mxu0 %v8116_v47  ;;  %v8127_v47 = vld [vmem:[#allocation4_spill] sm:$0xff]  ;;  %v8160_v7 = vld [vmem:[#allocation51_spill] sm:$0xff] }
 0x57c   :  { %4295 = vmatprep.subr.bf16.mxu0 %v8117_v14  ;;  %v8128_v14 = vld [vmem:[#allocation80_spill] sm:$0xff] }
 0x57e   :  { %4233 = vmatpush1.bf16.msra.mxu1 %v8118_v18  ;;  %v8159_v18 = vld [vmem:[#allocation49_spill] sm:$0xff] }
 0x57f   :  { %4235 = vmatprep.subr.bf16.mxu1 %v8119_v41  ;;  %4297 = vmatpush1.bf16.msra.mxu0 %v8120_v8  ;;  %v8130_v8 = vld [vmem:[#allocation5_spill] sm:$0xff]  ;;  %v8158_v41 = vld [vmem:[#allocation47_spill] sm:$0xff] }
 0x580   :  { %4299 = vmatprep.subr.bf16.mxu0 %v8121_v55  ;;  %v8131_v55 = vld [vmem:[#allocation6_spill] sm:$0xff] }
 0x582   :  { %4237 = vmatpush1.bf16.msra.mxu1 %v8122_v1  ;;  %v8157_v1 = vld [vmem:[#allocation45_spill] sm:$0xff] }
 0x583   :  { %4239 = vmatprep.subr.bf16.mxu1 %v8123_v63  ;;  %4301 = vmatpush1.bf16.msra.mxu0 %v8124_v32  ;;  %v8134_v32 = vld [vmem:[#allocation9_spill] sm:$0xff]  ;;  %v8156_v63 = vld [vmem:[#allocation43_spill] sm:$0xff] }
 0x584   :  { %4303 = vmatprep.subr.bf16.mxu0 %v8125_v28  ;;  %v8135_v28 = vld [vmem:[#allocation10_spill] sm:$0xff] }
 0x586   :  { %4241 = vmatpush1.bf16.msra.mxu1 %v8126_v12  ;;  %v8155_v12 = vld [vmem:[#allocation41_spill] sm:$0xff] }
 0x587   :  { %4307 = vmatprep.subr.bf16.mxu1 %v8127_v47  ;;  %4305 = vmatpush1.bf16.msra.mxu0 %v8128_v14  ;;  %v8138_v14 = vld [vmem:[#allocation13_spill] sm:$0xff] }
 0x588   :  { %4371 = vmatprep.subr.bf16.mxu0 %v8129_v3  ;;  %v8154_v3 = vld [vmem:[#allocation39_spill] sm:$0xff] }
 0x589   :  { %2106 = vmatmul.mubr.f32.vlgmr.msra.gmra.mrb[30].mxu1 %v6947_v4 }
 0x58a   :  { %4309 = vmatpush1.bf16.msra.mxu1 %v8130_v8 }
 0x58b   :  { %4311 = vmatprep.subr.bf16.mxu1 %v8131_v55 }
 0x58e   :  { %4313 = vmatpush1.bf16.msra.mxu1 %v8132_v17 }
 0x58f   :  { %4315 = vmatprep.subr.bf16.mxu1 %v8133_v31 }
 0x592   :  { %4317 = vmatpush1.bf16.msra.mxu1 %v8134_v32 }
 0x593   :  { %4319 = vmatprep.subr.bf16.mxu1 %v8135_v28 }
 0x596   :  { %4321 = vmatpush1.bf16.msra.mxu1 %v8136_v39 }
 0x597   :  { %4323 = vmatprep.subr.bf16.mxu1 %v8137_v44 }
 0x59a   :  { %4325 = vmatpush1.bf16.msra.mxu1 %v8138_v14 }
 0x59b   :  { %4327 = vmatprep.subr.bf16.mxu1 %v8139_v45 }
 0x59e   :  { %4329 = vmatpush1.bf16.msra.mxu1 %v8140_v56 }
 0x59f   :  { %4331 = vmatprep.subr.bf16.mxu1 %v8141_v62 }
 0x5a2   :  { %4333 = vmatpush1.bf16.msra.mxu1 %v8142_v9 }
 0x5a3   :  { %4335 = vmatprep.subr.bf16.mxu1 %v8143_v16 }
 0x5a6   :  { %4337 = vmatpush1.bf16.msra.mxu1 %v8144_v27 }
 0x5a7   :  { %4339 = vmatprep.subr.bf16.mxu1 %v8145_v38 }
 0x5aa   :  { %4341 = vmatpush1.bf16.msra.mxu1 %v8146_v61 }
 0x5ab   :  { %4343 = vmatprep.subr.bf16.mxu1 %v8147_v33 }
 0x5ae   :  { %4345 = vmatpush1.bf16.msra.mxu1 %v8148_v50 }
 0x5af   :  { %4347 = vmatprep.subr.bf16.mxu1 %v8149_v24  ;;  %v8163_v24 = vld [vmem:[#allocation100_spill] sm:$0xff] }
 0x5b2   :  { %4349 = vmatpush1.bf16.msra.mxu1 %v8150_v43 }
 0x5b3   :  { %4351 = vmatprep.subr.bf16.mxu1 %v8151_v20 }
 0x5b6   :  { %4353 = vmatpush1.bf16.msra.mxu1 %v8152_v58 }
 0x5b7   :  { %4355 = vmatprep.subr.bf16.mxu1 %v8153_v0 }
 0x5ba   :  { %4357 = vmatpush1.bf16.msra.mxu1 %v8154_v3 }
 0x5bb   :  { %4359 = vmatprep.subr.bf16.mxu1 %v8155_v12 }
 0x5be   :  { %4361 = vmatpush1.bf16.msra.mxu1 %v8156_v63 }
 0x5bf   :  { %4363 = vmatprep.subr.bf16.mxu1 %v8157_v1  ;;  %v8162_v1 = vld [vmem:[#allocation99_spill] sm:$0xff] }
 0x5c2   :  { %4365 = vmatpush1.bf16.msra.mxu1 %v8158_v41 }
 0x5c3   :  { %4367 = vmatprep.subr.bf16.mxu1 %v8159_v18 }
 0x5c6   :  { %4369 = vmatpush1.bf16.msra.mxu1 %v8160_v7 }
 0x5c7   :  { %4499 = vmatprep.subr.bf16.mxu1 %v8127_v47 }
 0x61c   :  { %v1965_v13 = vpop.f32.mrb[8].mxu0  ;;  %v2036_v58 = vpop.f32.mrb[28].mxu1 }
 0x61d   :  { %v4867_v0 = vadd.f32 %v8161_v5, %v1965_v13  ;;  %v1967_v10 = vpop.f32.mrb[9].mxu0  ;;  %v2038_v3 = vpop.f32.mrb[29].mxu1  ;;  %v2037_v26 = vadd.f32 %v2036_v58, %v6557_v49 }
 0x61e   :  { %v2039_v12 = vadd.f32 %v2038_v3, %v7978_v42  ;;  %v4869_v63 = vadd.f32 %v6551_v52, %v1967_v10 }
 0x61f   :  { %v3127_v20 = vmul.f32 -1.442695, %v4867_v0 }
 0x620   :  { %v2140_v43 = vadd.f32 %v2039_v12, %v8162_v1  ;;  %v3128_v41 = vmul.f32 -1.442695, %v4869_v63 }
 0x621   :  { %4979 = vpow2.f32 %v3127_v20 }
 0x622   :  { %4981 = vpow2.f32 %v3128_v41  ;;  %v3129_v0 = vmul.f32 -1.442695, %v2140_v43 }
 0x62b   :  { %v4980_v18 = vpop.eup %4979 }
 0x62c   :  { %v2123_v7 = vadd.f32 1.0, %v4980_v18  ;;  %v4982_v47 = vpop.eup %4981 }
 0x62d   :  { %v2130_v30 = vadd.f32 1.0, %v4982_v47  ;;  %v8164_v47 = vld [vmem:[#allocation113_spill] sm:$0xff] }
 0x62e   :  { %4983 = vrcp.f32 %v2123_v7 }
 0x62f   :  { %4985 = vrcp.f32 %v2130_v30 }
 0x638   :  { %v4984_v13 = vpop.eup %4983 }
 0x639   :  { %v2133_v5 = vmul.f32 %v4984_v13, %v2037_v26  ;;  %v4986_v10 = vpop.eup %4985 }
 0x63a   :  { %v2136_v12 = vsub.f32 1.0, %v4986_v10  ;;  %v2138_v41 = vmul.f32 %v4986_v10, %v6947_v4 }
 0x63b   :  { %v2134_v3 = vadd.f32 %v2133_v5, %v8163_v24 }
 0x63d   :  { %4987 = vtanh.f32 %v2134_v3  ;;  %v8165_v3 = vld [vmem:[#allocation114_spill] sm:$0xff] }
 0x63e   :  { %4989 = vpow2.f32 %v3129_v0 }
 0x647   :  { %v4988_v20 = vpop.eup %4987 }
 0x648   :  { %v2137_v63 = vmul.f32 %v4988_v20, %v2136_v12  ;;  %v4990_v58 = vpop.eup %4989 }
 0x649   :  { %v2144_v26 = vadd.f32 1.0, %v4990_v58 }
 0x64a   :  { %v7073_v18 = vadd.f32 %v2138_v41, %v2137_v63 }
 0x64b   :  { %4991 = vrcp.f32 %v2144_v26 }
 0x64c   :  { %3131 = vst [vmem:[%s7503_s7 + $0x40] sm:$0xff] %v7073_v18 }
 0x655   :  { %v4992_v7 = vpop.eup %4991 }
 0x65c   :  { %v2107_v24 = vpop.f32.mrb[30].mxu1 }
 0x65d   :  { %v2108_v43 = vadd.f32 %v2107_v24, %v6564_v59  ;;  %v2109_v30 = vpop.f32.mrb[31].mxu1 }
 0x65e   :  { %v2110_v5 = vadd.f32 %v2109_v30, %v6568_v40  ;;  %v8168_v30 = vld [vmem:[#allocation83_spill] sm:$0xff] }
 0x65f   :  { %v2147_v1 = vadd.f32 %v2108_v43, %v8164_v47  ;;  %v8167_v43 = vld [vmem:[#allocation82_spill] sm:$0xff]  ;;  %v8171_v47 = vld [vmem:[#allocation84_spill] sm:$0xff] }
 0x660   :  { %v2154_v4 = vmul.f32 %v4992_v7, %v2110_v5  ;;  %v8169_v5 = vld [vmem:[#allocation31_spill] sm:$0xff]  ;;  %v8170_v7 = vld [vmem:[#allocation33_spill] sm:$0xff] }
 0x661   :  { %v3130_v13 = vmul.f32 -1.442695, %v2147_v1  ;;  %v8172_v1 = vld [vmem:[#allocation85_spill] sm:$0xff] }
 0x662   :  { %v2155_v0 = vadd.f32 %v2154_v4, %v8165_v3  ;;  %v8173_v4 = vld [vmem:[#allocation35_spill] sm:$0xff]  ;;  %v8175_v3 = vld [vmem:[#allocation86_spill] sm:$0xff] }
 0x663   :  { %4993 = vpow2.f32 %v3130_v13  ;;  %v8174_v13 = vld [vmem:[#allocation37_spill] sm:$0xff] }
 0x66d   :  { %v4994_v10 = vpop.eup %4993 }
 0x66e   :  { %v2151_v12 = vadd.f32 1.0, %v4994_v10  ;;  %v8177_v10 = vld [vmem:[#allocation39_spill] sm:$0xff] }
 0x670   :  { %4995 = vrcp.f32 %v2151_v12  ;;  %v8178_v12 = vld [vmem:[#allocation41_spill] sm:$0xff] }
 0x671   :  { %4997 = vtanh.f32 %v2155_v0  ;;  %v8176_v0 = vld [vmem:[#allocation87_spill] sm:$0xff] }
 0x67a   :  { %v4996_v20 = vpop.eup %4995 }
 0x67b   :  { %v2157_v63 = vsub.f32 1.0, %v4996_v20  ;;  %v4998_v41 = vpop.eup %4997  ;;  %v2159_v26 = vmul.f32 %v4996_v20, %v6958_v60  ;;  %v8166_v60 = vld [vmem:[#allocation29_spill] sm:$0xff]  ;;  %v8179_v20 = vld [vmem:[#allocation88_spill] sm:$0xff] }
 0x67d   :  { %v2158_v58 = vmul.f32 %v4998_v41, %v2157_v63  ;;  %v8180_v63 = vld [vmem:[#allocation89_spill] sm:$0xff]  ;;  %v8181_v41 = vld [vmem:[#allocation43_spill] sm:$0xff] }
 0x67f   :  { %v7084_v24 = vadd.f32 %v2159_v26, %v2158_v58  ;;  %v8182_v58 = vld [vmem:[#allocation45_spill] sm:$0xff]  ;;  %v8183_v26 = vld [vmem:[#allocation90_spill] sm:$0xff] }
 0x681   :  { %3132 = vst [vmem:[%s7503_s7 + $0x38] sm:$0xff] %v7084_v24  ;;  %2231 = vmatprep.mubr.f32.mxu0 %v7084_v24  ;;  %2302 = vmatprep.mubr.f32.mxu1 %v7084_v24 }
 0x682   :  { %2232 = vmatmul.mubr.f32.vlgmr.msra.gmra.mrb[10].mxu0 %v7073_v18  ;;  %2303 = vmatmul.mubr.f32.vlgmr.msra.gmra.mrb[32].mxu1 %v7073_v18 }
 0x683   :  { %4373 = vmatpush1.bf16.msra.mxu0 %v7920_v57  ;;  %2373 = vmatprep.mubr.f32.mxu0 %v7084_v24 }
 0x684   :  { %4375 = vmatprep.subr.bf16.mxu0 %v7921_v11  ;;  %4501 = vmatpush1.bf16.msra.mxu1 %v8130_v8  ;;  %v8214_v8 = vld [vmem:[#allocation68_spill] sm:$0xff] }
 0x685   :  { %4503 = vmatprep.subr.bf16.mxu1 %v8131_v55  ;;  %v8213_v55 = vld [vmem:[#allocation66_spill] sm:$0xff] }
 0x687   :  { %4377 = vmatpush1.bf16.msra.mxu0 %v7922_v22 }
 0x688   :  { %4379 = vmatprep.subr.bf16.mxu0 %v7923_v36  ;;  %4505 = vmatpush1.bf16.msra.mxu1 %v8132_v17  ;;  %v8212_v17 = vld [vmem:[#allocation64_spill] sm:$0xff] }
 0x689   :  { %4507 = vmatprep.subr.bf16.mxu1 %v8133_v31  ;;  %v8211_v31 = vld [vmem:[#allocation62_spill] sm:$0xff] }
 0x68b   :  { %4381 = vmatpush1.bf16.msra.mxu0 %v7924_v23 }
 0x68c   :  { %4383 = vmatprep.subr.bf16.mxu0 %v7925_v29  ;;  %4509 = vmatpush1.bf16.msra.mxu1 %v8134_v32  ;;  %v8210_v32 = vld [vmem:[#allocation60_spill] sm:$0xff] }
 0x68d   :  { %4511 = vmatprep.subr.bf16.mxu1 %v8135_v28  ;;  %v8209_v28 = vld [vmem:[#allocation58_spill] sm:$0xff] }
 0x68f   :  { %4385 = vmatpush1.bf16.msra.mxu0 %v7926_v54 }
 0x690   :  { %4387 = vmatprep.subr.bf16.mxu0 %v7927_v15  ;;  %4513 = vmatpush1.bf16.msra.mxu1 %v8136_v39  ;;  %v8208_v39 = vld [vmem:[#allocation56_spill] sm:$0xff] }
 0x691   :  { %4515 = vmatprep.subr.bf16.mxu1 %v8137_v44  ;;  %v8207_v44 = vld [vmem:[#allocation54_spill] sm:$0xff] }
 0x693   :  { %4389 = vmatpush1.bf16.msra.mxu0 %v7928_v21 }
 0x694   :  { %4391 = vmatprep.subr.bf16.mxu0 %v7929_v46  ;;  %4517 = vmatpush1.bf16.msra.mxu1 %v8138_v14  ;;  %v8206_v14 = vld [vmem:[#allocation52_spill] sm:$0xff] }
 0x695   :  { %4519 = vmatprep.subr.bf16.mxu1 %v8139_v45  ;;  %v8205_v45 = vld [vmem:[#allocation50_spill] sm:$0xff] }
 0x697   :  { %4393 = vmatpush1.bf16.msra.mxu0 %v7930_v35 }
 0x698   :  { %4395 = vmatprep.subr.bf16.mxu0 %v7931_v37  ;;  %4521 = vmatpush1.bf16.msra.mxu1 %v8140_v56  ;;  %v8204_v56 = vld [vmem:[#allocation48_spill] sm:$0xff] }
 0x699   :  { %4523 = vmatprep.subr.bf16.mxu1 %v8141_v62  ;;  %v8203_v62 = vld [vmem:[#allocation46_spill] sm:$0xff] }
 0x69b   :  { %4397 = vmatpush1.bf16.msra.mxu0 %v6178_v2 }
 0x69c   :  { %4399 = vmatprep.subr.bf16.mxu0 %v6189_v6  ;;  %4525 = vmatpush1.bf16.msra.mxu1 %v8142_v9  ;;  %v8202_v9 = vld [vmem:[#allocation44_spill] sm:$0xff] }
 0x69d   :  { %4527 = vmatprep.subr.bf16.mxu1 %v8143_v16  ;;  %v8201_v16 = vld [vmem:[#allocation42_spill] sm:$0xff] }
 0x69f   :  { %4401 = vmatpush1.bf16.msra.mxu0 %v6208_v34 }
 0x6a0   :  { %4403 = vmatprep.subr.bf16.mxu0 %v7932_v53  ;;  %4529 = vmatpush1.bf16.msra.mxu1 %v8144_v27  ;;  %v8200_v27 = vld [vmem:[#allocation40_spill] sm:$0xff] }
 0x6a1   :  { %4531 = vmatprep.subr.bf16.mxu1 %v8145_v38  ;;  %v8198_v38 = vld [vmem:[#allocation36_spill] sm:$0xff] }
 0x6a3   :  { %4405 = vmatpush1.bf16.msra.mxu0 %v6227_v19 }
 0x6a4   :  { %4407 = vmatprep.subr.bf16.mxu0 %v6231_v25  ;;  %4533 = vmatpush1.bf16.msra.mxu1 %v8146_v61  ;;  %v8197_v61 = vld [vmem:[#allocation34_spill] sm:$0xff] }
 0x6a5   :  { %4535 = vmatprep.subr.bf16.mxu1 %v8147_v33  ;;  %v8194_v33 = vld [vmem:[#allocation28_spill] sm:$0xff] }
 0x6a7   :  { %4409 = vmatpush1.bf16.msra.mxu0 %v6248_v51 }
 0x6a8   :  { %4411 = vmatprep.subr.bf16.mxu0 %v6252_v48  ;;  %4537 = vmatpush1.bf16.msra.mxu1 %v8148_v50  ;;  %v8193_v50 = vld [vmem:[#allocation26_spill] sm:$0xff] }
 0x6a9   :  { %4539 = vmatprep.subr.bf16.mxu1 %v8166_v60  ;;  %v8190_v60 = vld [vmem:[#allocation53_spill] sm:$0xff] }
 0x6ab   :  { %4413 = vmatpush1.bf16.msra.mxu0 %v8167_v43 }
 0x6ac   :  { %4415 = vmatprep.subr.bf16.mxu0 %v8168_v30  ;;  %4541 = vmatpush1.bf16.msra.mxu1 %v8169_v5  ;;  %v8187_v5 = vld [vmem:[#allocation92_spill] sm:$0xff] }
 0x6ad   :  { %4543 = vmatprep.subr.bf16.mxu1 %v8170_v7  ;;  %v8186_v7 = vld [vmem:[#allocation49_spill] sm:$0xff] }
 0x6af   :  { %4417 = vmatpush1.bf16.msra.mxu0 %v8171_v47 }
 0x6b0   :  { %4419 = vmatprep.subr.bf16.mxu0 %v8172_v1  ;;  %4545 = vmatpush1.bf16.msra.mxu1 %v8173_v4  ;;  %v8184_v4 = vld [vmem:[#allocation91_spill] sm:$0xff]  ;;  %v8222_v1 = vld [vmem:[#allocation122_spill] sm:$0xff] }
 0x6b1   :  { %4547 = vmatprep.subr.bf16.mxu1 %v8174_v13  ;;  %v8185_v13 = vld [vmem:[#allocation47_spill] sm:$0xff] }
 0x6b3   :  { %4421 = vmatpush1.bf16.msra.mxu0 %v8175_v3 }
 0x6b4   :  { %4423 = vmatprep.subr.bf16.mxu0 %v8176_v0  ;;  %4549 = vmatpush1.bf16.msra.mxu1 %v8177_v10  ;;  %v8188_v10 = vld [vmem:[#allocation20_spill] sm:$0xff] }
 0x6b5   :  { %4551 = vmatprep.subr.bf16.mxu1 %v8178_v12  ;;  %v8189_v12 = vld [vmem:[#allocation51_spill] sm:$0xff]  ;;  %v8221_v0 = vld [vmem:[#allocation80_spill] sm:$0xff] }
 0x6b7   :  { %4425 = vmatpush1.bf16.msra.mxu0 %v8179_v20  ;;  %v8220_v20 = vld [vmem:[#allocation79_spill] sm:$0xff] }
 0x6b8   :  { %4427 = vmatprep.subr.bf16.mxu0 %v8180_v63  ;;  %4553 = vmatpush1.bf16.msra.mxu1 %v8181_v41  ;;  %v8191_v41 = vld [vmem:[#allocation22_spill] sm:$0xff] }
 0x6b9   :  { %4555 = vmatprep.subr.bf16.mxu1 %v8182_v58  ;;  %v8192_v58 = vld [vmem:[#allocation24_spill] sm:$0xff]  ;;  %v8219_v63 = vld [vmem:[#allocation78_spill] sm:$0xff] }
 0x6bb   :  { %4429 = vmatpush1.bf16.msra.mxu0 %v8183_v26  ;;  %v8218_v26 = vld [vmem:[#allocation76_spill] sm:$0xff] }
 0x6bc   :  { %4431 = vmatprep.subr.bf16.mxu0 %v8184_v4  ;;  %4557 = vmatpush1.bf16.msra.mxu1 %v8185_v13  ;;  %v8195_v13 = vld [vmem:[#allocation30_spill] sm:$0xff] }
 0x6bd   :  { %4559 = vmatprep.subr.bf16.mxu1 %v8186_v7  ;;  %v8196_v7 = vld [vmem:[#allocation32_spill] sm:$0xff]  ;;  %v8217_v4 = vld [vmem:[#allocation74_spill] sm:$0xff] }
 0x6bf   :  { %4433 = vmatpush1.bf16.msra.mxu0 %v8187_v5  ;;  %v8216_v5 = vld [vmem:[#allocation72_spill] sm:$0xff] }
 0x6c0   :  { %4435 = vmatprep.subr.bf16.mxu0 %v8188_v10  ;;  %4561 = vmatpush1.bf16.msra.mxu1 %v8189_v12  ;;  %v8199_v12 = vld [vmem:[#allocation38_spill] sm:$0xff] }
 0x6c1   :  { %4563 = vmatprep.subr.bf16.mxu1 %v8190_v60  ;;  %v8215_v60 = vld [vmem:[#allocation70_spill] sm:$0xff] }
 0x6c2   :  { %2374 = vmatmul.mubr.f32.vlgmr.msra.gmra.mrb[36].mxu0 %v7073_v18 }
 0x6c3   :  { %4437 = vmatpush1.bf16.msra.mxu0 %v8191_v41 }
 0x6c4   :  { %4439 = vmatprep.subr.bf16.mxu0 %v8192_v58 }
 0x6c7   :  { %4441 = vmatpush1.bf16.msra.mxu0 %v8193_v50 }
 0x6c8   :  { %4443 = vmatprep.subr.bf16.mxu0 %v8194_v33 }
 0x6cb   :  { %4445 = vmatpush1.bf16.msra.mxu0 %v8195_v13 }
 0x6cc   :  { %4447 = vmatprep.subr.bf16.mxu0 %v8196_v7 }
 0x6cf   :  { %4449 = vmatpush1.bf16.msra.mxu0 %v8197_v61 }
 0x6d0   :  { %4451 = vmatprep.subr.bf16.mxu0 %v8198_v38 }
 0x6d3   :  { %4453 = vmatpush1.bf16.msra.mxu0 %v8199_v12 }
 0x6d4   :  { %4455 = vmatprep.subr.bf16.mxu0 %v8200_v27 }
 0x6d7   :  { %4457 = vmatpush1.bf16.msra.mxu0 %v8201_v16 }
 0x6d8   :  { %4459 = vmatprep.subr.bf16.mxu0 %v8202_v9 }
 0x6db   :  { %4461 = vmatpush1.bf16.msra.mxu0 %v8203_v62 }
 0x6dc   :  { %4463 = vmatprep.subr.bf16.mxu0 %v8204_v56 }
 0x6df   :  { %4465 = vmatpush1.bf16.msra.mxu0 %v8205_v45 }
 0x6e0   :  { %4467 = vmatprep.subr.bf16.mxu0 %v8206_v14 }
 0x6e3   :  { %4469 = vmatpush1.bf16.msra.mxu0 %v8207_v44 }
 0x6e4   :  { %4471 = vmatprep.subr.bf16.mxu0 %v8208_v39 }
 0x6e7   :  { %4473 = vmatpush1.bf16.msra.mxu0 %v8209_v28 }
 0x6e8   :  { %4475 = vmatprep.subr.bf16.mxu0 %v8210_v32  ;;  %v8224_v32 = vld [vmem:[#allocation102_spill] sm:$0xff] }
 0x6eb   :  { %4477 = vmatpush1.bf16.msra.mxu0 %v8211_v31 }
 0x6ec   :  { %4479 = vmatprep.subr.bf16.mxu0 %v8212_v17 }
 0x6ef   :  { %4481 = vmatpush1.bf16.msra.mxu0 %v8213_v55 }
 0x6f0   :  { %4483 = vmatprep.subr.bf16.mxu0 %v8214_v8 }
 0x6f3   :  { %4485 = vmatpush1.bf16.msra.mxu0 %v8215_v60 }
 0x6f4   :  { %4487 = vmatprep.subr.bf16.mxu0 %v8216_v5 }
 0x6f7   :  { %4489 = vmatpush1.bf16.msra.mxu0 %v8217_v4 }
 0x6f8   :  { %4491 = vmatprep.subr.bf16.mxu0 %v8218_v26  ;;  %v8223_v26 = vld [vmem:[#allocation97_spill] sm:$0xff] }
 0x6fb   :  { %4493 = vmatpush1.bf16.msra.mxu0 %v8219_v63 }
 0x6fc   :  { %4495 = vmatprep.subr.bf16.mxu0 %v8220_v20 }
 0x6ff   :  { %4497 = vmatpush1.bf16.msra.mxu0 %v8221_v0 }
 0x700   :  { %4627 = vmatprep.subr.bf16.mxu0 %v8188_v10 }
 0x755   :  { %v2233_v3 = vpop.f32.mrb[10].mxu0  ;;  %v2304_v55 = vpop.f32.mrb[32].mxu1 }
 0x756   :  { %v4871_v8 = vadd.f32 %v8222_v1, %v2233_v3  ;;  %v2235_v47 = vpop.f32.mrb[11].mxu0  ;;  %v2306_v60 = vpop.f32.mrb[33].mxu1  ;;  %v2305_v43 = vadd.f32 %v2304_v55, %v6557_v49 }
 0x757   :  { %v2307_v5 = vadd.f32 %v2306_v60, %v7978_v42  ;;  %v4873_v4 = vadd.f32 %v6551_v52, %v2235_v47 }
 0x758   :  { %v3133_v17 = vmul.f32 -1.442695, %v4871_v8 }
 0x759   :  { %v2408_v31 = vadd.f32 %v2307_v5, %v8223_v26  ;;  %v3134_v63 = vmul.f32 -1.442695, %v4873_v4  ;;  %v8225_v26 = vld [vmem:[#allocation111_spill] sm:$0xff] }
 0x75a   :  { %4999 = vpow2.f32 %v3133_v17 }
 0x75b   :  { %5001 = vpow2.f32 %v3134_v63  ;;  %v3135_v8 = vmul.f32 -1.442695, %v2408_v31 }
 0x764   :  { %v5000_v20 = vpop.eup %4999 }
 0x765   :  { %v2391_v0 = vadd.f32 1.0, %v5000_v20  ;;  %v5002_v10 = vpop.eup %5001 }
 0x766   :  { %v2398_v30 = vadd.f32 1.0, %v5002_v10 }
 0x767   :  { %5003 = vrcp.f32 %v2391_v0 }
 0x768   :  { %5005 = vrcp.f32 %v2398_v30 }
 0x771   :  { %v5004_v3 = vpop.eup %5003 }
 0x772   :  { %v2401_v1 = vmul.f32 %v5004_v3, %v2305_v43  ;;  %v5006_v47 = vpop.eup %5005 }
 0x773   :  { %v2404_v5 = vsub.f32 1.0, %v5006_v47  ;;  %v2406_v63 = vmul.f32 %v5006_v47, %v7073_v18 }
 0x774   :  { %v2402_v60 = vadd.f32 %v2401_v1, %v8224_v32 }
 0x776   :  { %5007 = vtanh.f32 %v2402_v60  ;;  %v8226_v60 = vld [vmem:[#allocation112_spill] sm:$0xff] }
 0x777   :  { %5009 = vpow2.f32 %v3135_v8 }
 0x780   :  { %v5008_v17 = vpop.eup %5007 }
 0x781   :  { %v2405_v4 = vmul.f32 %v5008_v17, %v2404_v5  ;;  %v5010_v55 = vpop.eup %5009 }
 0x782   :  { %v2412_v43 = vadd.f32 1.0, %v5010_v55 }
 0x783   :  { %v7199_v20 = vadd.f32 %v2406_v63, %v2405_v4 }
 0x784   :  { %5011 = vrcp.f32 %v2412_v43 }
 0x785   :  { %3137 = vst [vmem:[%s7503_s7 + $0x50] sm:$0xff] %v7199_v20 }
 0x78e   :  { %v5012_v0 = vpop.eup %5011 }
 0x795   :  { %v2375_v32 = vpop.f32.mrb[36].mxu0 }
 0x796   :  { %v2376_v31 = vadd.f32 %v2375_v32, %v6564_v59  ;;  %v2377_v30 = vpop.f32.mrb[37].mxu0 }
 0x797   :  { %v2378_v1 = vadd.f32 %v2377_v30, %v6568_v40  ;;  %v8248_v30 = vld [vmem:[#allocation92_spill] sm:$0xff] }
 0x798   :  { %v2415_v10 = vadd.f32 %v2376_v31, %v8225_v26  ;;  %v8247_v31 = vld [vmem:[#allocation79_spill] sm:$0xff]  ;;  %v8251_v26 = vld [vmem:[#allocation53_spill] sm:$0xff] }
 0x799   :  { %v2422_v18 = vmul.f32 %v5012_v0, %v2378_v1  ;;  %v8249_v1 = vld [vmem:[#allocation4_spill] sm:$0xff] }
 0x79a   :  { %v3136_v3 = vmul.f32 -1.442695, %v2415_v10  ;;  %v8250_v0 = vld [vmem:[#allocation80_spill] sm:$0xff]  ;;  %v8252_v10 = vld [vmem:[#allocation5_spill] sm:$0xff] }
 0x79b   :  { %v2423_v8 = vadd.f32 %v2422_v18, %v8226_v60  ;;  %v8253_v18 = vld [vmem:[#allocation6_spill] sm:$0xff]  ;;  %v8255_v60 = vld [vmem:[#allocation8_spill] sm:$0xff] }
 0x79c   :  { %5013 = vpow2.f32 %v3136_v3  ;;  %v8254_v3 = vld [vmem:[#allocation7_spill] sm:$0xff] }
 0x7a6   :  { %v5014_v47 = vpop.eup %5013 }
 0x7a7   :  { %v2419_v5 = vadd.f32 1.0, %v5014_v47  ;;  %v8257_v47 = vld [vmem:[#allocation10_spill] sm:$0xff] }
 0x7a9   :  { %5015 = vrcp.f32 %v2419_v5  ;;  %v8258_v5 = vld [vmem:[#allocation11_spill] sm:$0xff] }
 0x7aa   :  { %5017 = vtanh.f32 %v2423_v8  ;;  %v8256_v8 = vld [vmem:[#allocation9_spill] sm:$0xff] }
 0x7b3   :  { %v5016_v17 = vpop.eup %5015 }
 0x7b4   :  { %v2425_v4 = vsub.f32 1.0, %v5016_v17  ;;  %v5018_v63 = vpop.eup %5017  ;;  %v2427_v43 = vmul.f32 %v5016_v17, %v7084_v24  ;;  %v8241_v24 = vld [vmem:[#allocation89_spill] sm:$0xff]  ;;  %v8259_v17 = vld [vmem:[#allocation12_spill] sm:$0xff] }
 0x7b6   :  { %v2426_v55 = vmul.f32 %v5018_v63, %v2425_v4  ;;  %v8260_v4 = vld [vmem:[#allocation13_spill] sm:$0xff]  ;;  %v8261_v63 = vld [vmem:[#allocation14_spill] sm:$0xff] }
 0x7b8   :  { %v7210_v32 = vadd.f32 %v2427_v43, %v2426_v55  ;;  %v8262_v55 = vld [vmem:[#allocation15_spill] sm:$0xff]  ;;  %v8263_v43 = vld [vmem:[#allocation16_spill] sm:$0xff] }
 0x7ba   :  { %3138 = vst [vmem:[%s7503_s7 + $0x28] sm:$0xff] %v7210_v32  ;;  %2499 = vmatprep.mubr.f32.mxu0 %v7210_v32  ;;  %2570 = vmatprep.mubr.f32.mxu1 %v7210_v32 }
 0x7bb   :  { %2500 = vmatmul.mubr.f32.vlgmr.msra.gmra.mrb[12].mxu0 %v7199_v20  ;;  %2571 = vmatmul.mubr.f32.vlgmr.msra.gmra.mrb[34].mxu1 %v7199_v20 }
 0x7bc   :  { %4565 = vmatpush1.bf16.msra.mxu1 %v7920_v57  ;;  %2641 = vmatprep.mubr.f32.mxu1 %v7210_v32 }
 0x7bd   :  { %4567 = vmatprep.subr.bf16.mxu1 %v7921_v11  ;;  %4629 = vmatpush1.bf16.msra.mxu0 %v8191_v41  ;;  %v8245_v41 = vld [vmem:[#allocation91_spill] sm:$0xff] }
 0x7be   :  { %4631 = vmatprep.subr.bf16.mxu0 %v8192_v58  ;;  %v8246_v58 = vld [vmem:[#allocation78_spill] sm:$0xff] }
 0x7c0   :  { %4569 = vmatpush1.bf16.msra.mxu1 %v7922_v22 }
 0x7c1   :  { %4571 = vmatprep.subr.bf16.mxu1 %v7923_v36  ;;  %4633 = vmatpush1.bf16.msra.mxu0 %v8193_v50  ;;  %v8237_v50 = vld [vmem:[#allocation87_spill] sm:$0xff] }
 0x7c2   :  { %4635 = vmatprep.subr.bf16.mxu0 %v8194_v33  ;;  %v8233_v33 = vld [vmem:[#allocation85_spill] sm:$0xff] }
 0x7c4   :  { %4573 = vmatpush1.bf16.msra.mxu1 %v7924_v23 }
 0x7c5   :  { %4575 = vmatprep.subr.bf16.mxu1 %v7925_v29  ;;  %4637 = vmatpush1.bf16.msra.mxu0 %v8195_v13  ;;  %v8243_v13 = vld [vmem:[#allocation76_spill] sm:$0xff] }
 0x7c6   :  { %4639 = vmatprep.subr.bf16.mxu0 %v8196_v7  ;;  %v8242_v7 = vld [vmem:[#allocation74_spill] sm:$0xff] }
 0x7c8   :  { %4577 = vmatpush1.bf16.msra.mxu1 %v7926_v54 }
 0x7c9   :  { %4579 = vmatprep.subr.bf16.mxu1 %v7927_v15  ;;  %4641 = vmatpush1.bf16.msra.mxu0 %v8197_v61  ;;  %v8235_v61 = vld [vmem:[#allocation68_spill] sm:$0xff] }
 0x7ca   :  { %4643 = vmatprep.subr.bf16.mxu0 %v8198_v38  ;;  %v8238_v38 = vld [vmem:[#allocation70_spill] sm:$0xff] }
 0x7cc   :  { %4581 = vmatpush1.bf16.msra.mxu1 %v7928_v21 }
 0x7cd   :  { %4583 = vmatprep.subr.bf16.mxu1 %v7929_v46  ;;  %4645 = vmatpush1.bf16.msra.mxu0 %v8199_v12  ;;  %v8244_v12 = vld [vmem:[#allocation90_spill] sm:$0xff] }
 0x7ce   :  { %4647 = vmatprep.subr.bf16.mxu0 %v8200_v27  ;;  %v8232_v27 = vld [vmem:[#allocation84_spill] sm:$0xff] }
 0x7d0   :  { %4585 = vmatpush1.bf16.msra.mxu1 %v7930_v35 }
 0x7d1   :  { %4587 = vmatprep.subr.bf16.mxu1 %v7931_v37  ;;  %4649 = vmatpush1.bf16.msra.mxu0 %v8201_v16  ;;  %v8231_v16 = vld [vmem:[#allocation64_spill] sm:$0xff] }
 0x7d2   :  { %4651 = vmatprep.subr.bf16.mxu0 %v8202_v9  ;;  %v8230_v9 = vld [vmem:[#allocation62_spill] sm:$0xff] }
 0x7d4   :  { %4589 = vmatpush1.bf16.msra.mxu1 %v6178_v2 }
 0x7d5   :  { %4591 = vmatprep.subr.bf16.mxu1 %v6189_v6  ;;  %4653 = vmatpush1.bf16.msra.mxu0 %v8203_v62  ;;  %v8228_v62 = vld [vmem:[#allocation82_spill] sm:$0xff] }
 0x7d6   :  { %4655 = vmatprep.subr.bf16.mxu0 %v8204_v56  ;;  %v8227_v56 = vld [vmem:[#allocation60_spill] sm:$0xff] }
 0x7d8   :  { %4593 = vmatpush1.bf16.msra.mxu1 %v6208_v34 }
 0x7d9   :  { %4595 = vmatprep.subr.bf16.mxu1 %v7932_v53  ;;  %4657 = vmatpush1.bf16.msra.mxu0 %v8205_v45  ;;  %v8229_v45 = vld [vmem:[#allocation83_spill] sm:$0xff] }
 0x7da   :  { %4659 = vmatprep.subr.bf16.mxu0 %v8206_v14  ;;  %v8240_v14 = vld [vmem:[#allocation88_spill] sm:$0xff] }
 0x7dc   :  { %4597 = vmatpush1.bf16.msra.mxu1 %v6227_v19 }
 0x7dd   :  { %4599 = vmatprep.subr.bf16.mxu1 %v6231_v25  ;;  %4661 = vmatpush1.bf16.msra.mxu0 %v8207_v44  ;;  %v8236_v44 = vld [vmem:[#allocation86_spill] sm:$0xff] }
 0x7de   :  { %4663 = vmatprep.subr.bf16.mxu0 %v8208_v39  ;;  %v8234_v39 = vld [vmem:[#allocation66_spill] sm:$0xff] }
 0x7e0   :  { %4601 = vmatpush1.bf16.msra.mxu1 %v6248_v51 }
 0x7e1   :  { %4603 = vmatprep.subr.bf16.mxu1 %v6252_v48  ;;  %4665 = vmatpush1.bf16.msra.mxu0 %v8209_v28  ;;  %v8239_v28 = vld [vmem:[#allocation72_spill] sm:$0xff] }
 0x7e2   :  { %4667 = vmatprep.subr.bf16.mxu0 %v8227_v56  ;;  %v8264_v56 = vld [vmem:[#allocation17_spill] sm:$0xff] }
 0x7e4   :  { %4605 = vmatpush1.bf16.msra.mxu1 %v8228_v62 }
 0x7e5   :  { %4607 = vmatprep.subr.bf16.mxu1 %v8229_v45  ;;  %4669 = vmatpush1.bf16.msra.mxu0 %v8230_v9  ;;  %v8265_v9 = vld [vmem:[#allocation18_spill] sm:$0xff] }
 0x7e6   :  { %4671 = vmatprep.subr.bf16.mxu0 %v8231_v16  ;;  %v8266_v16 = vld [vmem:[#allocation19_spill] sm:$0xff] }
 0x7e8   :  { %4609 = vmatpush1.bf16.msra.mxu1 %v8232_v27 }
 0x7e9   :  { %4611 = vmatprep.subr.bf16.mxu1 %v8233_v33  ;;  %4673 = vmatpush1.bf16.msra.mxu0 %v8234_v39  ;;  %v8267_v39 = vld [vmem:[#allocation21_spill] sm:$0xff] }
 0x7ea   :  { %4675 = vmatprep.subr.bf16.mxu0 %v8235_v61  ;;  %v8268_v61 = vld [vmem:[#allocation23_spill] sm:$0xff] }
 0x7ec   :  { %4613 = vmatpush1.bf16.msra.mxu1 %v8236_v44 }
 0x7ed   :  { %4615 = vmatprep.subr.bf16.mxu1 %v8237_v50  ;;  %4677 = vmatpush1.bf16.msra.mxu0 %v8238_v38  ;;  %v8269_v38 = vld [vmem:[#allocation25_spill] sm:$0xff] }
 0x7ee   :  { %4679 = vmatprep.subr.bf16.mxu0 %v8239_v28  ;;  %v8270_v28 = vld [vmem:[#allocation27_spill] sm:$0xff] }
 0x7f0   :  { %4617 = vmatpush1.bf16.msra.mxu1 %v8240_v14 }
 0x7f1   :  { %4619 = vmatprep.subr.bf16.mxu1 %v8241_v24  ;;  %4681 = vmatpush1.bf16.msra.mxu0 %v8242_v7  ;;  %v8271_v7 = vld [vmem:[#allocation29_spill] sm:$0xff] }
 0x7f2   :  { %4683 = vmatprep.subr.bf16.mxu0 %v8243_v13  ;;  %v8272_v13 = vld [vmem:[#allocation31_spill] sm:$0xff] }
 0x7f4   :  { %4621 = vmatpush1.bf16.msra.mxu1 %v8244_v12 }
 0x7f5   :  { %4623 = vmatprep.subr.bf16.mxu1 %v8245_v41  ;;  %4685 = vmatpush1.bf16.msra.mxu0 %v8246_v58  ;;  %v8273_v58 = vld [vmem:[#allocation33_spill] sm:$0xff] }
 0x7f6   :  { %4687 = vmatprep.subr.bf16.mxu0 %v8247_v31  ;;  %v8274_v31 = vld [vmem:[#allocation35_spill] sm:$0xff] }
 0x7f8   :  { %4625 = vmatpush1.bf16.msra.mxu1 %v8248_v30 }
 0x7f9   :  { %4691 = vmatprep.subr.bf16.mxu1 %v8249_v1  ;;  %4689 = vmatpush1.bf16.msra.mxu0 %v8250_v0  ;;  %v8275_v1 = vld [vmem:[#allocation37_spill] sm:$0xff]  ;;  %v8276_v0 = vld [vmem:[#allocation39_spill] sm:$0xff] }
 0x7fa   :  { %4755 = vmatprep.subr.bf16.mxu0 %v8251_v26  ;;  %v8277_v26 = vld [vmem:[#allocation41_spill] sm:$0xff] }
 0x7fb   :  { %2642 = vmatmul.mubr.f32.vlgmr.msra.gmra.mrb[36].mxu1 %v7199_v20 }
 0x7fc   :  { %4693 = vmatpush1.bf16.msra.mxu1 %v8252_v10  ;;  %v8278_v10 = vld [vmem:[#allocation43_spill] sm:$0xff] }
 0x7fd   :  { %4695 = vmatprep.subr.bf16.mxu1 %v8253_v18  ;;  %v8279_v18 = vld [vmem:[#allocation45_spill] sm:$0xff] }
 0x800   :  { %4697 = vmatpush1.bf16.msra.mxu1 %v8254_v3  ;;  %v8280_v3 = vld [vmem:[#allocation47_spill] sm:$0xff] }
 0x801   :  { %4699 = vmatprep.subr.bf16.mxu1 %v8255_v60  ;;  %v8281_v60 = vld [vmem:[#allocation49_spill] sm:$0xff] }
 0x804   :  { %4701 = vmatpush1.bf16.msra.mxu1 %v8256_v8  ;;  %v8282_v8 = vld [vmem:[#allocation51_spill] sm:$0xff] }
 0x805   :  { %4703 = vmatprep.subr.bf16.mxu1 %v8257_v47 }
 0x808   :  { %4705 = vmatpush1.bf16.msra.mxu1 %v8258_v5 }
 0x809   :  { %4707 = vmatprep.subr.bf16.mxu1 %v8259_v17  ;;  %v8283_v17 = vld [vmem:[#allocation122_spill] sm:$0xff] }
 0x80c   :  { %4709 = vmatpush1.bf16.msra.mxu1 %v8260_v4 }
 0x80d   :  { %4711 = vmatprep.subr.bf16.mxu1 %v8261_v63 }
 0x810   :  { %4713 = vmatpush1.bf16.msra.mxu1 %v8262_v55 }
 0x811   :  { %4715 = vmatprep.subr.bf16.mxu1 %v8263_v43 }
 0x814   :  { %4717 = vmatpush1.bf16.msra.mxu1 %v8264_v56 }
 0x815   :  { %4719 = vmatprep.subr.bf16.mxu1 %v8265_v9 }
 0x818   :  { %4721 = vmatpush1.bf16.msra.mxu1 %v8266_v16  ;;  %v8284_v16 = vld [vmem:[#allocation95_spill] sm:$0xff] }
 0x819   :  { %4723 = vmatprep.subr.bf16.mxu1 %v8267_v39 }
 0x81c   :  { %4725 = vmatpush1.bf16.msra.mxu1 %v8268_v61 }
 0x81d   :  { %4727 = vmatprep.subr.bf16.mxu1 %v8269_v38 }
 0x820   :  { %4729 = vmatpush1.bf16.msra.mxu1 %v8270_v28 }
 0x821   :  { %4731 = vmatprep.subr.bf16.mxu1 %v8271_v7 }
 0x824   :  { %4733 = vmatpush1.bf16.msra.mxu1 %v8272_v13 }
 0x825   :  { %4735 = vmatprep.subr.bf16.mxu1 %v8273_v58 }
 0x828   :  { %4737 = vmatpush1.bf16.msra.mxu1 %v8274_v31 }
 0x829   :  { %4739 = vmatprep.subr.bf16.mxu1 %v8275_v1 }
 0x82c   :  { %4741 = vmatpush1.bf16.msra.mxu1 %v8276_v0  ;;  %v8285_v0 = vld [vmem:[#allocation104_spill] sm:$0xff] }
 0x82d   :  { %4743 = vmatprep.subr.bf16.mxu1 %v8277_v26 }
 0x830   :  { %4745 = vmatpush1.bf16.msra.mxu1 %v8278_v10 }
 0x831   :  { %4747 = vmatprep.subr.bf16.mxu1 %v8279_v18 }
 0x834   :  { %4749 = vmatpush1.bf16.msra.mxu1 %v8280_v3 }
 0x835   :  { %4751 = vmatprep.subr.bf16.mxu1 %v8281_v60 }
 0x838   :  { %4753 = vmatpush1.bf16.msra.mxu1 %v8282_v8 }
 0x88e   :  { %v2501_v47 = vpop.f32.mrb[12].mxu0  ;;  %v2572_v5 = vpop.f32.mrb[34].mxu1 }
 0x88f   :  { %v4875_v4 = vadd.f32 %v8283_v17, %v2501_v47  ;;  %v2503_v63 = vpop.f32.mrb[13].mxu0  ;;  %v2574_v55 = vpop.f32.mrb[35].mxu1  ;;  %v2573_v58 = vadd.f32 %v2572_v5, %v6557_v49 }
 0x890   :  { %v2575_v43 = vadd.f32 %v2574_v55, %v7978_v42  ;;  %v4877_v9 = vadd.f32 %v6551_v52, %v2503_v63 }
 0x891   :  { %v3139_v56 = vmul.f32 -1.442695, %v4875_v4 }
 0x892   :  { %v2676_v39 = vadd.f32 %v2575_v43, %v8284_v16  ;;  %v3140_v61 = vmul.f32 -1.442695, %v4877_v9 }
 0x893   :  { %5019 = vpow2.f32 %v3139_v56 }
 0x894   :  { %5021 = vpow2.f32 %v3140_v61  ;;  %v3141_v10 = vmul.f32 -1.442695, %v2676_v39  ;;  %v8286_v39 = vld [vmem:[#allocation109_spill] sm:$0xff] }
 0x89d   :  { %v5020_v38 = vpop.eup %5019 }
 0x89e   :  { %v2659_v28 = vadd.f32 1.0, %v5020_v38  ;;  %v5022_v7 = vpop.eup %5021 }
 0x89f   :  { %v2666_v13 = vadd.f32 1.0, %v5022_v7 }
 0x8a0   :  { %5023 = vrcp.f32 %v2659_v28  ;;  %v8287_v28 = vld [vmem:[#allocation110_spill] sm:$0xff] }
 0x8a1   :  { %5025 = vrcp.f32 %v2666_v13 }
 0x8aa   :  { %v5024_v31 = vpop.eup %5023 }
 0x8ab   :  { %v2669_v1 = vmul.f32 %v5024_v31, %v2573_v58  ;;  %v5026_v18 = vpop.eup %5025 }
 0x8ac   :  { %v2672_v3 = vsub.f32 1.0, %v5026_v18  ;;  %v2674_v47 = vmul.f32 %v5026_v18, %v7199_v20 }
 0x8ad   :  { %v2670_v26 = vadd.f32 %v2669_v1, %v8285_v0 }
 0x8af   :  { %5027 = vtanh.f32 %v2670_v26 }
 0x8b0   :  { %5029 = vpow2.f32 %v3141_v10 }
 0x8b9   :  { %v5028_v60 = vpop.eup %5027 }
 0x8ba   :  { %v2673_v8 = vmul.f32 %v5028_v60, %v2672_v3  ;;  %v5030_v5 = vpop.eup %5029  ;;  %v2981_v3 = vld [vmem:[%s7504_s5 + $0x50] sm:$0xff]  ;;  %v2982_v60 = vld [vmem:[%s7504_s5 + $0x58] sm:$0xff] }
 0x8bb   :  { %v2680_v63 = vadd.f32 1.0, %v5030_v5  ;;  %v3000_v5 = vld [vmem:[%s7504_s5 + $0xe8] sm:$0xff] }
 0x8bc   :  { %v7324_v4 = vadd.f32 %v2674_v47, %v2673_v8  ;;  %v2999_v47 = vld [vmem:[%s7504_s5 + $0xe0] sm:$0xff] }
 0x8bd   :  { %5031 = vrcp.f32 %v2680_v63  ;;  %v4840_v63 = vpack.c.bf16 %v2982_v60, %v2981_v3 }
 0x8be   :  { %3143 = vst [vmem:[%s7503_s7 + $0x60] sm:$0xff] %v7324_v4 }
 0x8c7   :  { %v5032_v16 = vpop.eup %5031 }
 0x8ce   :  { %v2643_v55 = vpop.f32.mrb[36].mxu1 }
 0x8cf   :  { %v2644_v43 = vadd.f32 %v2643_v55, %v6564_v59  ;;  %v2645_v56 = vpop.f32.mrb[37].mxu1  ;;  %v4842_v55 = vpack.c.bf16 %v3000_v5, %v2999_v47 }
 0x8d0   :  { %v2646_v9 = vadd.f32 %v2645_v56, %v6568_v40  ;;  %v2984_v56 = vld [vmem:[%s7504_s5 + $0x68] sm:$0xff] }
 0x8d1   :  { %v2683_v61 = vadd.f32 %v2644_v43, %v8286_v39  ;;  %v2983_v43 = vld [vmem:[%s7504_s5 + $0x60] sm:$0xff] }
 0x8d2   :  { %v2690_v20 = vmul.f32 %v5032_v16, %v2646_v9  ;;  %v3001_v9 = vld [vmem:[%s7504_s5 + $0xf0] sm:$0xff]  ;;  %v3002_v16 = vld [vmem:[%s7504_s5 + $0xf8] sm:$0xff]  ;;  %v4844_v39 = vpack.c.bf16 %v2984_v56, %v2983_v43 }
 0x8d3   :  { %v3142_v38 = vmul.f32 -1.442695, %v2683_v61  ;;  %v4846_v61 = vpack.c.bf16 %v3002_v16, %v3001_v9 }
 0x8d4   :  { %v2691_v7 = vadd.f32 %v2690_v20, %v8287_v28  ;;  %v2985_v20 = vld [vmem:[%s7504_s5 + $0x70] sm:$0xff] }
 0x8d5   :  { %5033 = vpow2.f32 %v3142_v38  ;;  %v2986_v38 = vld [vmem:[%s7504_s5 + $0x78] sm:$0xff] }
 0x8d6   :  { %v4848_v28 = vpack.c.bf16 %v2986_v38, %v2985_v20 }
 0x8df   :  { %v5034_v13 = vpop.eup %5033 }
 0x8e0   :  { %v2687_v58 = vadd.f32 1.0, %v5034_v13 }
 0x8e2   :  { %5035 = vrcp.f32 %v2687_v58 }
 0x8e3   :  { %5037 = vtanh.f32 %v2691_v7 }
 0x8ec   :  { %v5036_v31 = vpop.eup %5035 }
 0x8ed   :  { %v2693_v1 = vsub.f32 1.0, %v5036_v31  ;;  %v5038_v0 = vpop.eup %5037  ;;  %v2695_v10 = vmul.f32 %v5036_v31, %v7210_v32 }
 0x8ef   :  { %v2694_v26 = vmul.f32 %v5038_v0, %v2693_v1 }
 0x8f1   :  { %v7335_v18 = vadd.f32 %v2695_v10, %v2694_v26 }
 0x8f3   :  { %3144 = vst [vmem:[%s7503_s7 + $0x18] sm:$0xff] %v7335_v18  ;;  %2767 = vmatprep.mubr.f32.mxu0 %v7335_v18  ;;  %2838 = vmatprep.mubr.f32.mxu1 %v7335_v18 }
 0x8f4   :  { %2768 = vmatmul.mubr.f32.vlgmr.msra.gmra.mrb[14].mxu0 %v7324_v4  ;;  %2839 = vmatmul.mubr.f32.vlgmr.msra.gmra.mrb[38].mxu1 %v7324_v4 }
 0x8f5   :  { %4757 = vmatpush1.bf16.msra.mxu0 %v7920_v57  ;;  %2909 = vmatprep.mubr.f32.mxu0 %v7335_v18  ;;  %v2990_v57 = vld [vmem:[%s7504_s5 + $0x98] sm:$0xff] }
 0x8f6   :  { %4759 = vmatprep.subr.bf16.mxu0 %v7921_v11 }
 0x8f9   :  { %4761 = vmatpush1.bf16.msra.mxu0 %v7922_v22  ;;  %v2973_v22 = vld [vmem:[%s7504_s5 + $0x10] sm:$0xff] }
 0x8fa   :  { %4763 = vmatprep.subr.bf16.mxu0 %v7923_v36  ;;  %v2974_v36 = vld [vmem:[%s7504_s5 + $0x18] sm:$0xff] }
 0x8fd   :  { %4765 = vmatpush1.bf16.msra.mxu0 %v7924_v23  ;;  %v4824_v23 = vpack.c.bf16 %v2974_v36, %v2973_v22  ;;  %v8289_v22 = vld [vmem:[#allocation106_spill] sm:$0xff] }
 0x8fe   :  { %4767 = vmatprep.subr.bf16.mxu0 %v7925_v29  ;;  %v2991_v29 = vld [vmem:[%s7504_s5 + $0xa0] sm:$0xff] }
 0x901   :  { %4769 = vmatpush1.bf16.msra.mxu0 %v7926_v54  ;;  %v2992_v54 = vld [vmem:[%s7504_s5 + $0xa8] sm:$0xff] }
 0x902   :  { %4771 = vmatprep.subr.bf16.mxu0 %v7927_v15  ;;  %v4826_v15 = vpack.c.bf16 %v2992_v54, %v2991_v29 }
 0x905   :  { %4773 = vmatpush1.bf16.msra.mxu0 %v7928_v21  ;;  %v2975_v21 = vld [vmem:[%s7504_s5 + $0x20] sm:$0xff] }
 0x906   :  { %4775 = vmatprep.subr.bf16.mxu0 %v7929_v46  ;;  %v2976_v46 = vld [vmem:[%s7504_s5 + $0x28] sm:$0xff] }
 0x909   :  { %4777 = vmatpush1.bf16.msra.mxu0 %v7930_v35  ;;  %v4828_v35 = vpack.c.bf16 %v2976_v46, %v2975_v21 }
 0x90a   :  { %4779 = vmatprep.subr.bf16.mxu0 %v7931_v37  ;;  %v2993_v37 = vld [vmem:[%s7504_s5 + $0xb0] sm:$0xff] }
 0x90d   :  { %4781 = vmatpush1.bf16.msra.mxu0 %v6178_v2  ;;  %v2987_v2 = vld [vmem:[%s7504_s5 + $0x80] sm:$0xff] }
 0x90e   :  { %4783 = vmatprep.subr.bf16.mxu0 %v6189_v6  ;;  %v2988_v6 = vld [vmem:[%s7504_s5 + $0x88] sm:$0xff] }
 0x911   :  { %4785 = vmatpush1.bf16.msra.mxu0 %v6208_v34  ;;  %v4818_v34 = vpack.c.bf16 %v2988_v6, %v2987_v2  ;;  %v8288_v2 = vld [vmem:[#allocation93_spill] sm:$0xff] }
 0x912   :  { %4787 = vmatprep.subr.bf16.mxu0 %v7932_v53  ;;  %v2994_v53 = vld [vmem:[%s7504_s5 + $0xb8] sm:$0xff] }
 0x913   :  { %4819 = vmatprep.subr.bf16.mxu1 %v4818_v34  ;;  %v4830_v32 = vpack.c.bf16 %v2994_v53, %v2993_v37 }
 0x915   :  { %4789 = vmatpush1.bf16.msra.mxu0 %v6227_v19  ;;  %v2971_v19 = vld [vmem:[%s7504_s5] sm:$0xff] }
 0x916   :  { %4791 = vmatprep.subr.bf16.mxu0 %v6231_v25  ;;  %v2972_v25 = vld [vmem:[%s7504_s5 + $0x8] sm:$0xff] }
 0x919   :  { %4793 = vmatpush1.bf16.msra.mxu0 %v6248_v51  ;;  %v4820_v51 = vpack.c.bf16 %v2972_v25, %v2971_v19 }
 0x91a   :  { %4795 = vmatprep.subr.bf16.mxu0 %v6252_v48  ;;  %v2989_v48 = vld [vmem:[%s7504_s5 + $0x90] sm:$0xff] }
 0x91b   :  { %4821 = vmatpush3.bf16.msra.mxu1 %v4820_v51  ;;  %v4822_v11 = vpack.c.bf16 %v2990_v57, %v2989_v48 }
 0x91d   :  { %4797 = vmatpush1.bf16.msra.mxu0 %v8228_v62  ;;  %4823 = vmatprep.subr.bf16.mxu1 %v4822_v11  ;;  %v2977_v62 = vld [vmem:[%s7504_s5 + $0x30] sm:$0xff] }
 0x91e   :  { %4799 = vmatprep.subr.bf16.mxu0 %v8229_v45  ;;  %v2978_v45 = vld [vmem:[%s7504_s5 + $0x38] sm:$0xff] }
 0x91f   :  { %4825 = vmatpush3.bf16.msra.mxu1 %v4824_v23 }
 0x920   :  { %4827 = vmatprep.subr.bf16.mxu1 %v4826_v15 }
 0x921   :  { %4801 = vmatpush1.bf16.msra.mxu0 %v8232_v27  ;;  %v4832_v27 = vpack.c.bf16 %v2978_v45, %v2977_v62  ;;  %v8290_v45 = vld [vmem:[#allocation107_spill] sm:$0xff] }
 0x922   :  { %4803 = vmatprep.subr.bf16.mxu0 %v8233_v33  ;;  %v2995_v33 = vld [vmem:[%s7504_s5 + $0xc0] sm:$0xff] }
 0x923   :  { %4829 = vmatpush3.bf16.msra.mxu1 %v4828_v35 }
 0x924   :  { %4831 = vmatprep.subr.bf16.mxu1 %v4830_v32 }
 0x925   :  { %4805 = vmatpush1.bf16.msra.mxu0 %v8236_v44  ;;  %v2996_v44 = vld [vmem:[%s7504_s5 + $0xc8] sm:$0xff] }
 0x926   :  { %4807 = vmatprep.subr.bf16.mxu0 %v8237_v50  ;;  %v4834_v50 = vpack.c.bf16 %v2996_v44, %v2995_v33 }
 0x927   :  { %4833 = vmatpush3.bf16.msra.mxu1 %v4832_v27 }
 0x928   :  { %4835 = vmatprep.subr.bf16.mxu1 %v4834_v50 }
 0x929   :  { %4809 = vmatpush1.bf16.msra.mxu0 %v8240_v14  ;;  %v2979_v14 = vld [vmem:[%s7504_s5 + $0x40] sm:$0xff] }
 0x92a   :  { %4811 = vmatprep.subr.bf16.mxu0 %v8241_v24  ;;  %v2980_v24 = vld [vmem:[%s7504_s5 + $0x48] sm:$0xff] }
 0x92d   :  { %4813 = vmatpush1.bf16.msra.mxu0 %v8244_v12  ;;  %v2997_v12 = vld [vmem:[%s7504_s5 + $0xd0] sm:$0xff] }
 0x92e   :  { %4815 = vmatprep.subr.bf16.mxu0 %v8245_v41  ;;  %v4836_v41 = vpack.c.bf16 %v2980_v24, %v2979_v14 }
 0x930   :  { %4837 = vmatpush3.bf16.msra.mxu1 %v4836_v41 }
 0x931   :  { %4817 = vmatpush1.bf16.msra.mxu0 %v8248_v30  ;;  %v2998_v30 = vld [vmem:[%s7504_s5 + $0xd8] sm:$0xff] }
 0x932   :  { %v4838_v8 = vpack.c.bf16 %v2998_v30, %v2997_v12 }
 0x934   :  { %2910 = vmatmul.mubr.f32.vlgmr.msra.gmra.mrb[38].mxu0 %v7324_v4  ;;  %4839 = vmatprep.subr.bf16.mxu1 %v4838_v8  ;;  %v3150_v8 = vld [vmem:[%s7505_s6] ss:$0 sm:$0xff] }
 0x935   :  { %4841 = vmatpush3.bf16.msra.mxu1 %v4840_v63 }
 0x936   :  { %4843 = vmatprep.subr.bf16.mxu1 %v4842_v55 }
 0x939   :  { %4845 = vmatpush3.bf16.msra.mxu1 %v4844_v39 }
 0x93a   :  { %4847 = vmatprep.subr.bf16.mxu1 %v4846_v61 }
 0x93d   :  { %4849 = vmatpush3.bf16.msra.mxu1 %v4848_v28 }
 0x9c7   :  { %v2769_v7 = vpop.f32.mrb[14].mxu0  ;;  %v2840_v13 = vpop.f32.mrb[38].mxu1 }
 0x9c8   :  { %v4879_v58 = vadd.f32 %v8283_v17, %v2769_v7  ;;  %v2771_v31 = vpop.f32.mrb[15].mxu0  ;;  %v2842_v1 = vpop.f32.mrb[39].mxu1  ;;  %v2841_v57 = vadd.f32 %v2840_v13, %v6557_v49 }
 0x9c9   :  { %v2843_v0 = vadd.f32 %v2842_v1, %v7978_v42  ;;  %v4881_v10 = vadd.f32 %v6551_v52, %v2771_v31 }
 0x9ca   :  { %v3145_v26 = vmul.f32 -1.442695, %v4879_v58 }
 0x9cb   :  { %v2944_v6 = vadd.f32 %v2843_v0, %v8288_v2  ;;  %v3146_v34 = vmul.f32 -1.442695, %v4881_v10 }
 0x9cc   :  { %5039 = vpow2.f32 %v3145_v26 }
 0x9cd   :  { %5041 = vpow2.f32 %v3146_v34  ;;  %v3147_v36 = vmul.f32 -1.442695, %v2944_v6 }
 0x9d6   :  { %v5040_v19 = vpop.eup %5039 }
 0x9d7   :  { %v2927_v25 = vadd.f32 1.0, %v5040_v19  ;;  %v5042_v51 = vpop.eup %5041 }
 0x9d8   :  { %v2934_v48 = vadd.f32 1.0, %v5042_v51 }
 0x9d9   :  { %5043 = vrcp.f32 %v2927_v25 }
 0x9da   :  { %5045 = vrcp.f32 %v2934_v48 }
 0x9e3   :  { %v5044_v17 = vpop.eup %5043 }
 0x9e4   :  { %v2937_v11 = vmul.f32 %v5044_v17, %v2841_v57  ;;  %v5046_v52 = vpop.eup %5045 }
 0x9e5   :  { %v2940_v23 = vsub.f32 1.0, %v5046_v52  ;;  %v2942_v15 = vmul.f32 %v5046_v52, %v7324_v4  ;;  %v8291_v4 = vld [vmem:[#allocation108_spill] sm:$0xff] }
 0x9e6   :  { %v2938_v42 = vadd.f32 %v2937_v11, %v8289_v22 }
 0x9e8   :  { %5047 = vtanh.f32 %v2938_v42 }
 0x9e9   :  { %5049 = vpow2.f32 %v3147_v36 }
 0x9f2   :  { %v5048_v29 = vpop.eup %5047 }
 0x9f3   :  { %v2941_v54 = vmul.f32 %v5048_v29, %v2940_v23  ;;  %v5050_v49 = vpop.eup %5049 }
 0x9f4   :  { %v2948_v46 = vadd.f32 1.0, %v5050_v49 }
 0x9f5   :  { %v2943_v21 = vadd.f32 %v2942_v15, %v2941_v54 }
 0x9f6   :  { %5051 = vrcp.f32 %v2948_v46 }
 0x9f7   :  { %3149 = vst [vmem:[%s7503_s7 + $0x70] sm:$0xff] %v2943_v21 }
 0xa00   :  { %v5052_v62 = vpop.eup %5051 }
 0xa07   :  { %v2911_v35 = vpop.f32.mrb[38].mxu0 }
 0xa08   :  { %v2912_v37 = vadd.f32 %v2911_v35, %v6564_v59  ;;  %v2913_v53 = vpop.f32.mrb[39].mxu0 }
 0xa09   :  { %v2914_v32 = vadd.f32 %v2913_v53, %v6568_v40 }
 0xa0a   :  { %v2951_v27 = vadd.f32 %v2912_v37, %v8290_v45 }
 0xa0b   :  { %v2958_v33 = vmul.f32 %v5052_v62, %v2914_v32 }
 0xa0c   :  { %v3148_v44 = vmul.f32 -1.442695, %v2951_v27 }
 0xa0d   :  { %v2959_v50 = vadd.f32 %v2958_v33, %v8291_v4 }
 0xa0e   :  { %5053 = vpow2.f32 %v3148_v44 }
 0xa18   :  { %v5054_v14 = vpop.eup %5053 }
 0xa19   :  { %v2955_v24 = vadd.f32 1.0, %v5054_v14 }
 0xa1b   :  { %5055 = vrcp.f32 %v2955_v24 }
 0xa1c   :  { %5057 = vtanh.f32 %v2959_v50 }
 0xa25   :  { %v5056_v12 = vpop.eup %5055 }
 0xa26   :  { %v2961_v41 = vsub.f32 1.0, %v5056_v12  ;;  %v5058_v30 = vpop.eup %5057  ;;  %v2963_v59 = vmul.f32 %v5056_v12, %v7335_v18 }
 0xa28   :  { %v2962_v3 = vmul.f32 %v5058_v30, %v2961_v41 }
 0xa2a   :  { %v2964_v60 = vadd.f32 %v2963_v59, %v2962_v3 }
 0xa2c   :  { %2968 = vst [vmem:[%s7503_s7 + $0x8] sm:$0xff] %v2964_v60  ;;  %3074 = vmatprep.mubr.f32.mxu1 %v2964_v60 }
 0xa2d   :  { %3075 = vmatmul.mubr.f32.vlgmr.msra.gmra.mrb[40].mxu1 %v2943_v21 }
 0xb00   :  { %v3183_v40 = vpop.f32.mrb[40].mxu1 }
 0xb01   :  { %v3184_v47 = vpop.f32.mrb[41].mxu1 }
 0xb02   :  { %v3185_v5 = vadd.f32 %v3184_v47, %v3183_v40 }
 0xb04   :  { %v3077_v63 = vadd.f32 %v3185_v5, %v3150_v8 }
 0xb06   :  { %5059 = vtanh.f32 %v3077_v63 }
 0xb10   :  { %v5060_v55 = vpop.eup %5059 }
 0xb11   :  { %3081 = vst [vmem:[%s7506_s8] sm:$0xff] %v5060_v55 }

</bundles_post_ra>
